<compile_context>
chip_gen: v6e
topology: v6e:2x2x1
jax: 0.10.0
libtpu: 0.0.40
codegen_flags: <defaults>
</compile_context>

<pallas_src>
import math

import jax
import jax.numpy as jnp
from jax.experimental import pallas as pl
from jax.experimental.pallas import tpu as pltpu

# ------------------------ configuration (small shapes) ----------------------
N_PROTS  = 64     # module default 919
IN_CH    = 32     # module default 512 (in_channels)
N_HEADS  = 4
DEPTH    = IN_CH // N_HEADS
N_HID    = 32     # must equal IN_CH: layer adds ff + out1 residually
FF_HID   = 2048   # hard coded in FeedForward
N_LAYERS = 2
EPS      = 1e-5   # nn.LayerNorm default


def _vmem():
    return pl.BlockSpec(memory_space=pltpu.MemorySpace.VMEM)


def _smem():
    return pl.BlockSpec(memory_space=pltpu.MemorySpace.SMEM)


def _pick_row_tile(n):
    """Row-tile size for the node dimension (keeps the (8,128) rule happy)."""
    if n % 8 != 0:
        return n              # fall back to a single full block
    for t in (512, 256, 128):
        if n % t == 0:
            return t
    return 8


# ------------------------------ Pallas kernels -------------------------------
def _pe_add_kernel(emb_ref, acts_ref, w_ref, b_ref, o_ref):
    # x = emb(global_idx) + Linear(2, C)(acts)
    acts = acts_ref[...]                                   # (N, 2)
    proj = (acts[:, 0:1] * w_ref[0:1, :]                   # (N,1)*(1,C)
            + acts[:, 1:2] * w_ref[1:2, :]
            + b_ref[...])
    o_ref[...] = emb_ref[...] + proj


def _qkv_bias_kernel(scal_ref, x_ref, adj_ref, wqkv_ref, qkv_ref, bias_ref):
    # Fused QKV projection.  The 1/sqrt(in_channels) logit scale is folded
    # into the Q third of wqkv at init, so no per-logit scaling later.
    qkv_ref[...] = jnp.dot(x_ref[...], wqkv_ref[...],
                           preferred_element_type=jnp.float32)   # (tile, 3C)

    # 1x1 Conv2d(3 -> 1) over the channels-first adjacency view + bias,
    # pre-scaled by `param` (scal = [w0, w1, w2, conv_b, param, 0, 0, 0]).
    adj = adj_ref[...]                                            # (3, tile, N)
    bias_ref[...] = scal_ref[4] * (scal_ref[0] * adj[0]
                                   + scal_ref[1] * adj[1]
                                   + scal_ref[2] * adj[2]
                                   + scal_ref[3])                 # (tile, N)


def _attn_head_kernel(bias_ref, q_ref, k_ref, v_ref, o_ref):
    # One attention head per grid step (grid axis is "parallel" -> megacore).
    q = q_ref[...]                                                # (N, D)
    k = k_ref[...]
    s = jax.lax.dot_general(q, k, (((1,), (1,)), ((), ())),
                            preferred_element_type=jnp.float32)   # (N, N)
    logits = s + bias_ref[...]          # scale already folded into Q weights

    # softmax over the last dim; divide moved to the EUP via reciprocal
    m = jnp.max(logits, axis=-1, keepdims=True)
    e = jnp.exp(logits - m)
    denom = jnp.sum(e, axis=-1, keepdims=True)
    p = e * pl.reciprocal(denom, approx=True)

    o_ref[...] = jnp.dot(p, v_ref[...],
                         preferred_element_type=jnp.float32)      # (N, D)


def _post_kernel(x_ref, a_ref, wout_ref, ln1g_ref, ln1b_ref,
                 w1_ref, b1_ref, w2_ref, b2_ref, ln2g_ref, ln2b_ref,
                 prelu_ref, o_ref):
    # attn_out = lin_out(attn)           (dropout p=0.1 -> identity, inference)
    attn = jnp.dot(a_ref[...], wout_ref[...], preferred_element_type=jnp.float32)
    h = x_ref[...] + attn

    # out1 = LayerNorm1(x + attn_out)
    mu = jnp.mean(h, axis=-1, keepdims=True)
    var = jnp.mean(jnp.square(h - mu), axis=-1, keepdims=True)
    out1 = (h - mu) * jax.lax.rsqrt(var + EPS) * ln1g_ref[...] + ln1b_ref[...]

    # FeedForward: relu(ff1) -> ff2      (dropout p=0.05 -> identity, inference)
    f = jnp.dot(out1, w1_ref[...], preferred_element_type=jnp.float32) + b1_ref[...]
    f = jnp.maximum(f, 0.0)
    f2 = jnp.dot(f, w2_ref[...], preferred_element_type=jnp.float32) + b2_ref[...]

    # out2 = LayerNorm2(ff + out1)
    h2 = f2 + out1
    mu2 = jnp.mean(h2, axis=-1, keepdims=True)
    var2 = jnp.mean(jnp.square(h2 - mu2), axis=-1, keepdims=True)
    out2 = (h2 - mu2) * jax.lax.rsqrt(var2 + EPS) * ln2g_ref[...] + ln2b_ref[...]

    # PReLU(C) with per-channel slope
    o_ref[...] = jnp.where(out2 > 0, out2, prelu_ref[...] * out2)


# ------------------------------ kernel wrappers ------------------------------
def pe_add(x_emb, acts, w_t, b):
    N, C = x_emb.shape
    return pl.pallas_call(
        _pe_add_kernel,
        out_shape=jax.ShapeDtypeStruct((N, C), jnp.float32),
        in_specs=[_vmem()] * 4,
        out_specs=_vmem(),
    )(x_emb, acts, w_t, b)


def qkv_bias(scal, x, adj3, wqkv_t):
    N, C = x.shape
    tn = _pick_row_tile(N)
    return pl.pallas_call(
        _qkv_bias_kernel,
        out_shape=(jax.ShapeDtypeStruct((N, 3 * C), jnp.float32),
                   jax.ShapeDtypeStruct((N, N), jnp.float32)),
        grid=(N // tn,),
        in_specs=[
            _smem(),                                          # scal
            pl.BlockSpec((tn, C), lambda i: (i, 0)),          # x
            pl.BlockSpec((3, tn, N), lambda i: (0, i, 0)),    # adj3
            pl.BlockSpec((C, 3 * C), lambda i: (0, 0)),       # wqkv_t (resident)
        ],
        out_specs=(pl.BlockSpec((tn, 3 * C), lambda i: (i, 0)),
                   pl.BlockSpec((tn, N), lambda i: (i, 0))),
        compiler_params=pltpu.CompilerParams(dimension_semantics=("parallel",)),
    )(scal, x, adj3, wqkv_t)


def attn_heads(bias, qh, kh, vh):
    H, N, D = qh.shape
    head_in = pl.BlockSpec((None, N, D), lambda h: (h, 0, 0))
    return pl.pallas_call(
        _attn_head_kernel,
        out_shape=jax.ShapeDtypeStruct((H, N, D), jnp.float32),
        grid=(H,),
        in_specs=[pl.BlockSpec((N, N), lambda h: (0, 0)),     # bias (resident)
                  head_in, head_in, head_in],
        out_specs=pl.BlockSpec((None, N, D), lambda h: (h, 0, 0)),
        compiler_params=pltpu.CompilerParams(dimension_semantics=("parallel",)),
    )(bias, qh, kh, vh)


def post_attention(x, a2d, lp):
    N, C = x.shape
    tn = _pick_row_tile(N)
    row = lambda i: (i, 0)
    cst = lambda i: (0, 0)
    return pl.pallas_call(
        _post_kernel,
        out_shape=jax.ShapeDtypeStruct((N, C), jnp.float32),
        grid=(N // tn,),
        in_specs=[
            pl.BlockSpec((tn, C), row),              # x
            pl.BlockSpec((tn, C), row),              # a2d
            pl.BlockSpec((C, C), cst),               # wout_t
            pl.BlockSpec((1, C), cst),               # ln1_g
            pl.BlockSpec((1, C), cst),               # ln1_b
            pl.BlockSpec((C, FF_HID), cst),          # ff1_w_t
            pl.BlockSpec((1, FF_HID), cst),          # ff1_b
            pl.BlockSpec((FF_HID, N_HID), cst),      # ff2_w_t
            pl.BlockSpec((1, N_HID), cst),           # ff2_b
            pl.BlockSpec((1, N_HID), cst),           # ln2_g
            pl.BlockSpec((1, N_HID), cst),           # ln2_b
            pl.BlockSpec((1, C), cst),               # prelu
        ],
        out_specs=pl.BlockSpec((tn, C), row),
        compiler_params=pltpu.CompilerParams(dimension_semantics=("parallel",)),
    )(x, a2d, lp["wout_t"], lp["ln1_g"], lp["ln1_b"],
      lp["ff1_w_t"], lp["ff1_b"], lp["ff2_w_t"], lp["ff2_b"],
      lp["ln2_g"], lp["ln2_b"], lp["prelu"])


# ------------------------------- forward pass --------------------------------
def encoder_layer(x, adj3, lp):
    N, C = x.shape
    qkv, bias = qkv_bias(lp["scal"], x, adj3, lp["wqkv_t"])     # (N,3C), (N,N)
    q, k, v = qkv[:, :C], qkv[:, C:2 * C], qkv[:, 2 * C:]
    # split_heads is a *raw* view in torch: (N, C).view(H, -1, D) == reshape.
    # Kept in glue: row-major reinterpretation, free in HBM.
    qh = q.reshape(N_HEADS, N, DEPTH)
    kh = k.reshape(N_HEADS, N, DEPTH)
    vh = v.reshape(N_HEADS, N, DEPTH)
    ah = attn_heads(bias, qh, kh, vh)                           # (H, N, D)
    # torch: attn_out.reshape(x.size(0), in_channels) -- raw reshape again
    a2d = ah.reshape(N, C)
    return post_attention(x, a2d, lp)


def encoder_forward(params, global_idx, acts, edge_index, sign, weight):
    N = global_idx.shape[0]
    # embedding lookup (sparse gather) -- glue
    x_emb = params["emb"][global_idx]
    # PostEncoding: x = emb + Linear(2, C)(acts)
    x = pe_add(x_emb, acts.astype(jnp.float32), params["pe_w_t"], params["pe_b"])

    # data.edge_attr = cat(sign, weight.view(-1, 1))
    edge_attr = jnp.concatenate([sign, weight[:, None]], axis=-1)      # (E, 3)
    # to_dense_adj(edge_index, None, edge_attr) -> (1, N, N, 3); duplicates summed
    adj = jnp.zeros((N, N, 3), jnp.float32).at[edge_index[0], edge_index[1]].add(edge_attr)
    # torch: adj_w_sign.view(1, 3, N, -1)  == raw row-major reinterpretation
    adj3 = adj.reshape(3, N, N)

    # TODO(synk): the optional `seq_mat` positional-attention branch and the
    # torch_geometric Batch block-diagonal -inf mask branch are not taken
    # (the synthetic `data` has neither attribute), matching the module's
    # hasattr/isinstance gating.
    for lp in params["layers"]:
        x = encoder_layer(x, adj3, lp)
    return x


# ----------------------------- parameter init --------------------------------
def init_params(key):
    keys = jax.random.split(key, 2 + N_LAYERS)
    p = {}
    # nn.Embedding(n_prots, C), uniform(-0.1, 0.1)
    p["emb"] = jax.random.uniform(keys[0], (N_PROTS, IN_CH), jnp.float32, -0.1, 0.1)
    # PostEncoding: Linear(2, C)
    pe_w = jax.random.normal(keys[1], (IN_CH, 2), jnp.float32) * 0.1    # (out, in)
    p["pe_w_t"] = pe_w.T                                                # (2, C)
    p["pe_b"] = jnp.zeros((1, IN_CH), jnp.float32)

    inv_sqrt_c = 1.0 / math.sqrt(IN_CH)
    layers = []
    for li in range(N_LAYERS):
        lk = jax.random.split(keys[2 + li], 10)
        s = 0.05
        wq = jax.random.normal(lk[0], (IN_CH, IN_CH), jnp.float32) * s
        wk = jax.random.normal(lk[1], (IN_CH, IN_CH), jnp.float32) * s
        wv = jax.random.normal(lk[2], (IN_CH, IN_CH), jnp.float32) * s
        wo = jax.random.normal(lk[3], (IN_CH, IN_CH), jnp.float32) * s
        conv_w = jax.random.uniform(lk[4], (3,), jnp.float32, 0.0, 1.0)  # uniform_ init
        conv_b = 0.0                                                      # zeros_
        param = 5.0                                                       # tensor(5.).clamp_min(1.)
        ff1_w = jax.random.normal(lk[5], (FF_HID, IN_CH), jnp.float32) * 0.02   # (out, in)
        ff1_b = jnp.zeros((1, FF_HID), jnp.float32)
        ff2_w = jax.random.normal(lk[6], (N_HID, FF_HID), jnp.float32) * 0.02   # (out, in)
        ff2_b = jnp.zeros((1, N_HID), jnp.float32)
        layers.append({
            # fused QKV weight; 1/sqrt(in_channels) folded into the Q columns
            "wqkv_t": jnp.concatenate([wq.T * inv_sqrt_c, wk.T, wv.T], axis=1),  # (C, 3C)
            "wout_t": wo.T,
            "scal": jnp.array([conv_w[0], conv_w[1], conv_w[2], conv_b,
                               param, 0.0, 0.0, 0.0], jnp.float32),
            "ln1_g": jnp.ones((1, IN_CH), jnp.float32),
            "ln1_b": jnp.zeros((1, IN_CH), jnp.float32),
            "ln2_g": jnp.ones((1, N_HID), jnp.float32),
            "ln2_b": jnp.zeros((1, N_HID), jnp.float32),
            "ff1_w_t": ff1_w.T,       # (C, 2048)
            "ff1_b": ff1_b,
            "ff2_w_t": ff2_w.T,       # (2048, C)
            "ff2_b": ff2_b,
            "prelu": jnp.full((1, IN_CH), 0.25, jnp.float32),   # nn.PReLU(C) default
        })
    p["layers"] = layers
    return p


# ----------------------------------- main -------------------------------------
if __name__ == "__main__":
    key = jax.random.PRNGKey(0)
    pkey, dkey = jax.random.split(key)
    params = init_params(pkey)

    N, E = 16, 24
    k1, k2, k3, k4, k5, k6 = jax.random.split(dkey, 6)
    global_idx = jax.random.randint(k1, (N,), 0, N_PROTS)
    acts = jax.random.normal(k2, (N, 2), jnp.float32)
    src = jax.random.randint(k3, (E,), 0, N)
    dst = jax.random.randint(k4, (E,), 0, N)
    edge_index = jnp.stack([src, dst])                               # (2, E)
    sign = jnp.where(jax.random.bernoulli(k5, 0.5, (E, 2)), 1.0, -1.0).astype(jnp.float32)
    weight = jax.random.normal(k6, (E,), jnp.float32)

    fwd = jax.jit(encoder_forward)
    out = fwd(params, global_idx, acts, edge_index, sign, weight)
    out = jax.block_until_ready(out)

    assert out.shape == (N, IN_CH), out.shape
    assert bool(jnp.all(jnp.isfinite(out)))
    print("KERNEL_OK")
</pallas_src>

<mosaic_0001>
module attributes {stable_mosaic.version = 11 : i64} {
  func.func @_pe_add_kernel(%arg0: memref<16x32xf32, #tpu.memory_space<vmem>>, %arg1: memref<16x2xf32, #tpu.memory_space<vmem>>, %arg2: memref<2x32xf32, #tpu.memory_space<vmem>>, %arg3: memref<1x32xf32, #tpu.memory_space<vmem>>, %arg4: memref<16x32xf32, #tpu.memory_space<vmem>>) attributes {dimension_semantics = [], scalar_prefetch = 0 : i64, scratch_operands = 0 : i64, tpu.core_type = #tpu.core_type<tc>} {
    %c0 = arith.constant 0 : index
    %c0_0 = arith.constant 0 : index
    %0 = vector.load %arg1[%c0, %c0_0] : memref<16x2xf32, #tpu.memory_space<vmem>>, vector<16x2xf32>
    %1 = vector.extract_strided_slice %0 {offsets = [0, 0], sizes = [16, 1], strides = [1, 1]} : vector<16x2xf32> to vector<16x1xf32>
    %c0_1 = arith.constant 0 : index
    %c0_2 = arith.constant 0 : index
    %2 = vector.load %arg2[%c0_1, %c0_2] : memref<2x32xf32, #tpu.memory_space<vmem>>, vector<1x32xf32>
    %3 = vector.broadcast %1 : vector<16x1xf32> to vector<16x32xf32>
    %4 = vector.broadcast %2 : vector<1x32xf32> to vector<16x32xf32>
    %5 = arith.mulf %3, %4 : vector<16x32xf32>
    %6 = vector.extract_strided_slice %0 {offsets = [0, 1], sizes = [16, 1], strides = [1, 1]} : vector<16x2xf32> to vector<16x1xf32>
    %c1 = arith.constant 1 : index
    %c0_3 = arith.constant 0 : index
    %7 = vector.load %arg2[%c1, %c0_3] : memref<2x32xf32, #tpu.memory_space<vmem>>, vector<1x32xf32>
    %8 = vector.broadcast %6 : vector<16x1xf32> to vector<16x32xf32>
    %9 = vector.broadcast %7 : vector<1x32xf32> to vector<16x32xf32>
    %10 = arith.mulf %8, %9 : vector<16x32xf32>
    %11 = arith.addf %5, %10 : vector<16x32xf32>
    %c0_4 = arith.constant 0 : index
    %c0_5 = arith.constant 0 : index
    %12 = vector.load %arg3[%c0_4, %c0_5] : memref<1x32xf32, #tpu.memory_space<vmem>>, vector<1x32xf32>
    %13 = vector.broadcast %12 : vector<1x32xf32> to vector<16x32xf32>
    %14 = arith.addf %11, %13 : vector<16x32xf32>
    %c0_6 = arith.constant 0 : index
    %c0_7 = arith.constant 0 : index
    %15 = vector.load %arg0[%c0_6, %c0_7] : memref<16x32xf32, #tpu.memory_space<vmem>>, vector<16x32xf32>
    %16 = arith.addf %15, %14 : vector<16x32xf32>
    %c0_8 = arith.constant 0 : index
    %c0_9 = arith.constant 0 : index
    %17 = vector.load %arg4[%c0_8, %c0_9] : memref<16x32xf32, #tpu.memory_space<vmem>>, vector<16x32xf32>
    tpu.vector_store %arg4[%c0_8, %c0_9], %16 {strides = array<i32>} : memref<16x32xf32, #tpu.memory_space<vmem>>, vector<16x32xf32>,
    return
  }
}

module attributes {stable_mosaic.version = 11 : i64} {
  func.func @_qkv_bias_kernel(%arg0: i32, %arg1: memref<8xf32, #tpu.memory_space<smem>>, %arg2: memref<8x32xf32, #tpu.memory_space<vmem>>, %arg3: memref<3x8x16xf32, #tpu.memory_space<vmem>>, %arg4: memref<32x96xf32, #tpu.memory_space<vmem>>, %arg5: memref<8x96xf32, #tpu.memory_space<vmem>>, %arg6: memref<8x16xf32, #tpu.memory_space<vmem>>) attributes {dimension_semantics = [#tpu.dimension_semantics<parallel>], iteration_bounds = array<i64: 2>, scalar_prefetch = 0 : i64, scratch_operands = 0 : i64, tpu.core_type = #tpu.core_type<tc>, window_params = [{transform_indices = @transform_0, window_bounds = array<i64: 8>}, {transform_indices = @transform_1, window_bounds = array<i64: 8, 32>}, {transform_indices = @transform_2, window_bounds = array<i64: 3, 8, 16>}, {pipeline_mode = #tpu.pipeline_mode<synchronous>, transform_indices = @transform_3, window_bounds = array<i64: 32, 96>}, {transform_indices = @transform_4, window_bounds = array<i64: 8, 96>}, {transform_indices = @transform_5, window_bounds = array<i64: 8, 16>}]} {
    %c0 = arith.constant 0 : index
    %c0_0 = arith.constant 0 : index
    %0 = vector.load %arg2[%c0, %c0_0] : memref<8x32xf32, #tpu.memory_space<vmem>>, vector<8x32xf32>
    %c0_1 = arith.constant 0 : index
    %c0_2 = arith.constant 0 : index
    %1 = vector.load %arg4[%c0_1, %c0_2] : memref<32x96xf32, #tpu.memory_space<vmem>>, vector<32x96xf32>
    %cst = arith.constant dense<0.000000e+00> : vector<8x96xf32>
    %2 = tpu.matmul %0, %1, %cst {dimension_numbers = #tpu.dot_dimension_numbers<[1], [0], [0], [1], [0, 0, 1, 1], [], []>} : vector<8x32xf32>, vector<32x96xf32>, vector<8x96xf32> -> vector<8x96xf32>
    %c0_3 = arith.constant 0 : index
    %c0_4 = arith.constant 0 : index
    %3 = vector.load %arg5[%c0_3, %c0_4] : memref<8x96xf32, #tpu.memory_space<vmem>>, vector<8x96xf32>
    tpu.vector_store %arg5[%c0_3, %c0_4], %2 {strides = array<i32>} : memref<8x96xf32, #tpu.memory_space<vmem>>, vector<8x96xf32>,
    %c0_5 = arith.constant 0 : index
    %c0_6 = arith.constant 0 : index
    %c0_7 = arith.constant 0 : index
    %4 = vector.load %arg3[%c0_5, %c0_6, %c0_7] : memref<3x8x16xf32, #tpu.memory_space<vmem>>, vector<3x8x16xf32>
    %c4 = arith.constant 4 : index
    %5 = memref.load %arg1[%c4] : memref<8xf32, #tpu.memory_space<smem>>
    %c0_8 = arith.constant 0 : index
    %6 = memref.load %arg1[%c0_8] : memref<8xf32, #tpu.memory_space<smem>>
    %7 = vector.extract_strided_slice %4 {offsets = [0, 0, 0], sizes = [1, 8, 16], strides = [1, 1, 1]} : vector<3x8x16xf32> to vector<1x8x16xf32>
    %8 = vector.shape_cast %7 : vector<1x8x16xf32> to vector<8x16xf32>
    %9 = vector.broadcast %6 : f32 to vector<8x16xf32>
    %10 = arith.mulf %9, %8 : vector<8x16xf32>
    %c1 = arith.constant 1 : index
    %11 = memref.load %arg1[%c1] : memref<8xf32, #tpu.memory_space<smem>>
    %12 = vector.extract_strided_slice %4 {offsets = [1, 0, 0], sizes = [1, 8, 16], strides = [1, 1, 1]} : vector<3x8x16xf32> to vector<1x8x16xf32>
    %13 = vector.shape_cast %12 : vector<1x8x16xf32> to vector<8x16xf32>
    %14 = vector.broadcast %11 : f32 to vector<8x16xf32>
    %15 = arith.mulf %14, %13 : vector<8x16xf32>
    %16 = arith.addf %10, %15 : vector<8x16xf32>
    %c2 = arith.constant 2 : index
    %17 = memref.load %arg1[%c2] : memref<8xf32, #tpu.memory_space<smem>>
    %18 = vector.extract_strided_slice %4 {offsets = [2, 0, 0], sizes = [1, 8, 16], strides = [1, 1, 1]} : vector<3x8x16xf32> to vector<1x8x16xf32>
    %19 = vector.shape_cast %18 : vector<1x8x16xf32> to vector<8x16xf32>
    %20 = vector.broadcast %17 : f32 to vector<8x16xf32>
    %21 = arith.mulf %20, %19 : vector<8x16xf32>
    %22 = arith.addf %16, %21 : vector<8x16xf32>
    %c3 = arith.constant 3 : index
    %23 = memref.load %arg1[%c3] : memref<8xf32, #tpu.memory_space<smem>>
    %24 = vector.broadcast %23 : f32 to vector<8x16xf32>
    %25 = arith.addf %22, %24 : vector<8x16xf32>
    %26 = vector.broadcast %5 : f32 to vector<8x16xf32>
    %27 = arith.mulf %26, %25 : vector<8x16xf32>
    %c0_9 = arith.constant 0 : index
    %c0_10 = arith.constant 0 : index
    %28 = vector.load %arg6[%c0_9, %c0_10] : memref<8x16xf32, #tpu.memory_space<vmem>>, vector<8x16xf32>
    tpu.vector_store %arg6[%c0_9, %c0_10], %27 {strides = array<i32>} : memref<8x16xf32, #tpu.memory_space<vmem>>, vector<8x16xf32>,
    return
  }
  func.func @transform_0(%arg0: i32) -> i32 {
    %c0_i32 = arith.constant 0 : i32
    %c0_i32_0 = arith.constant 0 : i32
    return %c0_i32 : i32
  }
  func.func @transform_1(%arg0: i32) -> (i32, i32) {
    %c0_i32 = arith.constant 0 : i32
    %c0_i32_0 = arith.constant 0 : i32
    return %arg0, %c0_i32 : i32, i32
  }
  func.func @transform_2(%arg0: i32) -> (i32, i32, i32) {
    %c0_i32 = arith.constant 0 : i32
    %c0_i32_0 = arith.constant 0 : i32
    %c0_i32_1 = arith.constant 0 : i32
    return %c0_i32, %arg0, %c0_i32_0 : i32, i32, i32
  }
  func.func @transform_3(%arg0: i32) -> (i32, i32) {
    %c0_i32 = arith.constant 0 : i32
    %c0_i32_0 = arith.constant 0 : i32
    %c0_i32_1 = arith.constant 0 : i32
    return %c0_i32, %c0_i32_0 : i32, i32
  }
  func.func @transform_4(%arg0: i32) -> (i32, i32) {
    %c0_i32 = arith.constant 0 : i32
    %c0_i32_0 = arith.constant 0 : i32
    return %arg0, %c0_i32 : i32, i32
  }
  func.func @transform_5(%arg0: i32) -> (i32, i32) {
    %c0_i32 = arith.constant 0 : i32
    %c0_i32_0 = arith.constant 0 : i32
    return %arg0, %c0_i32 : i32, i32
  }
}

module attributes {stable_mosaic.version = 11 : i64} {
  func.func @_attn_head_kernel(%arg0: i32, %arg1: memref<16x16xf32, #tpu.memory_space<vmem>>, %arg2: memref<1x16x8xf32, #tpu.memory_space<vmem>>, %arg3: memref<1x16x8xf32, #tpu.memory_space<vmem>>, %arg4: memref<1x16x8xf32, #tpu.memory_space<vmem>>, %arg5: memref<1x16x8xf32, #tpu.memory_space<vmem>>) attributes {dimension_semantics = [#tpu.dimension_semantics<parallel>], iteration_bounds = array<i64: 4>, scalar_prefetch = 0 : i64, scratch_operands = 0 : i64, tpu.core_type = #tpu.core_type<tc>, window_params = [{pipeline_mode = #tpu.pipeline_mode<synchronous>, transform_indices = @transform_0, window_bounds = array<i64: 16, 16>}, {transform_indices = @transform_1, window_bounds = array<i64: 1, 16, 8>}, {transform_indices = @transform_2, window_bounds = array<i64: 1, 16, 8>}, {transform_indices = @transform_3, window_bounds = array<i64: 1, 16, 8>}, {transform_indices = @transform_4, window_bounds = array<i64: 1, 16, 8>}]} {
    %c0 = arith.constant 0 : index
    %c0_0 = arith.constant 0 : index
    %c0_1 = arith.constant 0 : index
    %0 = vector.load %arg2[%c0, %c0_0, %c0_1] : memref<1x16x8xf32, #tpu.memory_space<vmem>>, vector<1x16x8xf32>
    %1 = vector.shape_cast %0 : vector<1x16x8xf32> to vector<16x8xf32>
    %c0_2 = arith.constant 0 : index
    %c0_3 = arith.constant 0 : index
    %c0_4 = arith.constant 0 : index
    %2 = vector.load %arg3[%c0_2, %c0_3, %c0_4] : memref<1x16x8xf32, #tpu.memory_space<vmem>>, vector<1x16x8xf32>
    %3 = vector.shape_cast %2 : vector<1x16x8xf32> to vector<16x8xf32>
    %cst = arith.constant dense<0.000000e+00> : vector<16x16xf32>
    %4 = tpu.matmul %1, %3, %cst {dimension_numbers = #tpu.dot_dimension_numbers<[1], [1], [0], [0], [0, 0, 1, 0], [], []>} : vector<16x8xf32>, vector<16x8xf32>, vector<16x16xf32> -> vector<16x16xf32>
    %c0_5 = arith.constant 0 : index
    %c0_6 = arith.constant 0 : index
    %5 = vector.load %arg1[%c0_5, %c0_6] : memref<16x16xf32, #tpu.memory_space<vmem>>, vector<16x16xf32>
    %6 = arith.addf %4, %5 : vector<16x16xf32>
    %cst_7 = arith.constant dense<0xFF800000> : vector<16xf32>
    %7 = vector.multi_reduction <maximumf>, %6, %cst_7 [1] : vector<16x16xf32> to vector<16xf32>
    %8 = vector.shape_cast %7 : vector<16xf32> to vector<16x1xf32>
    %9 = vector.broadcast %8 : vector<16x1xf32> to vector<16x16xf32>
    %10 = arith.subf %6, %9 : vector<16x16xf32>
    %11 = math.exp %10 : vector<16x16xf32>
    %cst_8 = arith.constant dense<0.000000e+00> : vector<16xf32>
    %12 = vector.multi_reduction <add>, %11, %cst_8 [1] : vector<16x16xf32> to vector<16xf32>
    %13 = vector.shape_cast %12 : vector<16xf32> to vector<16x1xf32>
    %14 = tpu.reciprocal %13 {approx = true} : vector<16x1xf32> -> vector<16x1xf32>
    %15 = vector.broadcast %14 : vector<16x1xf32> to vector<16x16xf32>
    %16 = arith.mulf %11, %15 : vector<16x16xf32>
    %c0_9 = arith.constant 0 : index
    %c0_10 = arith.constant 0 : index
    %c0_11 = arith.constant 0 : index
    %17 = vector.load %arg4[%c0_9, %c0_10, %c0_11] : memref<1x16x8xf32, #tpu.memory_space<vmem>>, vector<1x16x8xf32>
    %18 = vector.shape_cast %17 : vector<1x16x8xf32> to vector<16x8xf32>
    %cst_12 = arith.constant dense<0.000000e+00> : vector<16x8xf32>
    %19 = tpu.matmul %16, %18, %cst_12 {dimension_numbers = #tpu.dot_dimension_numbers<[1], [0], [0], [1], [0, 0, 1, 1], [], []>} : vector<16x16xf32>, vector<16x8xf32>, vector<16x8xf32> -> vector<16x8xf32>
    %c0_13 = arith.constant 0 : index
    %c0_14 = arith.constant 0 : index
    %c0_15 = arith.constant 0 : index
    %20 = vector.load %arg5[%c0_13, %c0_14, %c0_15] : memref<1x16x8xf32, #tpu.memory_space<vmem>>, vector<1x16x8xf32>
    %21 = vector.shape_cast %20 : vector<1x16x8xf32> to vector<16x8xf32>
    %22 = vector.shape_cast %19 : vector<16x8xf32> to vector<1x16x8xf32>
    tpu.vector_store %arg5[%c0_13, %c0_14, %c0_15], %22 {strides = array<i32>} : memref<1x16x8xf32, #tpu.memory_space<vmem>>, vector<1x16x8xf32>,
    return
  }
  func.func @transform_0(%arg0: i32) -> (i32, i32) {
    %c0_i32 = arith.constant 0 : i32
    %c0_i32_0 = arith.constant 0 : i32
    %c0_i32_1 = arith.constant 0 : i32
    return %c0_i32, %c0_i32_0 : i32, i32
  }
  func.func @transform_1(%arg0: i32) -> (i32, i32, i32) {
    %c0_i32 = arith.constant 0 : i32
    %c0_i32_0 = arith.constant 0 : i32
    %c0_i32_1 = arith.constant 0 : i32
    return %arg0, %c0_i32, %c0_i32_0 : i32, i32, i32
  }
  func.func @transform_2(%arg0: i32) -> (i32, i32, i32) {
    %c0_i32 = arith.constant 0 : i32
    %c0_i32_0 = arith.constant 0 : i32
    %c0_i32_1 = arith.constant 0 : i32
    return %arg0, %c0_i32, %c0_i32_0 : i32, i32, i32
  }
  func.func @transform_3(%arg0: i32) -> (i32, i32, i32) {
    %c0_i32 = arith.constant 0 : i32
    %c0_i32_0 = arith.constant 0 : i32
    %c0_i32_1 = arith.constant 0 : i32
    return %arg0, %c0_i32, %c0_i32_0 : i32, i32, i32
  }
  func.func @transform_4(%arg0: i32) -> (i32, i32, i32) {
    %c0_i32 = arith.constant 0 : i32
    %c0_i32_0 = arith.constant 0 : i32
    %c0_i32_1 = arith.constant 0 : i32
    return %arg0, %c0_i32, %c0_i32_0 : i32, i32, i32
  }
}

module attributes {stable_mosaic.version = 11 : i64} {
  func.func @_post_kernel(%arg0: i32, %arg1: memref<8x32xf32, #tpu.memory_space<vmem>>, %arg2: memref<8x32xf32, #tpu.memory_space<vmem>>, %arg3: memref<32x32xf32, #tpu.memory_space<vmem>>, %arg4: memref<1x32xf32, #tpu.memory_space<vmem>>, %arg5: memref<1x32xf32, #tpu.memory_space<vmem>>, %arg6: memref<32x2048xf32, #tpu.memory_space<vmem>>, %arg7: memref<1x2048xf32, #tpu.memory_space<vmem>>, %arg8: memref<2048x32xf32, #tpu.memory_space<vmem>>, %arg9: memref<1x32xf32, #tpu.memory_space<vmem>>, %arg10: memref<1x32xf32, #tpu.memory_space<vmem>>, %arg11: memref<1x32xf32, #tpu.memory_space<vmem>>, %arg12: memref<1x32xf32, #tpu.memory_space<vmem>>, %arg13: memref<8x32xf32, #tpu.memory_space<vmem>>) attributes {dimension_semantics = [#tpu.dimension_semantics<parallel>], iteration_bounds = array<i64: 2>, scalar_prefetch = 0 : i64, scratch_operands = 0 : i64, tpu.core_type = #tpu.core_type<tc>, window_params = [{transform_indices = @transform_0, window_bounds = array<i64: 8, 32>}, {transform_indices = @transform_1, window_bounds = array<i64: 8, 32>}, {pipeline_mode = #tpu.pipeline_mode<synchronous>, transform_indices = @transform_2, window_bounds = array<i64: 32, 32>}, {pipeline_mode = #tpu.pipeline_mode<synchronous>, transform_indices = @transform_3, window_bounds = array<i64: 1, 32>}, {pipeline_mode = #tpu.pipeline_mode<synchronous>, transform_indices = @transform_4, window_bounds = array<i64: 1, 32>}, {pipeline_mode = #tpu.pipeline_mode<synchronous>, transform_indices = @transform_5, window_bounds = array<i64: 32, 2048>}, {pipeline_mode = #tpu.pipeline_mode<synchronous>, transform_indices = @transform_6, window_bounds = array<i64: 1, 2048>}, {pipeline_mode = #tpu.pipeline_mode<synchronous>, transform_indices = @transform_7, window_bounds = array<i64: 2048, 32>}, {pipeline_mode = #tpu.pipeline_mode<synchronous>, transform_indices = @transform_8, window_bounds = array<i64: 1, 32>}, {pipeline_mode = #tpu.pipeline_mode<synchronous>, transform_indices = @transform_9, window_bounds = array<i64: 1, 32>}, {pipeline_mode = #tpu.pipeline_mode<synchronous>, transform_indices = @transform_10, window_bounds = array<i64: 1, 32>}, {pipeline_mode = #tpu.pipeline_mode<synchronous>, transform_indices = @transform_11, window_bounds = array<i64: 1, 32>}, {transform_indices = @transform_12, window_bounds = array<i64: 8, 32>}]} {
    %c0 = arith.constant 0 : index
    %c0_0 = arith.constant 0 : index
    %0 = vector.load %arg2[%c0, %c0_0] : memref<8x32xf32, #tpu.memory_space<vmem>>, vector<8x32xf32>
    %c0_1 = arith.constant 0 : index
    %c0_2 = arith.constant 0 : index
    %1 = vector.load %arg3[%c0_1, %c0_2] : memref<32x32xf32, #tpu.memory_space<vmem>>, vector<32x32xf32>
    %cst = arith.constant dense<0.000000e+00> : vector<8x32xf32>
    %2 = tpu.matmul %0, %1, %cst {dimension_numbers = #tpu.dot_dimension_numbers<[1], [0], [0], [1], [0, 0, 1, 1], [], []>} : vector<8x32xf32>, vector<32x32xf32>, vector<8x32xf32> -> vector<8x32xf32>
    %c0_3 = arith.constant 0 : index
    %c0_4 = arith.constant 0 : index
    %3 = vector.load %arg1[%c0_3, %c0_4] : memref<8x32xf32, #tpu.memory_space<vmem>>, vector<8x32xf32>
    %4 = arith.addf %3, %2 : vector<8x32xf32>
    %cst_5 = arith.constant dense<0.000000e+00> : vector<8xf32>
    %5 = vector.multi_reduction <add>, %4, %cst_5 [1] : vector<8x32xf32> to vector<8xf32>
    %6 = vector.shape_cast %5 : vector<8xf32> to vector<8x1xf32>
    %cst_6 = arith.constant 3.200000e+01 : f32
    %7 = vector.broadcast %cst_6 : f32 to vector<8x1xf32>
    %8 = arith.divf %6, %7 : vector<8x1xf32>
    %9 = vector.broadcast %8 : vector<8x1xf32> to vector<8x32xf32>
    %10 = arith.subf %4, %9 : vector<8x32xf32>
    %11 = arith.mulf %10, %10 : vector<8x32xf32>
    %cst_7 = arith.constant dense<0.000000e+00> : vector<8xf32>
    %12 = vector.multi_reduction <add>, %11, %cst_7 [1] : vector<8x32xf32> to vector<8xf32>
    %13 = vector.shape_cast %12 : vector<8xf32> to vector<8x1xf32>
    %cst_8 = arith.constant 3.200000e+01 : f32
    %14 = vector.broadcast %cst_8 : f32 to vector<8x1xf32>
    %15 = arith.divf %13, %14 : vector<8x1xf32>
    %16 = vector.broadcast %8 : vector<8x1xf32> to vector<8x32xf32>
    %17 = arith.subf %4, %16 : vector<8x32xf32>
    %cst_9 = arith.constant 9.99999974E-6 : f32
    %18 = vector.broadcast %cst_9 : f32 to vector<8x1xf32>
    %19 = arith.addf %15, %18 : vector<8x1xf32>
    %20 = math.rsqrt %19 : vector<8x1xf32>
    %21 = vector.broadcast %20 : vector<8x1xf32> to vector<8x32xf32>
    %22 = arith.mulf %17, %21 : vector<8x32xf32>
    %c0_10 = arith.constant 0 : index
    %c0_11 = arith.constant 0 : index
    %23 = vector.load %arg4[%c0_10, %c0_11] : memref<1x32xf32, #tpu.memory_space<vmem>>, vector<1x32xf32>
    %24 = vector.broadcast %23 : vector<1x32xf32> to vector<8x32xf32>
    %25 = arith.mulf %22, %24 : vector<8x32xf32>
    %c0_12 = arith.constant 0 : index
    %c0_13 = arith.constant 0 : index
    %26 = vector.load %arg5[%c0_12, %c0_13] : memref<1x32xf32, #tpu.memory_space<vmem>>, vector<1x32xf32>
    %27 = vector.broadcast %26 : vector<1x32xf32> to vector<8x32xf32>
    %28 = arith.addf %25, %27 : vector<8x32xf32>
    %c0_14 = arith.constant 0 : index
    %c0_15 = arith.constant 0 : index
    %29 = vector.load %arg6[%c0_14, %c0_15] : memref<32x2048xf32, #tpu.memory_space<vmem>>, vector<32x2048xf32>
    %cst_16 = arith.constant dense<0.000000e+00> : vector<8x2048xf32>
    %30 = tpu.matmul %28, %29, %cst_16 {dimension_numbers = #tpu.dot_dimension_numbers<[1], [0], [0], [1], [0, 0, 1, 1], [], []>} : vector<8x32xf32>, vector<32x2048xf32>, vector<8x2048xf32> -> vector<8x2048xf32>
    %c0_17 = arith.constant 0 : index
    %c0_18 = arith.constant 0 : index
    %31 = vector.load %arg7[%c0_17, %c0_18] : memref<1x2048xf32, #tpu.memory_space<vmem>>, vector<1x2048xf32>
    %32 = vector.broadcast %31 : vector<1x2048xf32> to vector<8x2048xf32>
    %33 = arith.addf %30, %32 : vector<8x2048xf32>
    %cst_19 = arith.constant 0.000000e+00 : f32
    %34 = vector.broadcast %cst_19 : f32 to vector<8x2048xf32>
    %35 = arith.maximumf %33, %34 : vector<8x2048xf32>
    %c0_20 = arith.constant 0 : index
    %c0_21 = arith.constant 0 : index
    %36 = vector.load %arg8[%c0_20, %c0_21] : memref<2048x32xf32, #tpu.memory_space<vmem>>, vector<2048x32xf32>
    %cst_22 = arith.constant dense<0.000000e+00> : vector<8x32xf32>
    %37 = tpu.matmul %35, %36, %cst_22 {dimension_numbers = #tpu.dot_dimension_numbers<[1], [0], [0], [1], [0, 0, 1, 1], [], []>} : vector<8x2048xf32>, vector<2048x32xf32>, vector<8x32xf32> -> vector<8x32xf32>
    %c0_23 = arith.constant 0 : index
    %c0_24 = arith.constant 0 : index
    %38 = vector.load %arg9[%c0_23, %c0_24] : memref<1x32xf32, #tpu.memory_space<vmem>>, vector<1x32xf32>
    %39 = vector.broadcast %38 : vector<1x32xf32> to vector<8x32xf32>
    %40 = arith.addf %37, %39 : vector<8x32xf32>
    %41 = arith.addf %40, %28 : vector<8x32xf32>
    %cst_25 = arith.constant dense<0.000000e+00> : vector<8xf32>
    %42 = vector.multi_reduction <add>, %41, %cst_25 [1] : vector<8x32xf32> to vector<8xf32>
    %43 = vector.shape_cast %42 : vector<8xf32> to vector<8x1xf32>
    %cst_26 = arith.constant 3.200000e+01 : f32
    %44 = vector.broadcast %cst_26 : f32 to vector<8x1xf32>
    %45 = arith.divf %43, %44 : vector<8x1xf32>
    %46 = vector.broadcast %45 : vector<8x1xf32> to vector<8x32xf32>
    %47 = arith.subf %41, %46 : vector<8x32xf32>
    %48 = arith.mulf %47, %47 : vector<8x32xf32>
    %cst_27 = arith.constant dense<0.000000e+00> : vector<8xf32>
    %49 = vector.multi_reduction <add>, %48, %cst_27 [1] : vector<8x32xf32> to vector<8xf32>
    %50 = vector.shape_cast %49 : vector<8xf32> to vector<8x1xf32>
    %cst_28 = arith.constant 3.200000e+01 : f32
    %51 = vector.broadcast %cst_28 : f32 to vector<8x1xf32>
    %52 = arith.divf %50, %51 : vector<8x1xf32>
    %53 = vector.broadcast %45 : vector<8x1xf32> to vector<8x32xf32>
    %54 = arith.subf %41, %53 : vector<8x32xf32>
    %cst_29 = arith.constant 9.99999974E-6 : f32
    %55 = vector.broadcast %cst_29 : f32 to vector<8x1xf32>
    %56 = arith.addf %52, %55 : vector<8x1xf32>
    %57 = math.rsqrt %56 : vector<8x1xf32>
    %58 = vector.broadcast %57 : vector<8x1xf32> to vector<8x32xf32>
    %59 = arith.mulf %54, %58 : vector<8x32xf32>
    %c0_30 = arith.constant 0 : index
    %c0_31 = arith.constant 0 : index
    %60 = vector.load %arg10[%c0_30, %c0_31] : memref<1x32xf32, #tpu.memory_space<vmem>>, vector<1x32xf32>
    %61 = vector.broadcast %60 : vector<1x32xf32> to vector<8x32xf32>
    %62 = arith.mulf %59, %61 : vector<8x32xf32>
    %c0_32 = arith.constant 0 : index
    %c0_33 = arith.constant 0 : index
    %63 = vector.load %arg11[%c0_32, %c0_33] : memref<1x32xf32, #tpu.memory_space<vmem>>, vector<1x32xf32>
    %64 = vector.broadcast %63 : vector<1x32xf32> to vector<8x32xf32>
    %65 = arith.addf %62, %64 : vector<8x32xf32>
    %cst_34 = arith.constant 0.000000e+00 : f32
    %66 = vector.broadcast %cst_34 : f32 to vector<8x32xf32>
    %67 = arith.cmpf ogt, %65, %66 : vector<8x32xf32>
    %c0_35 = arith.constant 0 : index
    %c0_36 = arith.constant 0 : index
    %68 = vector.load %arg12[%c0_35, %c0_36] : memref<1x32xf32, #tpu.memory_space<vmem>>, vector<1x32xf32>
    %69 = vector.broadcast %68 : vector<1x32xf32> to vector<8x32xf32>
    %70 = arith.mulf %69, %65 : vector<8x32xf32>
    %71 = arith.select %67, %65, %70 : vector<8x32xi1>, vector<8x32xf32>
    %c0_37 = arith.constant 0 : index
    %c0_38 = arith.constant 0 : index
    %72 = vector.load %arg13[%c0_37, %c0_38] : memref<8x32xf32, #tpu.memory_space<vmem>>, vector<8x32xf32>
    tpu.vector_store %arg13[%c0_37, %c0_38], %71 {strides = array<i32>} : memref<8x32xf32, #tpu.memory_space<vmem>>, vector<8x32xf32>,
    return
  }
  func.func @transform_0(%arg0: i32) -> (i32, i32) {
    %c0_i32 = arith.constant 0 : i32
    %c0_i32_0 = arith.constant 0 : i32
    return %arg0, %c0_i32 : i32, i32
  }
  func.func @transform_1(%arg0: i32) -> (i32, i32) {
    %c0_i32 = arith.constant 0 : i32
    %c0_i32_0 = arith.constant 0 : i32
    return %arg0, %c0_i32 : i32, i32
  }
  func.func @transform_2(%arg0: i32) -> (i32, i32) {
    %c0_i32 = arith.constant 0 : i32
    %c0_i32_0 = arith.constant 0 : i32
    %c0_i32_1 = arith.constant 0 : i32
    return %c0_i32, %c0_i32_0 : i32, i32
  }
  func.func @transform_3(%arg0: i32) -> (i32, i32) {
    %c0_i32 = arith.constant 0 : i32
    %c0_i32_0 = arith.constant 0 : i32
    %c0_i32_1 = arith.constant 0 : i32
    return %c0_i32, %c0_i32_0 : i32, i32
  }
  func.func @transform_4(%arg0: i32) -> (i32, i32) {
    %c0_i32 = arith.constant 0 : i32
    %c0_i32_0 = arith.constant 0 : i32
    %c0_i32_1 = arith.constant 0 : i32
    return %c0_i32, %c0_i32_0 : i32, i32
  }
  func.func @transform_5(%arg0: i32) -> (i32, i32) {
    %c0_i32 = arith.constant 0 : i32
    %c0_i32_0 = arith.constant 0 : i32
    %c0_i32_1 = arith.constant 0 : i32
    return %c0_i32, %c0_i32_0 : i32, i32
  }
  func.func @transform_6(%arg0: i32) -> (i32, i32) {
    %c0_i32 = arith.constant 0 : i32
    %c0_i32_0 = arith.constant 0 : i32
    %c0_i32_1 = arith.constant 0 : i32
    return %c0_i32, %c0_i32_0 : i32, i32
  }
  func.func @transform_7(%arg0: i32) -> (i32, i32) {
    %c0_i32 = arith.constant 0 : i32
    %c0_i32_0 = arith.constant 0 : i32
    %c0_i32_1 = arith.constant 0 : i32
    return %c0_i32, %c0_i32_0 : i32, i32
  }
  func.func @transform_8(%arg0: i32) -> (i32, i32) {
    %c0_i32 = arith.constant 0 : i32
    %c0_i32_0 = arith.constant 0 : i32
    %c0_i32_1 = arith.constant 0 : i32
    return %c0_i32, %c0_i32_0 : i32, i32
  }
  func.func @transform_9(%arg0: i32) -> (i32, i32) {
    %c0_i32 = arith.constant 0 : i32
    %c0_i32_0 = arith.constant 0 : i32
    %c0_i32_1 = arith.constant 0 : i32
    return %c0_i32, %c0_i32_0 : i32, i32
  }
  func.func @transform_10(%arg0: i32) -> (i32, i32) {
    %c0_i32 = arith.constant 0 : i32
    %c0_i32_0 = arith.constant 0 : i32
    %c0_i32_1 = arith.constant 0 : i32
    return %c0_i32, %c0_i32_0 : i32, i32
  }
  func.func @transform_11(%arg0: i32) -> (i32, i32) {
    %c0_i32 = arith.constant 0 : i32
    %c0_i32_0 = arith.constant 0 : i32
    %c0_i32_1 = arith.constant 0 : i32
    return %c0_i32, %c0_i32_0 : i32, i32
  }
  func.func @transform_12(%arg0: i32) -> (i32, i32) {
    %c0_i32 = arith.constant 0 : i32
    %c0_i32_0 = arith.constant 0 : i32
    return %arg0, %c0_i32 : i32, i32
  }
}

module attributes {stable_mosaic.version = 11 : i64} {
  func.func @_post_kernel(%arg0: i32, %arg1: memref<8x32xf32, #tpu.memory_space<vmem>>, %arg2: memref<8x32xf32, #tpu.memory_space<vmem>>, %arg3: memref<32x32xf32, #tpu.memory_space<vmem>>, %arg4: memref<1x32xf32, #tpu.memory_space<vmem>>, %arg5: memref<1x32xf32, #tpu.memory_space<vmem>>, %arg6: memref<32x2048xf32, #tpu.memory_space<vmem>>, %arg7: memref<1x2048xf32, #tpu.memory_space<vmem>>, %arg8: memref<2048x32xf32, #tpu.memory_space<vmem>>, %arg9: memref<1x32xf32, #tpu.memory_space<vmem>>, %arg10: memref<1x32xf32, #tpu.memory_space<vmem>>, %arg11: memref<1x32xf32, #tpu.memory_space<vmem>>, %arg12: memref<1x32xf32, #tpu.memory_space<vmem>>, %arg13: memref<8x32xf32, #tpu.memory_space<vmem>>) attributes {dimension_semantics = [#tpu.dimension_semantics<parallel>], iteration_bounds = array<i64: 2>, scalar_prefetch = 0 : i64, scratch_operands = 0 : i64, tpu.core_type = #tpu.core_type<tc>, window_params = [{transform_indices = @transform_0, window_bounds = array<i64: 8, 32>}, {transform_indices = @transform_1, window_bounds = array<i64: 8, 32>}, {pipeline_mode = #tpu.pipeline_mode<synchronous>, transform_indices = @transform_2, window_bounds = array<i64: 32, 32>}, {pipeline_mode = #tpu.pipeline_mode<synchronous>, transform_indices = @transform_3, window_bounds = array<i64: 1, 32>}, {pipeline_mode = #tpu.pipeline_mode<synchronous>, transform_indices = @transform_4, window_bounds = array<i64: 1, 32>}, {pipeline_mode = #tpu.pipeline_mode<synchronous>, transform_indices = @transform_5, window_bounds = array<i64: 32, 2048>}, {pipeline_mode = #tpu.pipeline_mode<synchronous>, transform_indices = @transform_6, window_bounds = array<i64: 1, 2048>}, {pipeline_mode = #tpu.pipeline_mode<synchronous>, transform_indices = @transform_7, window_bounds = array<i64: 2048, 32>}, {pipeline_mode = #tpu.pipeline_mode<synchronous>, transform_indices = @transform_8, window_bounds = array<i64: 1, 32>}, {pipeline_mode = #tpu.pipeline_mode<synchronous>, transform_indices = @transform_9, window_bounds = array<i64: 1, 32>}, {pipeline_mode = #tpu.pipeline_mode<synchronous>, transform_indices = @transform_10, window_bounds = array<i64: 1, 32>}, {pipeline_mode = #tpu.pipeline_mode<synchronous>, transform_indices = @transform_11, window_bounds = array<i64: 1, 32>}, {transform_indices = @transform_12, window_bounds = array<i64: 8, 32>}]} {
    %c0 = arith.constant 0 : index
    %c0_0 = arith.constant 0 : index
    %0 = vector.load %arg2[%c0, %c0_0] : memref<8x32xf32, #tpu.memory_space<vmem>>, vector<8x32xf32>
    %c0_1 = arith.constant 0 : index
    %c0_2 = arith.constant 0 : index
    %1 = vector.load %arg3[%c0_1, %c0_2] : memref<32x32xf32, #tpu.memory_space<vmem>>, vector<32x32xf32>
    %cst = arith.constant dense<0.000000e+00> : vector<8x32xf32>
    %2 = tpu.matmul %0, %1, %cst {dimension_numbers = #tpu.dot_dimension_numbers<[1], [0], [0], [1], [0, 0, 1, 1], [], []>} : vector<8x32xf32>, vector<32x32xf32>, vector<8x32xf32> -> vector<8x32xf32>
    %c0_3 = arith.constant 0 : index
    %c0_4 = arith.constant 0 : index
    %3 = vector.load %arg1[%c0_3, %c0_4] : memref<8x32xf32, #tpu.memory_space<vmem>>, vector<8x32xf32>
    %4 = arith.addf %3, %2 : vector<8x32xf32>
    %cst_5 = arith.constant dense<0.000000e+00> : vector<8xf32>
    %5 = vector.multi_reduction <add>, %4, %cst_5 [1] : vector<8x32xf32> to vector<8xf32>
    %6 = vector.shape_cast %5 : vector<8xf32> to vector<8x1xf32>
    %cst_6 = arith.constant 3.200000e+01 : f32
    %7 = vector.broadcast %cst_6 : f32 to vector<8x1xf32>
    %8 = arith.divf %6, %7 : vector<8x1xf32>
    %9 = vector.broadcast %8 : vector<8x1xf32> to vector<8x32xf32>
    %10 = arith.subf %4, %9 : vector<8x32xf32>
    %11 = arith.mulf %10, %10 : vector<8x32xf32>
    %cst_7 = arith.constant dense<0.000000e+00> : vector<8xf32>
    %12 = vector.multi_reduction <add>, %11, %cst_7 [1] : vector<8x32xf32> to vector<8xf32>
    %13 = vector.shape_cast %12 : vector<8xf32> to vector<8x1xf32>
    %cst_8 = arith.constant 3.200000e+01 : f32
    %14 = vector.broadcast %cst_8 : f32 to vector<8x1xf32>
    %15 = arith.divf %13, %14 : vector<8x1xf32>
    %16 = vector.broadcast %8 : vector<8x1xf32> to vector<8x32xf32>
    %17 = arith.subf %4, %16 : vector<8x32xf32>
    %cst_9 = arith.constant 9.99999974E-6 : f32
    %18 = vector.broadcast %cst_9 : f32 to vector<8x1xf32>
    %19 = arith.addf %15, %18 : vector<8x1xf32>
    %20 = math.rsqrt %19 : vector<8x1xf32>
    %21 = vector.broadcast %20 : vector<8x1xf32> to vector<8x32xf32>
    %22 = arith.mulf %17, %21 : vector<8x32xf32>
    %c0_10 = arith.constant 0 : index
    %c0_11 = arith.constant 0 : index
    %23 = vector.load %arg4[%c0_10, %c0_11] : memref<1x32xf32, #tpu.memory_space<vmem>>, vector<1x32xf32>
    %24 = vector.broadcast %23 : vector<1x32xf32> to vector<8x32xf32>
    %25 = arith.mulf %22, %24 : vector<8x32xf32>
    %c0_12 = arith.constant 0 : index
    %c0_13 = arith.constant 0 : index
    %26 = vector.load %arg5[%c0_12, %c0_13] : memref<1x32xf32, #tpu.memory_space<vmem>>, vector<1x32xf32>
    %27 = vector.broadcast %26 : vector<1x32xf32> to vector<8x32xf32>
    %28 = arith.addf %25, %27 : vector<8x32xf32>
    %c0_14 = arith.constant 0 : index
    %c0_15 = arith.constant 0 : index
    %29 = vector.load %arg6[%c0_14, %c0_15] : memref<32x2048xf32, #tpu.memory_space<vmem>>, vector<32x2048xf32>
    %cst_16 = arith.constant dense<0.000000e+00> : vector<8x2048xf32>
    %30 = tpu.matmul %28, %29, %cst_16 {dimension_numbers = #tpu.dot_dimension_numbers<[1], [0], [0], [1], [0, 0, 1, 1], [], []>} : vector<8x32xf32>, vector<32x2048xf32>, vector<8x2048xf32> -> vector<8x2048xf32>
    %c0_17 = arith.constant 0 : index
    %c0_18 = arith.constant 0 : index
    %31 = vector.load %arg7[%c0_17, %c0_18] : memref<1x2048xf32, #tpu.memory_space<vmem>>, vector<1x2048xf32>
    %32 = vector.broadcast %31 : vector<1x2048xf32> to vector<8x2048xf32>
    %33 = arith.addf %30, %32 : vector<8x2048xf32>
    %cst_19 = arith.constant 0.000000e+00 : f32
    %34 = vector.broadcast %cst_19 : f32 to vector<8x2048xf32>
    %35 = arith.maximumf %33, %34 : vector<8x2048xf32>
    %c0_20 = arith.constant 0 : index
    %c0_21 = arith.constant 0 : index
    %36 = vector.load %arg8[%c0_20, %c0_21] : memref<2048x32xf32, #tpu.memory_space<vmem>>, vector<2048x32xf32>
    %cst_22 = arith.constant dense<0.000000e+00> : vector<8x32xf32>
    %37 = tpu.matmul %35, %36, %cst_22 {dimension_numbers = #tpu.dot_dimension_numbers<[1], [0], [0], [1], [0, 0, 1, 1], [], []>} : vector<8x2048xf32>, vector<2048x32xf32>, vector<8x32xf32> -> vector<8x32xf32>
    %c0_23 = arith.constant 0 : index
    %c0_24 = arith.constant 0 : index
    %38 = vector.load %arg9[%c0_23, %c0_24] : memref<1x32xf32, #tpu.memory_space<vmem>>, vector<1x32xf32>
    %39 = vector.broadcast %38 : vector<1x32xf32> to vector<8x32xf32>
    %40 = arith.addf %37, %39 : vector<8x32xf32>
    %41 = arith.addf %40, %28 : vector<8x32xf32>
    %cst_25 = arith.constant dense<0.000000e+00> : vector<8xf32>
    %42 = vector.multi_reduction <add>, %41, %cst_25 [1] : vector<8x32xf32> to vector<8xf32>
    %43 = vector.shape_cast %42 : vector<8xf32> to vector<8x1xf32>
    %cst_26 = arith.constant 3.200000e+01 : f32
    %44 = vector.broadcast %cst_26 : f32 to vector<8x1xf32>
    %45 = arith.divf %43, %44 : vector<8x1xf32>
    %46 = vector.broadcast %45 : vector<8x1xf32> to vector<8x32xf32>
    %47 = arith.subf %41, %46 : vector<8x32xf32>
    %48 = arith.mulf %47, %47 : vector<8x32xf32>
    %cst_27 = arith.constant dense<0.000000e+00> : vector<8xf32>
    %49 = vector.multi_reduction <add>, %48, %cst_27 [1] : vector<8x32xf32> to vector<8xf32>
    %50 = vector.shape_cast %49 : vector<8xf32> to vector<8x1xf32>
    %cst_28 = arith.constant 3.200000e+01 : f32
    %51 = vector.broadcast %cst_28 : f32 to vector<8x1xf32>
    %52 = arith.divf %50, %51 : vector<8x1xf32>
    %53 = vector.broadcast %45 : vector<8x1xf32> to vector<8x32xf32>
    %54 = arith.subf %41, %53 : vector<8x32xf32>
    %cst_29 = arith.constant 9.99999974E-6 : f32
    %55 = vector.broadcast %cst_29 : f32 to vector<8x1xf32>
    %56 = arith.addf %52, %55 : vector<8x1xf32>
    %57 = math.rsqrt %56 : vector<8x1xf32>
    %58 = vector.broadcast %57 : vector<8x1xf32> to vector<8x32xf32>
    %59 = arith.mulf %54, %58 : vector<8x32xf32>
    %c0_30 = arith.constant 0 : index
    %c0_31 = arith.constant 0 : index
    %60 = vector.load %arg10[%c0_30, %c0_31] : memref<1x32xf32, #tpu.memory_space<vmem>>, vector<1x32xf32>
    %61 = vector.broadcast %60 : vector<1x32xf32> to vector<8x32xf32>
    %62 = arith.mulf %59, %61 : vector<8x32xf32>
    %c0_32 = arith.constant 0 : index
    %c0_33 = arith.constant 0 : index
    %63 = vector.load %arg11[%c0_32, %c0_33] : memref<1x32xf32, #tpu.memory_space<vmem>>, vector<1x32xf32>
    %64 = vector.broadcast %63 : vector<1x32xf32> to vector<8x32xf32>
    %65 = arith.addf %62, %64 : vector<8x32xf32>
    %cst_34 = arith.constant 0.000000e+00 : f32
    %66 = vector.broadcast %cst_34 : f32 to vector<8x32xf32>
    %67 = arith.cmpf ogt, %65, %66 : vector<8x32xf32>
    %c0_35 = arith.constant 0 : index
    %c0_36 = arith.constant 0 : index
    %68 = vector.load %arg12[%c0_35, %c0_36] : memref<1x32xf32, #tpu.memory_space<vmem>>, vector<1x32xf32>
    %69 = vector.broadcast %68 : vector<1x32xf32> to vector<8x32xf32>
    %70 = arith.mulf %69, %65 : vector<8x32xf32>
    %71 = arith.select %67, %65, %70 : vector<8x32xi1>, vector<8x32xf32>
    %c0_37 = arith.constant 0 : index
    %c0_38 = arith.constant 0 : index
    %72 = vector.load %arg13[%c0_37, %c0_38] : memref<8x32xf32, #tpu.memory_space<vmem>>, vector<8x32xf32>
    tpu.vector_store %arg13[%c0_37, %c0_38], %71 {strides = array<i32>} : memref<8x32xf32, #tpu.memory_space<vmem>>, vector<8x32xf32>,
    return
  }
  func.func @transform_0(%arg0: i32) -> (i32, i32) {
    %c0_i32 = arith.constant 0 : i32
    %c0_i32_0 = arith.constant 0 : i32
    return %arg0, %c0_i32 : i32, i32
  }
  func.func @transform_1(%arg0: i32) -> (i32, i32) {
    %c0_i32 = arith.constant 0 : i32
    %c0_i32_0 = arith.constant 0 : i32
    return %arg0, %c0_i32 : i32, i32
  }
  func.func @transform_2(%arg0: i32) -> (i32, i32) {
    %c0_i32 = arith.constant 0 : i32
    %c0_i32_0 = arith.constant 0 : i32
    %c0_i32_1 = arith.constant 0 : i32
    return %c0_i32, %c0_i32_0 : i32, i32
  }
  func.func @transform_3(%arg0: i32) -> (i32, i32) {
    %c0_i32 = arith.constant 0 : i32
    %c0_i32_0 = arith.constant 0 : i32
    %c0_i32_1 = arith.constant 0 : i32
    return %c0_i32, %c0_i32_0 : i32, i32
  }
  func.func @transform_4(%arg0: i32) -> (i32, i32) {
    %c0_i32 = arith.constant 0 : i32
    %c0_i32_0 = arith.constant 0 : i32
    %c0_i32_1 = arith.constant 0 : i32
    return %c0_i32, %c0_i32_0 : i32, i32
  }
  func.func @transform_5(%arg0: i32) -> (i32, i32) {
    %c0_i32 = arith.constant 0 : i32
    %c0_i32_0 = arith.constant 0 : i32
    %c0_i32_1 = arith.constant 0 : i32
    return %c0_i32, %c0_i32_0 : i32, i32
  }
  func.func @transform_6(%arg0: i32) -> (i32, i32) {
    %c0_i32 = arith.constant 0 : i32
    %c0_i32_0 = arith.constant 0 : i32
    %c0_i32_1 = arith.constant 0 : i32
    return %c0_i32, %c0_i32_0 : i32, i32
  }
  func.func @transform_7(%arg0: i32) -> (i32, i32) {
    %c0_i32 = arith.constant 0 : i32
    %c0_i32_0 = arith.constant 0 : i32
    %c0_i32_1 = arith.constant 0 : i32
    return %c0_i32, %c0_i32_0 : i32, i32
  }
  func.func @transform_8(%arg0: i32) -> (i32, i32) {
    %c0_i32 = arith.constant 0 : i32
    %c0_i32_0 = arith.constant 0 : i32
    %c0_i32_1 = arith.constant 0 : i32
    return %c0_i32, %c0_i32_0 : i32, i32
  }
  func.func @transform_9(%arg0: i32) -> (i32, i32) {
    %c0_i32 = arith.constant 0 : i32
    %c0_i32_0 = arith.constant 0 : i32
    %c0_i32_1 = arith.constant 0 : i32
    return %c0_i32, %c0_i32_0 : i32, i32
  }
  func.func @transform_10(%arg0: i32) -> (i32, i32) {
    %c0_i32 = arith.constant 0 : i32
    %c0_i32_0 = arith.constant 0 : i32
    %c0_i32_1 = arith.constant 0 : i32
    return %c0_i32, %c0_i32_0 : i32, i32
  }
  func.func @transform_11(%arg0: i32) -> (i32, i32) {
    %c0_i32 = arith.constant 0 : i32
    %c0_i32_0 = arith.constant 0 : i32
    %c0_i32_1 = arith.constant 0 : i32
    return %c0_i32, %c0_i32_0 : i32, i32
  }
  func.func @transform_12(%arg0: i32) -> (i32, i32) {
    %c0_i32 = arith.constant 0 : i32
    %c0_i32_0 = arith.constant 0 : i32
    return %arg0, %c0_i32 : i32, i32
  }
}

</mosaic_0001>

<bundles_post_ra>
// kernel: encoder_forward.7
= control target key start
LH: loop header
LB: loop body
LE: loop exit
PB: predicated region body
PF: predicated region fallthrough
CT: control target
= control target key end

     0   :  { %v81_v0 = vmov 1   ;;  %v82_v1 = vmov 0   ;;  %vm66_vm0 = vcmask 261120   ;;  %s135_s1 = inlined_call_operand.vmem [shape: f32[16,2], index: 1, kind: input, shape index: {}]   ;;  %s136_s2 = inlined_call_operand.vmem [shape: f32[2,32], index: 2, kind: input, shape index: {}]   ;;  %s137_s3 = inlined_call_operand.vmem [shape: f32[1,32], index: 3, kind: input, shape index: {}]   ;;  %s138_s0 = inlined_call_operand.vmem [shape: f32[16,32], index: 0, kind: input, shape index: {}]   ;;  %s139_s4 = inlined_call_operand.vmem [shape: f32[16,32], index: 4, kind: output, shape index: {}]  }
   0x1   :  { %79 = vset.pattern.permute.xlu1 %v81_v0  ;;  %78 = vset.pattern.permute.xlu0 %v82_v1  ;;  %v17_v2 = vld [vmem:[%s135_s1] sm:$0xff]  ;;  %v18_v3 = vld [vmem:[%s135_s1 + $0x8] sm:$0xff] }
   0x2   :  { %38 = vperm.xlu1 %79, %v17_v2   ;;  %22 = vperm.xlu0 %78, %v17_v2   ;;  %v74_v4 = vld [vmem:[%s136_s2 + $0x1] ss:$0 sm:$0xff]  ;;  %v73_v5 = vld [vmem:[%s136_s2] ss:$0 sm:$0xff]  ;;  %v63_v20 = vld [vmem:[%s138_s0 + $0x8] sm:$0xff] }
   0x3   :  { %v75_v10 = vld [vmem:[%s137_s3] ss:$0 sm:$0xff] }
   0x4   :  { %v62_v12 = vld [vmem:[%s138_s0] sm:$0xff] }
   0x6   :  { %42 = vperm.xlu1 %79, %v18_v3   ;;  %27 = vperm.xlu0 %78, %v18_v3  }
   0xa   :  { %80 = vset.pattern.permute.xlu0 %v81_v0 }
  0x7d   :  { %v39_v6 = vpop.permute.xlu1 %38  ;;  %v23_v7 = vpop.permute.xlu0 %22 }
  0x7e   :  { %v49_v8 = vmul.f32 %v74_v4, %v39_v6  ;;  %v34_v9 = vmul.f32 %v73_v5, %v23_v7 }
  0x80   :  { %v51_v11 = vadd.f32 %v49_v8, %v34_v9 }
  0x81   :  { %v43_v13 = vpop.permute.xlu1 %42  ;;  %v28_v14 = vpop.permute.xlu0 %27 }
  0x82   :  { %v60_v15 = vadd.f32 %v75_v10, %v51_v11  ;;  %v50_v16 = vmul.f32 %v74_v4, %v43_v13  ;;  %v35_v17 = vmul.f32 %v73_v5, %v28_v14 }
  0x84   :  { %v64_v18 = vadd.f32 %v62_v12, %v60_v15  ;;  %v52_v19 = vadd.f32 %v50_v16, %v35_v17 }
  0x86   :  { %67 = vst.msk [vmem:[%s139_s4] sm:$0xff] %vm66_vm0, %v64_v18  ;;  %v61_v21 = vadd.f32 %v75_v10, %v52_v19 }
  0x88   :  { %v65_v22 = vadd.f32 %v63_v20, %v61_v21 }
  0x8a   :  { %68 = vst.msk [vmem:[%s139_s4 + $0x8] sm:$0xff] %vm66_vm0, %v65_v22 }

// kernel: encoder_forward.8
= control target key start
LH: loop header
LB: loop body
LE: loop exit
PB: predicated region body
PF: predicated region fallthrough
CT: control target
= control target key end

     0   :  { %11 = vsyncpa [#allocation3], 0  ;;  %s674_s18 = smov 0   ;;  %s676_s19 = smov 0   ;;  %s780_s0 = inlined_call_operand.vmem [shape: f32[8], index: 0, kind: input, shape index: {}]   ;;  %s781_s1 = inlined_call_operand.vmem [shape: f32[16,32], index: 1, kind: input, shape index: {}]   ;;  %s782_s2 = inlined_call_operand.vmem [shape: f32[3,16,16], index: 2, kind: input, shape index: {}]   ;;  %s783_s3 = inlined_call_operand.vmem [shape: f32[32,96], index: 3, kind: input, shape index: {}]   ;;  %s784_s4 = inlined_call_operand.vmem [shape: f32[16,96], index: 4, kind: output, shape index: {0}]   ;;  %s785_s5 = inlined_call_operand.vmem [shape: f32[16,16], index: 5, kind: output, shape index: {1}]  }
   0x1   :  { %s678_s20 = smov 0  }
   0x2 LB: > { %s690_s21 = sadd.s32 4294967295, %s639_s20   ;;  %s693_s22 = sadd.s32 1, %s639_s20   ;;  %s639_s20 = sphi %s678_s20, %s790_s20   ;;  %s635_s19 = sphi %s676_s19, %s789_s19   ;;  %s631_s18 = sphi %s674_s18, %s788_s18  }
   0x3   : > { %s68_s23 = ssub.s32 %s639_s20, %s693_s22  ;;  %s71_s24 = sadd.s32 1, %s635_s19 }
   0x4   : > { %p69_p0 = scmp.eq.s32.totalorder %s68_s23, 0  ;;  %p78_p1 = scmp.ne.s32.totalorder %s635_s19, %s631_s18 }
   0x5   : > { %p79_p2 = scmp.eq.s32.totalorder %s639_s20, 0  ;;  %p527_p3 = scmp.ge.s32.totalorder %s639_s20, 1 }
   0x6   : > { %s703_s25 = scalar_select %p69_p0, %s635_s19, %s71_s24  }
   0x7   : > { %p705_p4 = por %p79_p2, %p78_p1  ;;  %p168_p5 = scmp.lt.s32.totalorder %s639_s20, 3 }
   0x8   : > { %p569_p6 = scmp.eq.s32.totalorder %s690_s21, 0  ;;  %s181_s30 = sshll.u32 %s780_s0, 4  ;;  %s182_s30 = int_to_ptr.vmem [resolvable:$true] %s181_s30 }
   0x9   : > { %p711_p7 = pnand %p527_p3, %p168_p5  ;;  %s598_s6 = scalar_lea.vmem %s182_s30, 16 }
   0xa   : > { %p599_p10 = scmp.ne.s32.totalorder %s182_s30, %s598_s6  ;;  %p606_p0 = scmp.lt.s32.totalorder %s182_s30, %s182_s30 }
   0xb   : > { %p565_p8 = pneg %p711_p7  ;;  %p607_p1 = scmp.lt.s32.totalorder %s598_s6, %s598_s6 }
   0xd   : > { %p566_p9 = pnand %p569_p6, %p565_p8  ;;  %p608_p2 = por %p607_p1, %p606_p0 }
   0xf   : > { %p600_p11 = pneg %p566_p9 }
  0x11   : > { %p601_p12 = pnand %p600_p11, %p599_p10 }
  0x13   : > { %p602_p13 = pneg %p601_p12 }
  0x15   : > { %p609_p3 = pnand %p608_p2, %p602_p13 }
  0x17   : > { %612 = shalt.err (!%p609_p3)
}
  0x18   : > { %s641_s7 = smov [#allocation2]   ;;  %p529_p5 = scmp.ge.s32.totalorder %s639_s20, 2 }
  0x19   : > { %568 = dma.vmem_to_smem (!%p566_p9), %s182_s30, 16, %s641_s7, [#allocation3]  }
  0x1a   : > { %191 = sbr.rel (%p529_p5) target bundleno = 37 (0x25), region = 24 }
  0x1f   : > { %201 = sbr.rel (!%p705_p4) target bundleno = 37 (0x25), region = 32  ;;  %s203_s8 = sand.u32 (%p705_p4), 1, %s635_s19  }
  0x20   : > { %s530_s9 = sshll.u32 (%p705_p4), %s639_s20, 3  ;;  %s559_s10 = smul.u32 (%p705_p4), 24, %s203_s8 }
  0x21   : > { %s207_s13 = scalar_lea.vmem (%p705_p4), %s782_s2, %s530_s9 }
  0x22   : > { %v240_v0 = vld [vmem:[%s207_s13] sm:$0xff] (%p705_p4)  ;;  %v242_v1 = vld [vmem:[%s207_s13 + $0x10] sm:$0xff] (%p705_p4)  ;;  %s205_s14 = scalar_lea.vmem (%p705_p4), [#allocation4], %s559_s10 }
  0x23   : > { %v244_v2 = vld [vmem:[%s207_s13 + $0x20] sm:$0xff] (%p705_p4)  ;;  %241 = vst [vmem:[%s205_s14] sm:$0xff] (%p705_p4), %v240_v0  ;;  %243 = vst [vmem:[%s205_s14 + $0x8] sm:$0xff] (%p705_p4), %v242_v1 }
  0x24   : > { %245 = vst [vmem:[%s205_s14 + $0x10] sm:$0xff] %v244_v2 }
  0x25 PF: > { %254 = sbr.rel (%p711_p7) target bundleno = 252 (0xfc), region = 70 }
  0x2a   : > { %626 = dma.done.wait (%p569_p6), [#allocation3], 16  }
  0x2b   : > { %628 = vsyncadd (%p569_p6), [#allocation3], 4294967280  ;;  %s261_s15 = sand.u32 1, %s631_s18  }
  0x2c   : > { %s560_s16 = smul.u32 24, %s261_s15 }
  0x2e   : > { %s737_s17 = scalar_lea.vmem [#allocation4], %s560_s16 }
  0x2f   : > { %267 = sfence }
  0x30   : > { %v312_v3 = vld [vmem:[%s783_s3 + $0x18] sm:$0xff]  ;;  %p296_p4 = scmp.lt.s32.totalorder %s690_s21, 1  ;;  %v642_v4 = vmov 0.0   ;;  %v311_v5 = vld [vmem:[%s783_s3 + $0x10] sm:$0xff]  ;;  %vm643_vm0 = vmmov 0   ;;  %v310_v6 = vld [vmem:[%s783_s3 + $0x8] sm:$0xff] }
  0x31   : > { %548 = vmatprep.subr.mxu0 %v642_v4  ;;  %556 = vmatprep.mubr.msk.f32.mxu0 %vm643_vm0, %v642_v4  ;;  %s393_s28 = sld [smem:[#allocation2]]  ;;  %v309_v7 = vld [vmem:[%s783_s3] sm:$0xff]  ;;  %vm313_vm1 = vcmask 261120   ;;  %v391_v12 = vld [vmem:[%s737_s17 + $0x10] sm:$0xff]  ;;  %vm409_vm2 = vcmask 130048   ;;  %vm387_vm3 = vcmask 785408  }
  0x32   : > { %549 = vmatpush3.msra.mxu0 %v312_v3  ;;  %s792_s21 = smov (!%p296_p4, %s690_s21), 1  ;;  %s538_s30 = sld [smem:[#allocation2 + $0x1]]  ;;  %v389_v9 = vld [vmem:[%s737_s17] sm:$0xff]  ;;  %v390_v10 = vld [vmem:[%s737_s17 + $0x8] sm:$0xff] }
  0x33   : > { %550 = vmatprep.subr.mxu0 %v642_v4  ;;  %s750_s29 = sshll.u32 %s792_s21, 3  ;;  %s539_s11 = sld [smem:[#allocation2 + $0x2]] }
  0x34   : > { %551 = vmatpush3.msra.mxu0 %v311_v5  ;;  %s299_s10 = scalar_lea.vmem %s781_s1, %s750_s29  ;;  %s540_s21 = sld [smem:[#allocation2 + $0x3]] }
  0x35   : > { %552 = vmatprep.subr.mxu0 %v642_v4  ;;  %v308_v8 = vld [vmem:[%s299_s10] sm:$0xff]  ;;  %s537_s12 = sld [smem:[#allocation2 + $0x4]]  ;;  %s307_s15 = scalar_lea.vmem %s785_s5, %s750_s29 }
  0x36   : > { %553 = vmatpush3.msra.mxu0 %v310_v6  ;;  %s303_s17 = scalar_lea.vmem %s784_s4, %s750_s29 }
  0x37   : > { %554 = vmatprep.subr.mxu0 %v642_v4  ;;  %v394_v11 = vstv %s393_s28 }
  0x38   : > { %555 = vmatpush3.msra.mxu0 %v309_v7  ;;  %v395_v13 = vmul.f32 %v394_v11, %v389_v9  ;;  %v397_v14 = vstv %s538_s30 }
  0x39   : > { %557 = vmatmul.mubr.msk.f32.vlgmr.msra.gmra.mxu0 %vm313_vm1, %v308_v8  ;;  %v398_v15 = vmul.f32 %v397_v14, %v390_v10  ;;  %v401_v16 = vstv %s539_s11 }
  0x3a   : > { %v402_v18 = vmul.f32 %v401_v16, %v391_v12  ;;  %v405_v19 = vstv %s540_s21 }
  0x3b   : > { %v399_v17 = vadd.f32 %v398_v15, %v395_v13  ;;  %v407_v21 = vstv %s537_s12 }
  0x3d   : > { %v403_v20 = vadd.f32 %v402_v18, %v399_v17 }
  0x3f   : > { %v406_v22 = vadd.f32 %v405_v19, %v403_v20 }
  0x41   : > { %v408_v23 = vmul.f32 %v407_v21, %v406_v22 }
  0x43   : > { %410 = vst.msk [vmem:[%s307_s15] sm:$0xff] %vm409_vm2, %v408_v23 }
  0xf9   : > { %v383_v24 = vpop.f32.mrf.mxu0 }
  0xfa   : > { %388 = vst.msk [vmem:[%s303_s17] sm:$0xff] %vm387_vm3, %v383_v24 }
  0xfb   : > { %v558_v25 = vpop.f32.mrf.mxu0 }
  0xfc PF: > { %p14_p6 = scmp.ge.s32.totalorder %s693_s22, 4   ;;  %s788_s18 = smov %s635_s19 }
  0xfd   : > { %s789_s19 = smov %s703_s25  ;;  %s790_s20 = smov %s693_s22 }
  0xfe   :  { %16 = sbr.rel (!%p14_p6) target bundleno = 2 (0x2), region = 129 }
 0x103   :  { %444 = vsyncpa [#allocation3], 1 }
 0x104   :  { %446 = vsyncpa [#allocation3 + $0x1], 1 }

// kernel: encoder_forward.9
= control target key start
LH: loop header
LB: loop body
LE: loop exit
PB: predicated region body
PF: predicated region fallthrough
CT: control target
= control target key end

     0   :  { %s615_s15 = smov 0   ;;  %s664_s0 = inlined_call_operand.vmem [shape: f32[16,16], index: 0, kind: input, shape index: {}]   ;;  %s665_s1 = inlined_call_operand.vmem [shape: f32[4,16,8], index: 1, kind: input, shape index: {}]   ;;  %s666_s2 = inlined_call_operand.vmem [shape: f32[4,16,8], index: 2, kind: input, shape index: {}]   ;;  %s667_s3 = inlined_call_operand.vmem [shape: f32[4,16,8], index: 3, kind: input, shape index: {}]   ;;  %s668_s4 = inlined_call_operand.vmem [shape: f32[4,16,8], index: 4, kind: output, shape index: {}]  }
   0x1 LB: > { %s519_s16 = sadd.s32 4294967295, %s588_s15   ;;  %p523_p0 = scmp.ge.s32.totalorder %s588_s15, 1  ;;  %s588_s15 = sphi %s615_s15, %s14_s15  }
   0x2   : > { %p182_p1 = scmp.lt.s32.totalorder %s588_s15, 5 }
   0x4   : > { %p183_p2 = pnand %p523_p0, %p182_p1 }
   0x5   : > { %p218_p3 = scmp.lt.s32.totalorder (!%p183_p2), %s519_s16, 3 }
   0x6   : > { %186 = sbr.rel (%p183_p2) target bundleno = 732 (0x2dc), region = 36 }
   0xb   : > { %s670_s16 = smov (!%p218_p3, %s519_s16), 3  ;;  %vm244_vm0 = vcmask 64512   ;;  %v242_v5 = vld [vmem:[%s664_s0] sm:$0xff]  ;;  %v243_v6 = vld [vmem:[%s664_s0 + $0x8] sm:$0xff]  ;;  %vm332_vm1 = vcmask 130048  }
   0xc   : > { %s623_s17 = sshll.u32 %s670_s16, 4 }
   0xd   : > { %s227_s20 = scalar_lea.vmem %s666_s2, %s623_s17  ;;  %s222_s23 = scalar_lea.vmem %s665_s1, %s623_s17 }
   0xe   : > { %v240_v0 = vld [vmem:[%s227_s20] sm:$0xff]  ;;  %v241_v1 = vld [vmem:[%s227_s20 + $0x8] sm:$0xff]  ;;  %s232_s30 = scalar_lea.vmem %s667_s3, %s623_s17  ;;  %s237_s7 = scalar_lea.vmem %s668_s4, %s623_s17 }
   0xf   : > { %v238_v2 = vld [vmem:[%s222_s23] sm:$0xff]  ;;  %552 = vmatprep.subr.msk.mxu0 %vm244_vm0, %v241_v1  ;;  %v239_v3 = vld [vmem:[%s222_s23 + $0x8] sm:$0xff] }
  0x10   : > { %556 = vmatprep.mubr.msk.f32.mxu0 %vm244_vm0, %v238_v2  ;;  %553 = vmatpush3.xpose.msk.msra.mxu0 %vm244_vm0, %v241_v1  ;;  %v356_v22 = vld [vmem:[%s232_s30 + $0x8] sm:$0xff]  ;;  %v355_v23 = vld [vmem:[%s232_s30] sm:$0xff] }
  0x11   : > { %554 = vmatprep.subr.msk.mxu0 %vm244_vm0, %v240_v0  ;;  %559 = vmatprep.subr.mxu1 %v356_v22 }
  0x12   : > { %560 = vmatpush3.msra.mxu1 %v356_v22 }
  0x13   : > { %561 = vmatprep.subr.mxu1 %v355_v23 }
  0x14   : > { %555 = vmatpush3.xpose.msk.msra.mxu0 %vm244_vm0, %v240_v0  ;;  %562 = vmatpush3.msra.mxu1 %v355_v23 }
  0x17   : > { %557 = vmatmul.mubr.msk.f32.vlgmr.msra.gmra.mxu0 %vm244_vm0, %v239_v3 }
  0xd7   : > { %v558_v4 = vpop.f32.mrf.mxu0 }
  0xd8   : > { %v329_v9 = vadd.f32 %v558_v4, %v243_v6 }
  0xd9   : > { %v323_v7 = vpop.f32.mrf.mxu0 }
  0xda   : > { %v324_v8 = vadd.f32 %v323_v7, %v242_v5  ;;  %v336_v11 = vsel %vm332_vm1, %v329_v9, -inf }
  0xdc   : > { %v333_v10 = vsel %vm332_vm1, %v324_v8, -inf }
  0xdd   : > { %334 = vmax.xlane.f32.xlu0 %v333_v10 }
  0xe1   : > { %337 = vmax.xlane.f32.xlu0 %v336_v11 }
 0x166   : > { %v335_v12 = vpop.xlane.xlu0 %334 }
 0x167   : > { %v339_v13 = vsub.f32 %v324_v8, %v335_v12 }
 0x169   : > { %v341_v14 = vmul.f32 1.442695, %v339_v13 }
 0x16a   : > { %v338_v15 = vpop.xlane.xlu0 %337 }
 0x16b   : > { %574 = vpow2.f32 %v341_v14  ;;  %v340_v16 = vsub.f32 %v329_v9, %v338_v15 }
 0x16d   : > { %v343_v17 = vmul.f32 1.442695, %v340_v16 }
 0x16f   : > { %576 = vpow2.f32 %v343_v17 }
 0x178   : > { %v575_v18 = vpop.eup %574 }
 0x179   : > { %v345_v19 = vsel %vm332_vm1, %v575_v18, 0.0 }
 0x17a   : > { %346 = vadd.xlane.f32.xlu1 %v345_v19 }
 0x17c   : > { %v577_v20 = vpop.eup %576 }
 0x17d   : > { %v348_v21 = vsel %vm332_vm1, %v577_v20, 0.0 }
 0x17e   : > { %349 = vadd.xlane.f32.xlu1 %v348_v21 }
 0x203   : > { %v347_v24 = vpop.xlane.xlu1 %346 }
 0x204   : > { %578 = vrcp.f32 %v347_v24 }
 0x207   : > { %v350_v25 = vpop.xlane.xlu1 %349 }
 0x208   : > { %580 = vrcp.f32 %v350_v25 }
 0x211   : > { %v579_v26 = vpop.eup %578 }
 0x212   : > { %v353_v27 = vmul.f32 %v579_v26, %v575_v18 }
 0x214   : > { %563 = vmatprep.mubr.msk.f32.mxu1 %vm332_vm1, %v353_v27 }
 0x215   : > { %v581_v28 = vpop.eup %580 }
 0x216   : > { %v354_v29 = vmul.f32 %v581_v28, %v577_v20 }
 0x218   : > { %564 = vmatmul.mubr.msk.f32.vlgmr.msra.gmra.mxu1 %vm332_vm1, %v354_v29 }
 0x2d8   : > { %v565_v30 = vpop.f32.mrf.mxu1 }
 0x2d9   : > { %439 = vst.msk [vmem:[%s237_s7 + $0x8] sm:$0xff] %vm244_vm0, %v565_v30 }
 0x2da   : > { %v429_v31 = vpop.f32.mrf.mxu1 }
 0x2db   : > { %438 = vst.msk [vmem:[%s237_s7] sm:$0xff] %vm244_vm0, %v429_v31 }
 0x2dc PF: > { %s14_s15 = sadd.s32 1, %s588_s15  }
 0x2dd   : > { %p11_p4 = scmp.ge.s32.totalorder %s14_s15, 6  }
 0x2df   :  { %13 = sbr.rel (!%p11_p4) target bundleno = 1 (0x1), region = 72 }

// kernel: encoder_forward.10
= control target key start
LH: loop header
LB: loop body
LE: loop exit
PB: predicated region body
PF: predicated region fallthrough
CT: control target
= control target key end

     0   :  { %s2611_s21 = smov 0   ;;  %s3756_s0 = inlined_call_operand.vmem [shape: f32[16,32], index: 0, kind: input, shape index: {}]   ;;  %s3757_s1 = inlined_call_operand.vmem [shape: f32[16,32], index: 1, kind: input, shape index: {}]   ;;  %s3758_s2 = inlined_call_operand.vmem [shape: f32[32,32], index: 2, kind: input, shape index: {}]   ;;  %s3759_s3 = inlined_call_operand.vmem [shape: f32[1,32], index: 3, kind: input, shape index: {}]   ;;  %s3760_s4 = inlined_call_operand.vmem [shape: f32[1,32], index: 4, kind: input, shape index: {}]   ;;  %s3761_s5 = inlined_call_operand.vmem [shape: f32[32,2048], index: 5, kind: input, shape index: {}]   ;;  %s3762_s6 = inlined_call_operand.vmem [shape: f32[1,2048], index: 6, kind: input, shape index: {}]   ;;  %s3763_s7 = inlined_call_operand.vmem [shape: f32[2048,32], index: 7, kind: input, shape index: {}]   ;;  %s3764_s8 = inlined_call_operand.vmem [shape: f32[1,32], index: 8, kind: input, shape index: {}]   ;;  %s3765_s9 = inlined_call_operand.vmem [shape: f32[1,32], index: 9, kind: input, shape index: {}]   ;;  %s3766_s10 = inlined_call_operand.vmem [shape: f32[1,32], index: 10, kind: input, shape index: {}]   ;;  %s3767_s11 = inlined_call_operand.vmem [shape: f32[1,32], index: 11, kind: input, shape index: {}]   ;;  %s3768_s12 = inlined_call_operand.vmem [shape: f32[16,32], index: 12, kind: output, shape index: {}]  }
   0x1 LB: > { %s2201_s22 = sadd.s32 4294967295, %s2542_s21   ;;  %p2205_p0 = scmp.ge.s32.totalorder %s2542_s21, 1  ;;  %s2542_s21 = sphi %s2611_s21, %s22_s21  }
   0x2   : > { %p370_p1 = scmp.lt.s32.totalorder %s2542_s21, 3 }
   0x4   : > { %p371_p2 = pnand %p2205_p0, %p370_p1 }
   0x5   : > { %p414_p3 = scmp.lt.s32.totalorder (!%p371_p2), %s2201_s22, 1 }
   0x6   : > { %374 = sbr.rel (%p371_p2) target bundleno = 1339 (0x53b), region = 68 }
   0xb   : > { %v430_v0 = vld [vmem:[%s3758_s2 + $0x18] sm:$0xff]  ;;  %v2544_v1 = vmov 0.0   ;;  %v429_v2 = vld [vmem:[%s3758_s2 + $0x10] sm:$0xff]  ;;  %vm2545_vm0 = vmmov 0   ;;  %s3770_s22 = smov (!%p414_p3, %s2201_s22), 1  ;;  %v428_v3 = vld [vmem:[%s3758_s2 + $0x8] sm:$0xff] }
   0xc   : > { %2511 = vmatprep.subr.mxu0 %v2544_v1  ;;  %2519 = vmatprep.mubr.msk.f32.mxu0 %vm2545_vm0, %v2544_v1  ;;  %s2632_s29 = sshll.u32 %s3770_s22, 3  ;;  %v427_v4 = vld [vmem:[%s3758_s2] sm:$0xff]  ;;  %vm431_vm1 = vcmask 261120   ;;  %v586_v16 = vld [vmem:[%s3761_s5 + $0x188] sm:$0xff]  ;;  %v588_v17 = vld [vmem:[%s3761_s5 + $0x198] sm:$0xff] }
   0xd   : > { %2512 = vmatpush3.msra.mxu0 %v430_v0  ;;  %752 = vmatprep.mubr.f32.mxu1 %v2544_v1  ;;  %s421_s16 = scalar_lea.vmem %s3757_s1, %s2632_s29  ;;  %s417_s19 = scalar_lea.vmem %s3756_s0, %s2632_s29  ;;  %v585_v18 = vld [vmem:[%s3761_s5 + $0x180] sm:$0xff]  ;;  %v587_v19 = vld [vmem:[%s3761_s5 + $0x190] sm:$0xff]  ;;  %v570_v20 = vld [vmem:[%s3761_s5 + $0x108] sm:$0xff] }
   0xe   : > { %2513 = vmatprep.subr.mxu0 %v2544_v1  ;;  %v426_v5 = vld [vmem:[%s421_s16] sm:$0xff]  ;;  %712 = vmatprep.subr.mxu1 %v586_v16  ;;  %v572_v21 = vld [vmem:[%s3761_s5 + $0x118] sm:$0xff]  ;;  %v571_v23 = vld [vmem:[%s3761_s5 + $0x110] sm:$0xff]  ;;  %s425_s23 = scalar_lea.vmem %s3768_s12, %s2632_s29 }
   0xf   : > { %2514 = vmatpush3.msra.mxu0 %v429_v2  ;;  %v505_v6 = vld [vmem:[%s417_s19] sm:$0xff]  ;;  %713 = vmatpush1.msra.mxu1 %v585_v18  ;;  %v554_v24 = vld [vmem:[%s3761_s5 + $0x88] sm:$0xff]  ;;  %v556_v25 = vld [vmem:[%s3761_s5 + $0x98] sm:$0xff] }
  0x10   : > { %2515 = vmatprep.subr.mxu0 %v2544_v1  ;;  %714 = vmatprep.subr.mxu1 %v570_v20  ;;  %v569_v22 = vld [vmem:[%s3761_s5 + $0x100] sm:$0xff]  ;;  %v555_v27 = vld [vmem:[%s3761_s5 + $0x90] sm:$0xff]  ;;  %v538_v28 = vld [vmem:[%s3761_s5 + $0x8] sm:$0xff] }
  0x11   : > { %2516 = vmatpush3.msra.mxu0 %v428_v3  ;;  %715 = vmatpush1.msra.mxu1 %v569_v22  ;;  %v553_v26 = vld [vmem:[%s3761_s5 + $0x80] sm:$0xff]  ;;  %v540_v29 = vld [vmem:[%s3761_s5 + $0x18] sm:$0xff]  ;;  %v539_v31 = vld [vmem:[%s3761_s5 + $0x10] sm:$0xff] }
  0x12   : > { %2517 = vmatprep.subr.mxu0 %v2544_v1  ;;  %716 = vmatprep.subr.mxu1 %v554_v24  ;;  %v537_v30 = vld [vmem:[%s3761_s5] sm:$0xff]  ;;  %v590_v32 = vld [vmem:[%s3761_s5 + $0x1a8] sm:$0xff]  ;;  %v592_v33 = vld [vmem:[%s3761_s5 + $0x1b8] sm:$0xff] }
  0x13   : > { %2518 = vmatpush3.msra.mxu0 %v427_v4  ;;  %717 = vmatpush1.msra.mxu1 %v553_v26  ;;  %v2210_v38 = vld [vmem:[%s3759_s3] ss:$0 sm:$0xff]  ;;  %v591_v44 = vld [vmem:[%s3761_s5 + $0x1b0] sm:$0xff]  ;;  %v574_v45 = vld [vmem:[%s3761_s5 + $0x128] sm:$0xff] }
  0x14   : > { %2520 = vmatmul.mubr.msk.f32.vlgmr.msra.gmra.mxu0 %vm431_vm1, %v426_v5  ;;  %783 = vmatprep.subr.mxu0 %v588_v17  ;;  %v2211_v40 = vld [vmem:[%s3760_s4] ss:$0 sm:$0xff]  ;;  %v576_v46 = vld [vmem:[%s3761_s5 + $0x138] sm:$0xff]  ;;  %v575_v48 = vld [vmem:[%s3761_s5 + $0x130] sm:$0xff] }
  0x15   : > { %823 = vmatprep.mubr.f32.mxu0 %v2544_v1  ;;  %784 = vmatpush1.msra.mxu0 %v587_v19  ;;  %v589_v43 = vld [vmem:[%s3761_s5 + $0x1a0] sm:$0xff]  ;;  %v558_v49 = vld [vmem:[%s3761_s5 + $0xa8] sm:$0xff]  ;;  %v560_v50 = vld [vmem:[%s3761_s5 + $0xb8] sm:$0xff] }
  0x16   : > { %785 = vmatprep.subr.mxu0 %v572_v21  ;;  %718 = vmatprep.subr.mxu1 %v538_v28  ;;  %v573_v47 = vld [vmem:[%s3761_s5 + $0x120] sm:$0xff]  ;;  %v559_v52 = vld [vmem:[%s3761_s5 + $0xb0] sm:$0xff]  ;;  %v542_v53 = vld [vmem:[%s3761_s5 + $0x28] sm:$0xff] }
  0x17   : > { %786 = vmatpush1.msra.mxu0 %v571_v23  ;;  %719 = vmatpush1.msra.mxu1 %v537_v30  ;;  %v557_v51 = vld [vmem:[%s3761_s5 + $0xa0] sm:$0xff]  ;;  %v544_v54 = vld [vmem:[%s3761_s5 + $0x38] sm:$0xff]  ;;  %v543_v56 = vld [vmem:[%s3761_s5 + $0x30] sm:$0xff] }
  0x18   : > { %787 = vmatprep.subr.mxu0 %v556_v25  ;;  %854 = vmatprep.subr.mxu1 %v590_v32  ;;  %v541_v55 = vld [vmem:[%s3761_s5 + $0x20] sm:$0xff]  ;;  %v594_v57 = vld [vmem:[%s3761_s5 + $0x1c8] sm:$0xff]  ;;  %v596_v58 = vld [vmem:[%s3761_s5 + $0x1d8] sm:$0xff] }
  0x19   : > { %788 = vmatpush1.msra.mxu0 %v555_v27  ;;  %v593_v59 = vld [vmem:[%s3761_s5 + $0x1c0] sm:$0xff]  ;;  %v595_v60 = vld [vmem:[%s3761_s5 + $0x1d0] sm:$0xff]  ;;  %v578_v61 = vld [vmem:[%s3761_s5 + $0x148] sm:$0xff] }
  0x1a   : > { %789 = vmatprep.subr.mxu0 %v540_v29  ;;  %v580_v62 = vld [vmem:[%s3761_s5 + $0x158] sm:$0xff]  ;;  %v577_v63 = vld [vmem:[%s3761_s5 + $0x140] sm:$0xff]  ;;  %v579_v0 = vld [vmem:[%s3761_s5 + $0x150] sm:$0xff] }
  0x1b   : > { %790 = vmatpush1.msra.mxu0 %v539_v31  ;;  %v562_v2 = vld [vmem:[%s3761_s5 + $0xc8] sm:$0xff]  ;;  %v564_v3 = vld [vmem:[%s3761_s5 + $0xd8] sm:$0xff]  ;;  %v561_v4 = vld [vmem:[%s3761_s5 + $0xc0] sm:$0xff] }
  0x1c   : > { %925 = vmatprep.subr.mxu0 %v592_v33  ;;  %v563_v5 = vld [vmem:[%s3761_s5 + $0xd0] sm:$0xff]  ;;  %v581_v16 = vld [vmem:[%s3761_s5 + $0x160] sm:$0xff]  ;;  %v566_v18 = vld [vmem:[%s3761_s5 + $0xe8] sm:$0xff] }
  0x1d   : > { %v583_v17 = vld [vmem:[%s3761_s5 + $0x170] sm:$0xff]  ;;  %v568_v19 = vld [vmem:[%s3761_s5 + $0xf8] sm:$0xff]  ;;  %v565_v20 = vld [vmem:[%s3761_s5 + $0xe0] sm:$0xff] }
  0x1e   : > { %v567_v21 = vld [vmem:[%s3761_s5 + $0xf0] sm:$0xff]  ;;  %v550_v22 = vld [vmem:[%s3761_s5 + $0x68] sm:$0xff]  ;;  %v552_v23 = vld [vmem:[%s3761_s5 + $0x78] sm:$0xff] }
  0x1f   : > { %v549_v24 = vld [vmem:[%s3761_s5 + $0x60] sm:$0xff]  ;;  %v551_v25 = vld [vmem:[%s3761_s5 + $0x70] sm:$0xff]  ;;  %v1303_v26 = vld [vmem:[%s3763_s7 + $0xf8] sm:$0xff] }
  0x20   : > { %v1335_v27 = vld [vmem:[%s3763_s7 + $0x1f8] sm:$0xff]  ;;  %v1302_v30 = vld [vmem:[%s3763_s7 + $0xf0] sm:$0xff]  ;;  %v1301_v33 = vld [vmem:[%s3763_s7 + $0xe8] sm:$0xff] }
  0x21   : > { %v1287_v28 = vld [vmem:[%s3763_s7 + $0x78] sm:$0xff]  ;;  %v1286_v31 = vld [vmem:[%s3763_s7 + $0x70] sm:$0xff] }
  0x22   : > { %v1319_v29 = vld [vmem:[%s3763_s7 + $0x178] sm:$0xff]  ;;  %v1318_v32 = vld [vmem:[%s3763_s7 + $0x170] sm:$0xff] }
  0xd4   : > { %v501_v7 = vpop.f32.mrf.mxu0 }
  0xd5   : > { %v506_v8 = vadd.f32 %v505_v6, %v501_v7  ;;  %v546_v6 = vld [vmem:[%s3761_s5 + $0x48] sm:$0xff]  ;;  %v548_v7 = vld [vmem:[%s3761_s5 + $0x58] sm:$0xff] }
  0xd6   : > { %v2521_v9 = vpop.f32.mrf.mxu0 }
  0xd7   : > { %v507_v10 = vsel %vm431_vm1, %v506_v8, 0.0  ;;  %v547_v9 = vld [vmem:[%s3761_s5 + $0x50] sm:$0xff] }
  0xd8   : > { %508 = vadd.xlane.f32.xlu0 %v507_v10  ;;  %v598_v10 = vld [vmem:[%s3761_s5 + $0x1e8] sm:$0xff] }
 0x161   : > { %v509_v11 = vpop.xlane.xlu0 %508 }
 0x162   : > { %v511_v12 = vmul.f32 0.03125, %v509_v11  ;;  %v600_v11 = vld [vmem:[%s3761_s5 + $0x1f8] sm:$0xff] }
 0x164   : > { %v512_v13 = vsub.f32 %v506_v8, %v511_v12  ;;  %v545_v8 = vld [vmem:[%s3761_s5 + $0x40] sm:$0xff] }
 0x165   : > { %v597_v12 = vld [vmem:[%s3761_s5 + $0x1e0] sm:$0xff] }
 0x166   : > { %v513_v14 = vmul.f32 %v512_v13, %v512_v13 }
 0x168   : > { %v514_v15 = vsel %vm431_vm1, %v513_v14, 0.0  ;;  %v582_v14 = vld [vmem:[%s3761_s5 + $0x168] sm:$0xff] }
 0x169   : > { %515 = vadd.xlane.f32.xlu0 %v514_v15  ;;  %v584_v15 = vld [vmem:[%s3761_s5 + $0x178] sm:$0xff] }
 0x1f2   : > { %v516_v34 = vpop.xlane.xlu0 %515 }
 0x1f3   : > { %v517_v35 = vmul.f32 0.03125, %v516_v34  ;;  %v1333_v34 = vld [vmem:[%s3763_s7 + $0x1e8] sm:$0xff] }
 0x1f5   : > { %v518_v36 = vadd.f32 1e-05, %v517_v35  ;;  %v1285_v35 = vld [vmem:[%s3763_s7 + $0x68] sm:$0xff] }
 0x1f7   : > { %2532 = vrsqrt.f32 %v518_v36  ;;  %v1317_v36 = vld [vmem:[%s3763_s7 + $0x168] sm:$0xff] }
 0x204   : > { %v2533_v37 = vpop.eup %2532 }
 0x205   : > { %v520_v39 = vmul.f32 %v2533_v37, %v512_v13  ;;  %v599_v13 = vld [vmem:[%s3761_s5 + $0x1f0] sm:$0xff]  ;;  %v1300_v37 = vld [vmem:[%s3763_s7 + $0xe0] sm:$0xff] }
 0x207   : > { %v528_v41 = vmul.f32 %v2210_v38, %v520_v39  ;;  %v1332_v38 = vld [vmem:[%s3763_s7 + $0x1e0] sm:$0xff] }
 0x208   : > { %v1284_v39 = vld [vmem:[%s3763_s7 + $0x60] sm:$0xff] }
 0x209   : > { %v2711_v42 = vadd.f32 %v2211_v40, %v528_v41  ;;  %v1316_v40 = vld [vmem:[%s3763_s7 + $0x160] sm:$0xff]  ;;  %v1299_v41 = vld [vmem:[%s3763_s7 + $0xd8] sm:$0xff] }
 0x20b   : > { %2212 = vmatmul.mubr.msk.f32.vlgmr.msra.gmra.mxu1 %vm431_vm1, %v2711_v42  ;;  %2213 = vmatmul.mubr.msk.f32.vlgmr.msra.gmra.mxu0 %vm431_vm1, %v2711_v42 }
 0x20c   : > { %855 = vmatpush1.msra.mxu1 %v589_v43  ;;  %926 = vmatpush1.msra.mxu0 %v591_v44  ;;  %v1331_v43 = vld [vmem:[%s3763_s7 + $0x1d8] sm:$0xff] }
 0x20d   : > { %856 = vmatprep.subr.mxu1 %v574_v45  ;;  %927 = vmatprep.subr.mxu0 %v576_v46  ;;  %v1283_v44 = vld [vmem:[%s3763_s7 + $0x58] sm:$0xff]  ;;  %v1298_v46 = vld [vmem:[%s3763_s7 + $0xd0] sm:$0xff] }
 0x20e   : > { %857 = vmatpush1.msra.mxu1 %v573_v47  ;;  %928 = vmatpush1.msra.mxu0 %v575_v48  ;;  %v1315_v45 = vld [vmem:[%s3763_s7 + $0x158] sm:$0xff]  ;;  %v1330_v47 = vld [vmem:[%s3763_s7 + $0x1d0] sm:$0xff] }
 0x20f   : > { %858 = vmatprep.subr.mxu1 %v558_v49  ;;  %929 = vmatprep.subr.mxu0 %v560_v50  ;;  %v1282_v48 = vld [vmem:[%s3763_s7 + $0x50] sm:$0xff]  ;;  %v1297_v50 = vld [vmem:[%s3763_s7 + $0xc8] sm:$0xff] }
 0x210   : > { %859 = vmatpush1.msra.mxu1 %v557_v51  ;;  %930 = vmatpush1.msra.mxu0 %v559_v52  ;;  %v1314_v49 = vld [vmem:[%s3763_s7 + $0x150] sm:$0xff]  ;;  %v1329_v51 = vld [vmem:[%s3763_s7 + $0x1c8] sm:$0xff] }
 0x211   : > { %860 = vmatprep.subr.mxu1 %v542_v53  ;;  %931 = vmatprep.subr.mxu0 %v544_v54  ;;  %v1281_v52 = vld [vmem:[%s3763_s7 + $0x48] sm:$0xff]  ;;  %v1296_v54 = vld [vmem:[%s3763_s7 + $0xc0] sm:$0xff] }
 0x212   : > { %861 = vmatpush1.msra.mxu1 %v541_v55  ;;  %894 = vmatprep.mubr.f32.mxu1 %v2544_v1  ;;  %v1313_v53 = vld [vmem:[%s3763_s7 + $0x148] sm:$0xff]  ;;  %v1328_v55 = vld [vmem:[%s3763_s7 + $0x1c0] sm:$0xff] }
 0x213   : > { %932 = vmatpush1.msra.mxu0 %v543_v56  ;;  %965 = vmatprep.mubr.f32.mxu0 %v2544_v1  ;;  %v1280_v56 = vld [vmem:[%s3763_s7 + $0x40] sm:$0xff] }
 0x214   : > { %2214 = vmatmul.mubr.msk.f32.vlgmr.msra.gmra.mxu1 %vm431_vm1, %v2711_v42  ;;  %2215 = vmatmul.mubr.msk.f32.vlgmr.msra.gmra.mxu0 %vm431_vm1, %v2711_v42 }
 0x215   : > { %996 = vmatprep.subr.mxu1 %v594_v57  ;;  %1067 = vmatprep.subr.mxu0 %v596_v58  ;;  %v1312_v57 = vld [vmem:[%s3763_s7 + $0x140] sm:$0xff]  ;;  %v1295_v58 = vld [vmem:[%s3763_s7 + $0xb8] sm:$0xff] }
 0x216   : > { %997 = vmatpush1.msra.mxu1 %v593_v59  ;;  %1068 = vmatpush1.msra.mxu0 %v595_v60  ;;  %v1327_v59 = vld [vmem:[%s3763_s7 + $0x1b8] sm:$0xff] }
 0x217   : > { %998 = vmatprep.subr.mxu1 %v578_v61  ;;  %1069 = vmatprep.subr.mxu0 %v580_v62  ;;  %v1279_v60 = vld [vmem:[%s3763_s7 + $0x38] sm:$0xff]  ;;  %v1294_v62 = vld [vmem:[%s3763_s7 + $0xb0] sm:$0xff] }
 0x218   : > { %999 = vmatpush1.msra.mxu1 %v577_v63  ;;  %1070 = vmatpush1.msra.mxu0 %v579_v0  ;;  %v1311_v61 = vld [vmem:[%s3763_s7 + $0x138] sm:$0xff]  ;;  %v1326_v63 = vld [vmem:[%s3763_s7 + $0x1b0] sm:$0xff] }
 0x219   : > { %1000 = vmatprep.subr.mxu1 %v562_v2  ;;  %1071 = vmatprep.subr.mxu0 %v564_v3  ;;  %v1278_v0 = vld [vmem:[%s3763_s7 + $0x30] sm:$0xff]  ;;  %v1293_v3 = vld [vmem:[%s3763_s7 + $0xa8] sm:$0xff] }
 0x21a   : > { %1001 = vmatpush1.msra.mxu1 %v561_v4  ;;  %1072 = vmatpush1.msra.mxu0 %v563_v5  ;;  %v1310_v2 = vld [vmem:[%s3763_s7 + $0x130] sm:$0xff]  ;;  %v1325_v4 = vld [vmem:[%s3763_s7 + $0x1a8] sm:$0xff] }
 0x21b   : > { %1002 = vmatprep.subr.mxu1 %v546_v6  ;;  %1073 = vmatprep.subr.mxu0 %v548_v7  ;;  %v1277_v5 = vld [vmem:[%s3763_s7 + $0x28] sm:$0xff]  ;;  %v1292_v7 = vld [vmem:[%s3763_s7 + $0xa0] sm:$0xff] }
 0x21c   : > { %1003 = vmatpush1.msra.mxu1 %v545_v8  ;;  %1036 = vmatprep.mubr.f32.mxu1 %v2544_v1  ;;  %v1309_v6 = vld [vmem:[%s3763_s7 + $0x128] sm:$0xff]  ;;  %v1324_v8 = vld [vmem:[%s3763_s7 + $0x1a0] sm:$0xff] }
 0x21d   : > { %1074 = vmatpush1.msra.mxu0 %v547_v9  ;;  %1107 = vmatprep.mubr.f32.mxu0 %v2544_v1  ;;  %v1276_v9 = vld [vmem:[%s3763_s7 + $0x20] sm:$0xff] }
 0x21e   : > { %2216 = vmatmul.mubr.msk.f32.vlgmr.msra.gmra.mxu1 %vm431_vm1, %v2711_v42  ;;  %2217 = vmatmul.mubr.msk.f32.vlgmr.msra.gmra.mxu0 %vm431_vm1, %v2711_v42 }
 0x21f   : > { %1138 = vmatprep.subr.mxu1 %v598_v10  ;;  %1209 = vmatprep.subr.mxu0 %v600_v11  ;;  %v1308_v10 = vld [vmem:[%s3763_s7 + $0x120] sm:$0xff]  ;;  %v1291_v11 = vld [vmem:[%s3763_s7 + $0x98] sm:$0xff] }
 0x220   : > { %1139 = vmatpush1.msra.mxu1 %v597_v12  ;;  %1210 = vmatpush1.msra.mxu0 %v599_v13  ;;  %v1323_v12 = vld [vmem:[%s3763_s7 + $0x198] sm:$0xff] }
 0x221   : > { %1140 = vmatprep.subr.mxu1 %v582_v14  ;;  %1211 = vmatprep.subr.mxu0 %v584_v15  ;;  %v1275_v13 = vld [vmem:[%s3763_s7 + $0x18] sm:$0xff]  ;;  %v1290_v15 = vld [vmem:[%s3763_s7 + $0x90] sm:$0xff] }
 0x222   : > { %1141 = vmatpush1.msra.mxu1 %v581_v16  ;;  %1212 = vmatpush1.msra.mxu0 %v583_v17  ;;  %v1307_v14 = vld [vmem:[%s3763_s7 + $0x118] sm:$0xff]  ;;  %v1322_v16 = vld [vmem:[%s3763_s7 + $0x190] sm:$0xff] }
 0x223   : > { %1142 = vmatprep.subr.mxu1 %v566_v18  ;;  %1213 = vmatprep.subr.mxu0 %v568_v19  ;;  %v1274_v17 = vld [vmem:[%s3763_s7 + $0x10] sm:$0xff]  ;;  %v1289_v19 = vld [vmem:[%s3763_s7 + $0x88] sm:$0xff] }
 0x224   : > { %1143 = vmatpush1.msra.mxu1 %v565_v20  ;;  %1214 = vmatpush1.msra.mxu0 %v567_v21  ;;  %v1306_v18 = vld [vmem:[%s3763_s7 + $0x110] sm:$0xff]  ;;  %v1321_v20 = vld [vmem:[%s3763_s7 + $0x188] sm:$0xff] }
 0x225   : > { %1144 = vmatprep.subr.mxu1 %v550_v22  ;;  %1215 = vmatprep.subr.mxu0 %v552_v23  ;;  %v1273_v21 = vld [vmem:[%s3763_s7 + $0x8] sm:$0xff]  ;;  %v1288_v23 = vld [vmem:[%s3763_s7 + $0x80] sm:$0xff] }
 0x226   : > { %1145 = vmatpush1.msra.mxu1 %v549_v24  ;;  %1178 = vmatprep.mubr.f32.mxu1 %v2544_v1  ;;  %v1305_v22 = vld [vmem:[%s3763_s7 + $0x108] sm:$0xff]  ;;  %v1320_v24 = vld [vmem:[%s3763_s7 + $0x180] sm:$0xff] }
 0x227   : > { %1216 = vmatpush1.msra.mxu0 %v551_v25  ;;  %1249 = vmatprep.mubr.f32.mxu0 %v2544_v1  ;;  %v1334_v1 = vld [vmem:[%s3763_s7 + $0x1f0] sm:$0xff]  ;;  %v1272_v25 = vld [vmem:[%s3763_s7] sm:$0xff] }
 0x228   : > { %2218 = vmatmul.mubr.msk.f32.vlgmr.msra.gmra.mxu1 %vm431_vm1, %v2711_v42  ;;  %2219 = vmatmul.mubr.msk.f32.vlgmr.msra.gmra.mxu0 %vm431_vm1, %v2711_v42 }
 0x229   : > { %2231 = vmatprep.subr.mxu1 %v1303_v26  ;;  %2266 = vmatprep.subr.mxu0 %v1335_v27  ;;  %v1304_v26 = vld [vmem:[%s3763_s7 + $0x100] sm:$0xff]  ;;  %v1367_v27 = vld [vmem:[%s3763_s7 + $0x2f8] sm:$0xff] }
 0x22a   : > { %2232 = vmatpush3.msra.mxu1 %v1287_v28  ;;  %2267 = vmatpush3.msra.mxu0 %v1319_v29  ;;  %v1399_v28 = vld [vmem:[%s3763_s7 + $0x3f8] sm:$0xff]  ;;  %v605_v29 = vlaneseq }
 0x22b   : > { %2233 = vmatprep.subr.mxu1 %v1302_v30  ;;  %2268 = vmatprep.subr.mxu0 %v1334_v1 }
 0x22c   : > { %2234 = vmatpush3.msra.mxu1 %v1286_v31  ;;  %2269 = vmatpush3.msra.mxu0 %v1318_v32  ;;  %v3071_v30 = vshrl.u32 %v605_v29, 7  ;;  %v3077_v31 = vld [vmem:[%s3762_s6 + $0x8] sm:$0xff] }
 0x22d   : > { %2235 = vmatprep.subr.mxu1 %v1301_v33  ;;  %2270 = vmatprep.subr.mxu0 %v1333_v34  ;;  %v1393_v29 = vld [vmem:[%s3763_s7 + $0x3c8] sm:$0xff] }
 0x22e   : > { %2236 = vmatpush3.msra.mxu1 %v1285_v35  ;;  %2271 = vmatpush3.msra.mxu0 %v1317_v36  ;;  %v623_v1 = vsub.s32 4, %v3071_v30  ;;  %v631_v33 = vsub.s32 6, %v3071_v30  ;;  %v607_v35 = vsub.s32 0, %v3071_v30  ;;  %v615_v36 = vsub.s32 2, %v3071_v30 }
 0x22f   : > { %2237 = vmatprep.subr.mxu1 %v1300_v37  ;;  %2272 = vmatprep.subr.mxu0 %v1332_v38  ;;  %v3095_v37 = vld [vmem:[%s3762_s6] sm:$0xff]  ;;  %v611_v38 = vsub.s32 1, %v3071_v30 }
 0x230   : > { %2238 = vmatpush3.msra.mxu1 %v1284_v39  ;;  %2273 = vmatpush3.msra.mxu0 %v1316_v40  ;;  %v3082_v32 = vrot.slane %v3077_v31, %v623_v1  ;;  %v3088_v34 = vrot.slane %v3077_v31, %v631_v33  ;;  %v619_v39 = vsub.s32 3, %v3071_v30  ;;  %v608_v40 = vrot.slane %v3095_v37, %v607_v35 }
 0x231   : > { %2239 = vmatprep.subr.mxu1 %v1299_v41  ;;  %2274 = vmatprep.subr.mxu0 %v1331_v43  ;;  %v616_v41 = vrot.slane %v3095_v37, %v615_v36  ;;  %v612_v43 = vrot.slane %v3095_v37, %v611_v38 }
 0x232   : > { %2240 = vmatpush3.msra.mxu1 %v1283_v44  ;;  %2275 = vmatpush3.msra.mxu0 %v1315_v45  ;;  %v620_v44 = vrot.slane %v3095_v37, %v619_v39 }
 0x233   : > { %2241 = vmatprep.subr.mxu1 %v1298_v46  ;;  %2276 = vmatprep.subr.mxu0 %v1330_v47 }
 0x234   : > { %2242 = vmatpush3.msra.mxu1 %v1282_v48  ;;  %2277 = vmatpush3.msra.mxu0 %v1314_v49 }
 0x235   : > { %2243 = vmatprep.subr.mxu1 %v1297_v50  ;;  %2278 = vmatprep.subr.mxu0 %v1329_v51 }
 0x236   : > { %2244 = vmatpush3.msra.mxu1 %v1281_v52  ;;  %2279 = vmatpush3.msra.mxu0 %v1313_v53  ;;  %v627_v53 = vsub.s32 5, %v3071_v30 }
 0x237   : > { %2245 = vmatprep.subr.mxu1 %v1296_v54  ;;  %2280 = vmatprep.subr.mxu0 %v1328_v55  ;;  %v635_v54 = vsub.s32 7, %v3071_v30  ;;  %v1401_v30 = vld [vmem:[%s3763_s7 + $0x408] sm:$0xff] }
 0x238   : > { %2246 = vmatpush3.msra.mxu1 %v1280_v56  ;;  %2281 = vmatpush3.msra.mxu0 %v1312_v57 }
 0x239   : > { %2247 = vmatprep.subr.mxu1 %v1295_v58  ;;  %2282 = vmatprep.subr.mxu0 %v1327_v59  ;;  %v1351_v59 = vld [vmem:[%s3763_s7 + $0x278] sm:$0xff] }
 0x23a   : > { %2248 = vmatpush3.msra.mxu1 %v1279_v60  ;;  %2283 = vmatpush3.msra.mxu0 %v1311_v61  ;;  %v1383_v60 = vld [vmem:[%s3763_s7 + $0x378] sm:$0xff]  ;;  %v1366_v61 = vld [vmem:[%s3763_s7 + $0x2f0] sm:$0xff] }
 0x23b   : > { %2249 = vmatprep.subr.mxu1 %v1294_v62  ;;  %2284 = vmatprep.subr.mxu0 %v1326_v63  ;;  %v1398_v62 = vld [vmem:[%s3763_s7 + $0x3f0] sm:$0xff]  ;;  %v628_v63 = vrot.slane %v3095_v37, %v627_v53 }
 0x23c   : > { %2250 = vmatpush3.msra.mxu1 %v1278_v0  ;;  %2285 = vmatpush3.msra.mxu0 %v1310_v2  ;;  %v636_v0 = vrot.slane %v3095_v37, %v635_v54  ;;  %v1350_v2 = vld [vmem:[%s3763_s7 + $0x270] sm:$0xff] }
 0x23d   : > { %2251 = vmatprep.subr.mxu1 %v1293_v3  ;;  %2286 = vmatprep.subr.mxu0 %v1325_v4  ;;  %v1382_v3 = vld [vmem:[%s3763_s7 + $0x370] sm:$0xff] }
 0x23e   : > { %2252 = vmatpush3.msra.mxu1 %v1277_v5  ;;  %2287 = vmatpush3.msra.mxu0 %v1309_v6  ;;  %v1365_v6 = vld [vmem:[%s3763_s7 + $0x2e8] sm:$0xff] }
 0x23f   : > { %2253 = vmatprep.subr.mxu1 %v1292_v7  ;;  %2288 = vmatprep.subr.mxu0 %v1324_v8  ;;  %v1397_v7 = vld [vmem:[%s3763_s7 + $0x3e8] sm:$0xff] }
 0x240   : > { %2254 = vmatpush3.msra.mxu1 %v1276_v9  ;;  %2289 = vmatpush3.msra.mxu0 %v1308_v10  ;;  %v1349_v8 = vld [vmem:[%s3763_s7 + $0x268] sm:$0xff] }
 0x241   : > { %2255 = vmatprep.subr.mxu1 %v1291_v11  ;;  %2290 = vmatprep.subr.mxu0 %v1323_v12  ;;  %v1381_v9 = vld [vmem:[%s3763_s7 + $0x368] sm:$0xff]  ;;  %v1364_v12 = vld [vmem:[%s3763_s7 + $0x2e0] sm:$0xff] }
 0x242   : > { %2256 = vmatpush3.msra.mxu1 %v1275_v13  ;;  %2291 = vmatpush3.msra.mxu0 %v1307_v14  ;;  %v1396_v13 = vld [vmem:[%s3763_s7 + $0x3e0] sm:$0xff] }
 0x243   : > { %2257 = vmatprep.subr.mxu1 %v1290_v15  ;;  %2292 = vmatprep.subr.mxu0 %v1322_v16  ;;  %v1348_v16 = vld [vmem:[%s3763_s7 + $0x260] sm:$0xff] }
 0x244   : > { %2258 = vmatpush3.msra.mxu1 %v1274_v17  ;;  %2293 = vmatpush3.msra.mxu0 %v1306_v18  ;;  %v1380_v17 = vld [vmem:[%s3763_s7 + $0x360] sm:$0xff] }
 0x245   : > { %2259 = vmatprep.subr.mxu1 %v1289_v19  ;;  %2294 = vmatprep.subr.mxu0 %v1321_v20  ;;  %v1363_v20 = vld [vmem:[%s3763_s7 + $0x2d8] sm:$0xff] }
 0x246   : > { %2260 = vmatpush3.msra.mxu1 %v1273_v21  ;;  %2295 = vmatpush3.msra.mxu0 %v1305_v22  ;;  %v1395_v21 = vld [vmem:[%s3763_s7 + $0x3d8] sm:$0xff] }
 0x247   : > { %2261 = vmatprep.subr.mxu1 %v1288_v23  ;;  %2296 = vmatprep.subr.mxu0 %v1320_v24  ;;  %v1347_v22 = vld [vmem:[%s3763_s7 + $0x258] sm:$0xff]  ;;  %v1362_v24 = vld [vmem:[%s3763_s7 + $0x2d0] sm:$0xff] }
 0x248   : > { %2262 = vmatpush3.msra.mxu1 %v1272_v25  ;;  %2297 = vmatpush3.msra.mxu0 %v1304_v26  ;;  %v1379_v23 = vld [vmem:[%s3763_s7 + $0x358] sm:$0xff]  ;;  %v1394_v25 = vld [vmem:[%s3763_s7 + $0x3d0] sm:$0xff] }
 0x249   : > { %2301 = vmatprep.subr.mxu1 %v1367_v27  ;;  %2336 = vmatprep.subr.mxu0 %v1399_v28  ;;  %v1346_v26 = vld [vmem:[%s3763_s7 + $0x250] sm:$0xff]  ;;  %v1361_v28 = vld [vmem:[%s3763_s7 + $0x2c8] sm:$0xff] }
 0x24a   : > { %v1378_v27 = vld [vmem:[%s3763_s7 + $0x350] sm:$0xff] }
 0x2cb   : > { %v754_v45 = vpop.f32.mrf.mxu1  ;;  %v825_v46 = vpop.f32.mrf.mxu0 }
 0x2cc   : > { %v755_v47 = vadd.f32 %v754_v45, %v608_v40  ;;  %v826_v48 = vadd.f32 %v825_v46, %v616_v41  ;;  %v1345_v40 = vld [vmem:[%s3763_s7 + $0x248] sm:$0xff]  ;;  %v1344_v45 = vld [vmem:[%s3763_s7 + $0x240] sm:$0xff] }
 0x2cd   : > { %v756_v49 = vpop.f32.mrf.mxu1  ;;  %v827_v50 = vpop.f32.mrf.mxu0  ;;  %v1377_v41 = vld [vmem:[%s3763_s7 + $0x348] sm:$0xff]  ;;  %v1376_v46 = vld [vmem:[%s3763_s7 + $0x340] sm:$0xff] }
 0x2ce   : > { %v757_v51 = vadd.f32 %v756_v49, %v612_v43  ;;  %v828_v52 = vadd.f32 %v827_v50, %v620_v44  ;;  %v1256_v57 = vmax.f32 %v755_v47, 0.0  ;;  %v1258_v58 = vmax.f32 %v826_v48, 0.0  ;;  %v1360_v43 = vld [vmem:[%s3763_s7 + $0x2c0] sm:$0xff]  ;;  %v1359_v47 = vld [vmem:[%s3763_s7 + $0x2b8] sm:$0xff] }
 0x2cf   : > { %v1392_v44 = vld [vmem:[%s3763_s7 + $0x3c0] sm:$0xff]  ;;  %v1391_v48 = vld [vmem:[%s3763_s7 + $0x3b8] sm:$0xff] }
 0x2d0   : > { %v1257_v55 = vmax.f32 %v757_v51, 0.0  ;;  %v1259_v56 = vmax.f32 %v828_v52, 0.0  ;;  %v1343_v49 = vld [vmem:[%s3763_s7 + $0x238] sm:$0xff]  ;;  %v1358_v51 = vld [vmem:[%s3763_s7 + $0x2b0] sm:$0xff] }
 0x2d1   : > { %v1375_v50 = vld [vmem:[%s3763_s7 + $0x338] sm:$0xff]  ;;  %v1390_v52 = vld [vmem:[%s3763_s7 + $0x3b0] sm:$0xff] }
 0x2d2   : > { %1599 = vmatprep.mubr.f32.mxu1 %v1257_v55  ;;  %1669 = vmatprep.mubr.f32.mxu0 %v1259_v56  ;;  %v1342_v55 = vld [vmem:[%s3763_s7 + $0x230] sm:$0xff] }
 0x2d3   : > { %1600 = vmatmul.mubr.f32.vlgmr.msra.gmra.mxu1 %v1256_v57  ;;  %1670 = vmatmul.mubr.f32.vlgmr.msra.gmra.mxu0 %v1258_v58  ;;  %v1374_v56 = vld [vmem:[%s3763_s7 + $0x330] sm:$0xff]  ;;  %v1357_v57 = vld [vmem:[%s3763_s7 + $0x2a8] sm:$0xff] }
 0x2d4   : > { %v3137_v4 = vpop.f32.mrf.mxu1  ;;  %v3139_v5 = vpop.f32.mrf.mxu0  ;;  %2302 = vmatpush3.msra.mxu1 %v1351_v59  ;;  %2337 = vmatpush3.msra.mxu0 %v1383_v60  ;;  %v1389_v58 = vld [vmem:[%s3763_s7 + $0x3a8] sm:$0xff] }
 0x2d5   : > { %2303 = vmatprep.subr.mxu1 %v1366_v61  ;;  %2338 = vmatprep.subr.mxu0 %v1398_v62  ;;  %v1341_v59 = vld [vmem:[%s3763_s7 + $0x228] sm:$0xff]  ;;  %v1356_v61 = vld [vmem:[%s3763_s7 + $0x2a0] sm:$0xff] }
 0x2d6   : > { %v898_v10 = vpop.f32.mrf.mxu1  ;;  %v969_v11 = vpop.f32.mrf.mxu0  ;;  %2304 = vmatpush3.msra.mxu1 %v1350_v2  ;;  %2339 = vmatpush3.msra.mxu0 %v1382_v3  ;;  %v1373_v60 = vld [vmem:[%s3763_s7 + $0x328] sm:$0xff]  ;;  %v1388_v62 = vld [vmem:[%s3763_s7 + $0x3a0] sm:$0xff]  ;;  %v1355_v3 = vld [vmem:[%s3763_s7 + $0x298] sm:$0xff] }
 0x2d7   : > { %v899_v14 = vadd.f32 %v898_v10, %v628_v63  ;;  %v970_v15 = vadd.f32 %v969_v11, %v636_v0  ;;  %2305 = vmatprep.subr.mxu1 %v1365_v6  ;;  %2340 = vmatprep.subr.mxu0 %v1397_v7  ;;  %v1340_v63 = vld [vmem:[%s3763_s7 + $0x220] sm:$0xff]  ;;  %v1387_v6 = vld [vmem:[%s3763_s7 + $0x398] sm:$0xff]  ;;  %v624_v7 = vrot.slane %v3095_v37, %v623_v1  ;;  %v1354_v1 = vld [vmem:[%s3763_s7 + $0x290] sm:$0xff] }
 0x2d8   : > { %2306 = vmatpush3.msra.mxu1 %v1349_v8  ;;  %2341 = vmatpush3.msra.mxu0 %v1381_v9  ;;  %v1372_v0 = vld [vmem:[%s3763_s7 + $0x320] sm:$0xff]  ;;  %v632_v8 = vrot.slane %v3095_v37, %v631_v33  ;;  %v1339_v10 = vld [vmem:[%s3763_s7 + $0x218] sm:$0xff]  ;;  %v1386_v33 = vld [vmem:[%s3763_s7 + $0x390] sm:$0xff]  ;;  %v644_v37 = vrot.slane %v3077_v31, %v611_v38 }
 0x2d9   : > { %v1261_v18 = vmax.f32 %v899_v14, 0.0  ;;  %v1263_v19 = vmax.f32 %v970_v15, 0.0  ;;  %2307 = vmatprep.subr.mxu1 %v1364_v12  ;;  %2342 = vmatprep.subr.mxu0 %v1396_v13  ;;  %v1371_v11 = vld [vmem:[%s3763_s7 + $0x318] sm:$0xff]  ;;  %v1338_v12 = vld [vmem:[%s3763_s7 + $0x210] sm:$0xff]  ;;  %v652_v15 = vrot.slane %v3077_v31, %v619_v39  ;;  %v1353_v38 = vld [vmem:[%s3763_s7 + $0x288] sm:$0xff] }
 0x2da   : > { %2308 = vmatpush3.msra.mxu1 %v1348_v16  ;;  %2343 = vmatpush3.msra.mxu0 %v1380_v17  ;;  %v1370_v13 = vld [vmem:[%s3763_s7 + $0x310] sm:$0xff]  ;;  %v1385_v16 = vld [vmem:[%s3763_s7 + $0x388] sm:$0xff]  ;;  %v897_v17 = vadd.f32 %v3137_v4, %v624_v7  ;;  %v1384_v4 = vld [vmem:[%s3763_s7 + $0x380] sm:$0xff] }
 0x2db   : > { %1739 = vmatprep.mubr.f32.mxu1 %v1261_v18  ;;  %1809 = vmatprep.mubr.f32.mxu0 %v1263_v19  ;;  %v968_v18 = vadd.f32 %v3139_v5, %v632_v8  ;;  %v1337_v39 = vld [vmem:[%s3763_s7 + $0x208] sm:$0xff] }
 0x2dc   : > { %2309 = vmatprep.subr.mxu1 %v1363_v20  ;;  %2344 = vmatprep.subr.mxu0 %v1395_v21  ;;  %v1369_v20 = vld [vmem:[%s3763_s7 + $0x308] sm:$0xff]  ;;  %v1352_v21 = vld [vmem:[%s3763_s7 + $0x280] sm:$0xff] }
 0x2dd   : > { %2310 = vmatpush3.msra.mxu1 %v1347_v22  ;;  %2345 = vmatpush3.msra.mxu0 %v1379_v23  ;;  %v1336_v22 = vld [vmem:[%s3763_s7 + $0x200] sm:$0xff]  ;;  %v1457_v7 = vld [vmem:[%s3763_s7 + $0x5c8] sm:$0xff] }
 0x2de   : > { %2311 = vmatprep.subr.mxu1 %v1362_v24  ;;  %2346 = vmatprep.subr.mxu0 %v1394_v25  ;;  %v3261_v2 = vpop.f32.mrf.mxu1  ;;  %v3275_v9 = vpop.f32.mrf.mxu0  ;;  %v1368_v23 = vld [vmem:[%s3763_s7 + $0x300] sm:$0xff]  ;;  %v1260_v25 = vmax.f32 %v897_v17, 0.0  ;;  %v1409_v8 = vld [vmem:[%s3763_s7 + $0x448] sm:$0xff]  ;;  %v1406_v17 = vld [vmem:[%s3763_s7 + $0x430] sm:$0xff] }
 0x2df   : > { %2312 = vmatpush3.msra.mxu1 %v1346_v26  ;;  %2347 = vmatpush3.msra.mxu0 %v1378_v27  ;;  %v1262_v26 = vmax.f32 %v968_v18, 0.0  ;;  %v1431_v27 = vld [vmem:[%s3763_s7 + $0x4f8] sm:$0xff]  ;;  %v1438_v18 = vld [vmem:[%s3763_s7 + $0x530] sm:$0xff] }
 0x2e0   : > { %2313 = vmatprep.subr.mxu1 %v1361_v28  ;;  %2348 = vmatprep.subr.mxu0 %v1393_v29  ;;  %v1040_v14 = vpop.f32.mrf.mxu1  ;;  %v1111_v19 = vpop.f32.mrf.mxu0  ;;  %v1463_v28 = vld [vmem:[%s3763_s7 + $0x5f8] sm:$0xff] }
 0x2e1   : > { %2314 = vmatpush3.msra.mxu1 %v1345_v40  ;;  %2349 = vmatpush3.msra.mxu0 %v1377_v41  ;;  %v1041_v5 = vadd.f32 %v1040_v14, %v644_v37  ;;  %v1112_v24 = vadd.f32 %v1111_v19, %v652_v15  ;;  %v1415_v29 = vld [vmem:[%s3763_s7 + $0x478] sm:$0xff]  ;;  %v1440_v37 = vld [vmem:[%s3763_s7 + $0x540] sm:$0xff]  ;;  %v1421_v19 = vld [vmem:[%s3763_s7 + $0x4a8] sm:$0xff] }
 0x2e2   : > { %2315 = vmatprep.subr.mxu1 %v1360_v43  ;;  %2350 = vmatprep.subr.mxu0 %v1392_v44  ;;  %v1447_v41 = vld [vmem:[%s3763_s7 + $0x578] sm:$0xff]  ;;  %v1430_v44 = vld [vmem:[%s3763_s7 + $0x4f0] sm:$0xff] }
 0x2e3   : > { %2316 = vmatpush3.msra.mxu1 %v1344_v45  ;;  %2351 = vmatpush3.msra.mxu0 %v1376_v46  ;;  %v1265_v40 = vmax.f32 %v1041_v5, 0.0  ;;  %v1267_v43 = vmax.f32 %v1112_v24, 0.0  ;;  %v1462_v45 = vld [vmem:[%s3763_s7 + $0x5f0] sm:$0xff]  ;;  %v1407_v14 = vld [vmem:[%s3763_s7 + $0x438] sm:$0xff]  ;;  %v1452_v5 = vld [vmem:[%s3763_s7 + $0x5a0] sm:$0xff] }
 0x2e4   : > { %2317 = vmatprep.subr.mxu1 %v1359_v47  ;;  %2352 = vmatprep.subr.mxu0 %v1391_v48  ;;  %v1414_v46 = vld [vmem:[%s3763_s7 + $0x470] sm:$0xff]  ;;  %v1429_v48 = vld [vmem:[%s3763_s7 + $0x4e8] sm:$0xff]  ;;  %v1439_v15 = vld [vmem:[%s3763_s7 + $0x538] sm:$0xff] }
 0x2e5   : > { %2318 = vmatpush3.msra.mxu1 %v1343_v49  ;;  %2353 = vmatpush3.msra.mxu0 %v1375_v50  ;;  %v1446_v47 = vld [vmem:[%s3763_s7 + $0x570] sm:$0xff]  ;;  %v1461_v49 = vld [vmem:[%s3763_s7 + $0x5e8] sm:$0xff] }
 0x2e6   : > { %2319 = vmatprep.subr.mxu1 %v1358_v51  ;;  %2354 = vmatprep.subr.mxu0 %v1390_v52  ;;  %v1413_v50 = vld [vmem:[%s3763_s7 + $0x468] sm:$0xff]  ;;  %v1428_v52 = vld [vmem:[%s3763_s7 + $0x4e0] sm:$0xff] }
 0x2e7   : > { %2320 = vmatpush3.msra.mxu1 %v1342_v55  ;;  %2355 = vmatpush3.msra.mxu0 %v1374_v56  ;;  %v1445_v51 = vld [vmem:[%s3763_s7 + $0x568] sm:$0xff]  ;;  %v1460_v55 = vld [vmem:[%s3763_s7 + $0x5e0] sm:$0xff] }
 0x2e8   : > { %2321 = vmatprep.subr.mxu1 %v1357_v57  ;;  %2356 = vmatprep.subr.mxu0 %v1389_v58  ;;  %v1412_v56 = vld [vmem:[%s3763_s7 + $0x460] sm:$0xff]  ;;  %v1427_v58 = vld [vmem:[%s3763_s7 + $0x4d8] sm:$0xff]  ;;  %v3471_v24 = vpop.f32.mrf.mxu1 }
 0x2e9   : > { %2322 = vmatpush3.msra.mxu1 %v1341_v59  ;;  %2357 = vmatpush3.msra.mxu0 %v1373_v60  ;;  %v1444_v57 = vld [vmem:[%s3763_s7 + $0x560] sm:$0xff]  ;;  %v1459_v59 = vld [vmem:[%s3763_s7 + $0x5d8] sm:$0xff] }
 0x2ea   : > { %2323 = vmatprep.subr.mxu1 %v1356_v61  ;;  %2358 = vmatprep.subr.mxu0 %v1388_v62  ;;  %v1411_v60 = vld [vmem:[%s3763_s7 + $0x458] sm:$0xff]  ;;  %v1426_v62 = vld [vmem:[%s3763_s7 + $0x4d0] sm:$0xff] }
 0x2eb   : > { %2324 = vmatpush3.msra.mxu1 %v1340_v63  ;;  %2359 = vmatpush3.msra.mxu0 %v1372_v0  ;;  %v1443_v61 = vld [vmem:[%s3763_s7 + $0x558] sm:$0xff]  ;;  %v1458_v63 = vld [vmem:[%s3763_s7 + $0x5d0] sm:$0xff] }
 0x2ec   : > { %2325 = vmatprep.subr.mxu1 %v1355_v3  ;;  %2360 = vmatprep.subr.mxu0 %v1387_v6  ;;  %v1410_v0 = vld [vmem:[%s3763_s7 + $0x450] sm:$0xff]  ;;  %v1425_v6 = vld [vmem:[%s3763_s7 + $0x4c8] sm:$0xff] }
 0x2ed   : > { %2326 = vmatpush3.msra.mxu1 %v1339_v10  ;;  %2361 = vmatpush3.msra.mxu0 %v1371_v11  ;;  %v1442_v3 = vld [vmem:[%s3763_s7 + $0x550] sm:$0xff]  ;;  %v1441_v10 = vld [vmem:[%s3763_s7 + $0x548] sm:$0xff]  ;;  %v1424_v11 = vld [vmem:[%s3763_s7 + $0x4c0] sm:$0xff] }
 0x2ee   : > { %2327 = vmatprep.subr.mxu1 %v1354_v1  ;;  %2362 = vmatprep.subr.mxu0 %v1386_v33  ;;  %v1456_v1 = vld [vmem:[%s3763_s7 + $0x5c0] sm:$0xff] }
 0x2ef   : > { %2328 = vmatpush3.msra.mxu1 %v1338_v12  ;;  %2363 = vmatpush3.msra.mxu0 %v1370_v13  ;;  %v1408_v33 = vld [vmem:[%s3763_s7 + $0x440] sm:$0xff]  ;;  %v1423_v12 = vld [vmem:[%s3763_s7 + $0x4b8] sm:$0xff] }
 0x2f0   : > { %2329 = vmatprep.subr.mxu1 %v1353_v38  ;;  %2364 = vmatprep.subr.mxu0 %v1385_v16  ;;  %v1455_v13 = vld [vmem:[%s3763_s7 + $0x5b8] sm:$0xff]  ;;  %v1422_v38 = vld [vmem:[%s3763_s7 + $0x4b0] sm:$0xff] }
 0x2f1   : > { %2330 = vmatpush3.msra.mxu1 %v1337_v39  ;;  %2365 = vmatpush3.msra.mxu0 %v1369_v20  ;;  %v1454_v16 = vld [vmem:[%s3763_s7 + $0x5b0] sm:$0xff]  ;;  %v1453_v39 = vld [vmem:[%s3763_s7 + $0x5a8] sm:$0xff] }
 0x2f2   : > { %2331 = vmatprep.subr.mxu1 %v1352_v21  ;;  %2366 = vmatprep.subr.mxu0 %v1384_v4  ;;  %v1405_v20 = vld [vmem:[%s3763_s7 + $0x428] sm:$0xff]  ;;  %v1420_v4 = vld [vmem:[%s3763_s7 + $0x4a0] sm:$0xff] }
 0x2f3   : > { %2332 = vmatpush3.msra.mxu1 %v1336_v22  ;;  %2367 = vmatpush3.msra.mxu0 %v1368_v23  ;;  %v1437_v21 = vld [vmem:[%s3763_s7 + $0x528] sm:$0xff]  ;;  %v1404_v22 = vld [vmem:[%s3763_s7 + $0x420] sm:$0xff] }
 0x2f4   : > { %1740 = vmatmul.mubr.f32.vlgmr.msra.gmra.mxu1 %v1260_v25  ;;  %1810 = vmatmul.mubr.f32.vlgmr.msra.gmra.mxu0 %v1262_v26  ;;  %v1436_v23 = vld [vmem:[%s3763_s7 + $0x520] sm:$0xff]  ;;  %v1419_v25 = vld [vmem:[%s3763_s7 + $0x498] sm:$0xff] }
 0x2f5   : > { %2371 = vmatprep.subr.mxu1 %v1431_v27  ;;  %2406 = vmatprep.subr.mxu0 %v1463_v28  ;;  %v1451_v26 = vld [vmem:[%s3763_s7 + $0x598] sm:$0xff]  ;;  %v640_v27 = vrot.slane %v3077_v31, %v607_v35  ;;  %v648_v28 = vrot.slane %v3077_v31, %v615_v36  ;;  %v1418_v35 = vld [vmem:[%s3763_s7 + $0x490] sm:$0xff] }
 0x2f6   : > { %2372 = vmatpush3.msra.mxu1 %v1415_v29  ;;  %1879 = vmatprep.mubr.f32.mxu1 %v1265_v40  ;;  %v3485_v29 = vpop.f32.mrf.mxu0  ;;  %v1403_v40 = vld [vmem:[%s3763_s7 + $0x418] sm:$0xff]  ;;  %v1450_v36 = vld [vmem:[%s3763_s7 + $0x590] sm:$0xff] }
 0x2f7   : > { %2407 = vmatpush3.msra.mxu0 %v1447_v41  ;;  %1949 = vmatprep.mubr.f32.mxu0 %v1267_v43  ;;  %v1435_v41 = vld [vmem:[%s3763_s7 + $0x518] sm:$0xff]  ;;  %v660_v43 = vrot.slane %v3077_v31, %v627_v53  ;;  %v1417_v53 = vld [vmem:[%s3763_s7 + $0x488] sm:$0xff] }
 0x2f8   : > { %2373 = vmatprep.subr.mxu1 %v1430_v44  ;;  %2408 = vmatprep.subr.mxu0 %v1462_v45  ;;  %v1402_v44 = vld [vmem:[%s3763_s7 + $0x410] sm:$0xff] }
 0x2f9   : > { %2374 = vmatpush3.msra.mxu1 %v1414_v46  ;;  %2409 = vmatpush3.msra.mxu0 %v1446_v47  ;;  %v1434_v45 = vld [vmem:[%s3763_s7 + $0x510] sm:$0xff]  ;;  %v1182_v46 = vpop.f32.mrf.mxu1  ;;  %v668_v47 = vrot.slane %v3077_v31, %v635_v54  ;;  %v1433_v31 = vld [vmem:[%s3763_s7 + $0x508] sm:$0xff]  ;;  %v1416_v54 = vld [vmem:[%s3763_s7 + $0x480] sm:$0xff] }
 0x2fa   : > { %2375 = vmatprep.subr.mxu1 %v1429_v48  ;;  %2410 = vmatprep.subr.mxu0 %v1461_v49  ;;  %v1449_v48 = vld [vmem:[%s3763_s7 + $0x588] sm:$0xff]  ;;  %v1039_v49 = vadd.f32 %v3261_v2, %v640_v27  ;;  %v1448_v2 = vld [vmem:[%s3763_s7 + $0x580] sm:$0xff] }
 0x2fb   : > { %2376 = vmatpush3.msra.mxu1 %v1413_v50  ;;  %2411 = vmatpush3.msra.mxu0 %v1445_v51  ;;  %v1110_v50 = vadd.f32 %v3275_v9, %v648_v28  ;;  %v1253_v51 = vpop.f32.mrf.mxu0  ;;  %v1183_v9 = vadd.f32 %v1182_v46, %v660_v43  ;;  %v1504_v27 = vld [vmem:[%s3763_s7 + $0x740] sm:$0xff]  ;;  %v1487_v28 = vld [vmem:[%s3763_s7 + $0x6b8] sm:$0xff]  ;;  %v1518_v43 = vld [vmem:[%s3763_s7 + $0x7b0] sm:$0xff] }
 0x2fc   : > { %2377 = vmatprep.subr.mxu1 %v1428_v52  ;;  %2412 = vmatprep.subr.mxu0 %v1460_v55  ;;  %v1400_v52 = vld [vmem:[%s3763_s7 + $0x400] sm:$0xff]  ;;  %v1485_v46 = vld [vmem:[%s3763_s7 + $0x6a8] sm:$0xff] }
 0x2fd   : > { %2378 = vmatpush3.msra.mxu1 %v1412_v56  ;;  %2413 = vmatpush3.msra.mxu0 %v1444_v57  ;;  %v1432_v55 = vld [vmem:[%s3763_s7 + $0x500] sm:$0xff]  ;;  %v1254_v56 = vadd.f32 %v1253_v51, %v668_v47  ;;  %v1264_v57 = vmax.f32 %v1039_v49, 0.0  ;;  %v1517_v47 = vld [vmem:[%s3763_s7 + $0x7a8] sm:$0xff] }
 0x2fe   : > { %2379 = vmatprep.subr.mxu1 %v1427_v58  ;;  %2414 = vmatprep.subr.mxu0 %v1459_v59  ;;  %v1266_v58 = vmax.f32 %v1110_v50, 0.0  ;;  %v1495_v59 = vld [vmem:[%s3763_s7 + $0x6f8] sm:$0xff]  ;;  %v1484_v49 = vld [vmem:[%s3763_s7 + $0x6a0] sm:$0xff] }
 0x2ff   : > { %2380 = vmatpush3.msra.mxu1 %v1411_v60  ;;  %2415 = vmatpush3.msra.mxu0 %v1443_v61  ;;  %v1527_v60 = vld [vmem:[%s3763_s7 + $0x7f8] sm:$0xff]  ;;  %v1516_v50 = vld [vmem:[%s3763_s7 + $0x7a0] sm:$0xff] }
 0x300   : > { %2381 = vmatprep.subr.mxu1 %v1426_v62  ;;  %2416 = vmatprep.subr.mxu0 %v1458_v63  ;;  %v1479_v61 = vld [vmem:[%s3763_s7 + $0x678] sm:$0xff]  ;;  %v1269_v62 = vmax.f32 %v1183_v9, 0.0  ;;  %v1468_v51 = vld [vmem:[%s3763_s7 + $0x620] sm:$0xff] }
 0x301   : > { %2382 = vmatpush3.msra.mxu1 %v1410_v0  ;;  %2417 = vmatpush3.msra.mxu0 %v1442_v3  ;;  %v1511_v63 = vld [vmem:[%s3763_s7 + $0x778] sm:$0xff]  ;;  %v1271_v0 = vmax.f32 %v1254_v56, 0.0  ;;  %v1494_v3 = vld [vmem:[%s3763_s7 + $0x6f0] sm:$0xff] }
 0x302   : > { %2383 = vmatprep.subr.mxu1 %v1425_v6  ;;  %2418 = vmatprep.subr.mxu0 %v1457_v7  ;;  %v1526_v6 = vld [vmem:[%s3763_s7 + $0x7f0] sm:$0xff]  ;;  %v1499_v9 = vld [vmem:[%s3763_s7 + $0x718] sm:$0xff] }
 0x303   : > { %2384 = vmatpush3.msra.mxu1 %v1409_v8  ;;  %2419 = vmatpush3.msra.mxu0 %v1441_v10  ;;  %v1478_v7 = vld [vmem:[%s3763_s7 + $0x670] sm:$0xff]  ;;  %v1493_v10 = vld [vmem:[%s3763_s7 + $0x6e8] sm:$0xff] }
 0x304   : > { %2385 = vmatprep.subr.mxu1 %v1424_v11  ;;  %2420 = vmatprep.subr.mxu0 %v1456_v1  ;;  %v1510_v8 = vld [vmem:[%s3763_s7 + $0x770] sm:$0xff]  ;;  %v1525_v11 = vld [vmem:[%s3763_s7 + $0x7e8] sm:$0xff] }
 0x305   : > { %2386 = vmatpush3.msra.mxu1 %v1408_v33  ;;  %2421 = vmatpush3.msra.mxu0 %v1440_v37  ;;  %v1477_v1 = vld [vmem:[%s3763_s7 + $0x668] sm:$0xff]  ;;  %v1492_v37 = vld [vmem:[%s3763_s7 + $0x6e0] sm:$0xff]  ;;  %v1466_v56 = vld [vmem:[%s3763_s7 + $0x610] sm:$0xff] }
 0x306   : > { %2387 = vmatprep.subr.mxu1 %v1423_v12  ;;  %2422 = vmatprep.subr.mxu0 %v1455_v13  ;;  %v1509_v33 = vld [vmem:[%s3763_s7 + $0x768] sm:$0xff]  ;;  %v1524_v12 = vld [vmem:[%s3763_s7 + $0x7e0] sm:$0xff] }
 0x307   : > { %2388 = vmatpush3.msra.mxu1 %v1407_v14  ;;  %2423 = vmatpush3.msra.mxu0 %v1439_v15  ;;  %v1476_v13 = vld [vmem:[%s3763_s7 + $0x660] sm:$0xff]  ;;  %v1491_v15 = vld [vmem:[%s3763_s7 + $0x6d8] sm:$0xff] }
 0x308   : > { %2389 = vmatprep.subr.mxu1 %v1422_v38  ;;  %2424 = vmatprep.subr.mxu0 %v1454_v16  ;;  %v1508_v14 = vld [vmem:[%s3763_s7 + $0x760] sm:$0xff]  ;;  %v1523_v38 = vld [vmem:[%s3763_s7 + $0x7d8] sm:$0xff] }
 0x309   : > { %2390 = vmatpush3.msra.mxu1 %v1406_v17  ;;  %2425 = vmatpush3.msra.mxu0 %v1438_v18  ;;  %v1475_v16 = vld [vmem:[%s3763_s7 + $0x658] sm:$0xff]  ;;  %v1490_v18 = vld [vmem:[%s3763_s7 + $0x6d0] sm:$0xff] }
 0x30a   : > { %2391 = vmatprep.subr.mxu1 %v1421_v19  ;;  %2426 = vmatprep.subr.mxu0 %v1453_v39  ;;  %v1507_v17 = vld [vmem:[%s3763_s7 + $0x758] sm:$0xff]  ;;  %v1522_v19 = vld [vmem:[%s3763_s7 + $0x7d0] sm:$0xff] }
 0x30b   : > { %2392 = vmatpush3.msra.mxu1 %v1405_v20  ;;  %2427 = vmatpush3.msra.mxu0 %v1437_v21  ;;  %v1474_v39 = vld [vmem:[%s3763_s7 + $0x650] sm:$0xff]  ;;  %v1489_v21 = vld [vmem:[%s3763_s7 + $0x6c8] sm:$0xff] }
 0x30c   : > { %2393 = vmatprep.subr.mxu1 %v1420_v4  ;;  %2428 = vmatprep.subr.mxu0 %v1452_v5  ;;  %v1506_v20 = vld [vmem:[%s3763_s7 + $0x750] sm:$0xff]  ;;  %v1521_v4 = vld [vmem:[%s3763_s7 + $0x7c8] sm:$0xff] }
 0x30d   : > { %2394 = vmatpush3.msra.mxu1 %v1404_v22  ;;  %2429 = vmatpush3.msra.mxu0 %v1436_v23  ;;  %v1473_v5 = vld [vmem:[%s3763_s7 + $0x648] sm:$0xff]  ;;  %v1488_v23 = vld [vmem:[%s3763_s7 + $0x6c0] sm:$0xff] }
 0x30e   : > { %2395 = vmatprep.subr.mxu1 %v1419_v25  ;;  %2430 = vmatprep.subr.mxu0 %v1451_v26  ;;  %v1505_v22 = vld [vmem:[%s3763_s7 + $0x748] sm:$0xff]  ;;  %v1520_v25 = vld [vmem:[%s3763_s7 + $0x7c0] sm:$0xff] }
 0x30f   : > { %2396 = vmatpush3.msra.mxu1 %v1403_v40  ;;  %2431 = vmatpush3.msra.mxu0 %v1435_v41  ;;  %v1472_v26 = vld [vmem:[%s3763_s7 + $0x640] sm:$0xff]  ;;  %v1519_v40 = vld [vmem:[%s3763_s7 + $0x7b8] sm:$0xff] }
 0x310   : > { %2397 = vmatprep.subr.mxu1 %v1418_v35  ;;  %2432 = vmatprep.subr.mxu0 %v1450_v36  ;;  %v1471_v41 = vld [vmem:[%s3763_s7 + $0x638] sm:$0xff]  ;;  %v1486_v36 = vld [vmem:[%s3763_s7 + $0x6b0] sm:$0xff] }
 0x311   : > { %2398 = vmatpush3.msra.mxu1 %v1402_v44  ;;  %2433 = vmatpush3.msra.mxu0 %v1434_v45  ;;  %v1503_v35 = vld [vmem:[%s3763_s7 + $0x738] sm:$0xff]  ;;  %v1470_v44 = vld [vmem:[%s3763_s7 + $0x630] sm:$0xff] }
 0x312   : > { %2399 = vmatprep.subr.mxu1 %v1417_v53  ;;  %2434 = vmatprep.subr.mxu0 %v1449_v48  ;;  %v1502_v45 = vld [vmem:[%s3763_s7 + $0x730] sm:$0xff]  ;;  %v1469_v53 = vld [vmem:[%s3763_s7 + $0x628] sm:$0xff] }
 0x313   : > { %2400 = vmatpush3.msra.mxu1 %v1401_v30  ;;  %2435 = vmatpush3.msra.mxu0 %v1433_v31  ;;  %v1501_v48 = vld [vmem:[%s3763_s7 + $0x728] sm:$0xff]  ;;  %v1500_v30 = vld [vmem:[%s3763_s7 + $0x720] sm:$0xff]  ;;  %v1483_v31 = vld [vmem:[%s3763_s7 + $0x698] sm:$0xff] }
 0x314   : > { %2401 = vmatprep.subr.mxu1 %v1416_v54  ;;  %2436 = vmatprep.subr.mxu0 %v1448_v2  ;;  %v1515_v54 = vld [vmem:[%s3763_s7 + $0x798] sm:$0xff] }
 0x315   : > { %2402 = vmatpush3.msra.mxu1 %v1400_v52  ;;  %2437 = vmatpush3.msra.mxu0 %v1432_v55  ;;  %v1467_v2 = vld [vmem:[%s3763_s7 + $0x618] sm:$0xff]  ;;  %v1482_v52 = vld [vmem:[%s3763_s7 + $0x690] sm:$0xff] }
 0x316   : > { %1880 = vmatmul.mubr.f32.vlgmr.msra.gmra.mxu1 %v1264_v57  ;;  %1950 = vmatmul.mubr.f32.vlgmr.msra.gmra.mxu0 %v1266_v58  ;;  %v1514_v55 = vld [vmem:[%s3763_s7 + $0x790] sm:$0xff]  ;;  %v1481_v58 = vld [vmem:[%s3763_s7 + $0x688] sm:$0xff] }
 0x317   : > { %2441 = vmatprep.subr.mxu1 %v1495_v59  ;;  %2476 = vmatprep.subr.mxu0 %v1527_v60  ;;  %v1498_v57 = vld [vmem:[%s3763_s7 + $0x710] sm:$0xff]  ;;  %v1513_v59 = vld [vmem:[%s3763_s7 + $0x788] sm:$0xff]  ;;  %v1181_v60 = vadd.f32 %v3471_v24, %v3082_v32  ;;  %v1512_v32 = vld [vmem:[%s3763_s7 + $0x780] sm:$0xff] }
 0x318   : > { %2442 = vmatpush3.msra.mxu1 %v1479_v61  ;;  %2019 = vmatprep.mubr.f32.mxu1 %v1269_v62  ;;  %v1252_v61 = vadd.f32 %v3485_v29, %v3088_v34  ;;  %v1465_v62 = vld [vmem:[%s3763_s7 + $0x608] sm:$0xff]  ;;  %v1464_v34 = vld [vmem:[%s3763_s7 + $0x600] sm:$0xff] }
 0x319   : > { %2477 = vmatpush3.msra.mxu0 %v1511_v63  ;;  %2089 = vmatprep.mubr.f32.mxu0 %v1271_v0  ;;  %v1497_v63 = vld [vmem:[%s3763_s7 + $0x708] sm:$0xff]  ;;  %v1480_v0 = vld [vmem:[%s3763_s7 + $0x680] sm:$0xff]  ;;  %v1268_v29 = vmax.f32 %v1181_v60, 0.0 }
 0x31a   : > { %2443 = vmatprep.subr.mxu1 %v1494_v3  ;;  %2478 = vmatprep.subr.mxu0 %v1526_v6  ;;  %v1496_v24 = vld [vmem:[%s3763_s7 + $0x700] sm:$0xff]  ;;  %v1270_v3 = vmax.f32 %v1252_v61, 0.0 }
 0x31b   : > { %2444 = vmatpush3.msra.mxu1 %v1478_v7  ;;  %2479 = vmatpush3.msra.mxu0 %v1510_v8 }
 0x31c   : > { %2445 = vmatprep.subr.mxu1 %v1493_v10  ;;  %2480 = vmatprep.subr.mxu0 %v1525_v11 }
 0x31d   : > { %2446 = vmatpush3.msra.mxu1 %v1477_v1  ;;  %2481 = vmatpush3.msra.mxu0 %v1509_v33  ;;  %v2220_v1 = vld [vmem:[%s3764_s8] ss:$0 sm:$0xff] }
 0x31e   : > { %2447 = vmatprep.subr.mxu1 %v1492_v37  ;;  %2482 = vmatprep.subr.mxu0 %v1524_v12 }
 0x31f   : > { %2448 = vmatpush3.msra.mxu1 %v1476_v13  ;;  %2483 = vmatpush3.msra.mxu0 %v1508_v14 }
 0x320   : > { %2449 = vmatprep.subr.mxu1 %v1491_v15  ;;  %2484 = vmatprep.subr.mxu0 %v1523_v38 }
 0x321   : > { %2450 = vmatpush3.msra.mxu1 %v1475_v16  ;;  %2485 = vmatpush3.msra.mxu0 %v1507_v17 }
 0x322   : > { %2451 = vmatprep.subr.mxu1 %v1490_v18  ;;  %2486 = vmatprep.subr.mxu0 %v1522_v19 }
 0x323   : > { %2452 = vmatpush3.msra.mxu1 %v1474_v39  ;;  %2487 = vmatpush3.msra.mxu0 %v1506_v20 }
 0x324   : > { %2453 = vmatprep.subr.mxu1 %v1489_v21  ;;  %2488 = vmatprep.subr.mxu0 %v1521_v4 }
 0x325   : > { %2454 = vmatpush3.msra.mxu1 %v1473_v5  ;;  %2489 = vmatpush3.msra.mxu0 %v1505_v22 }
 0x326   : > { %2455 = vmatprep.subr.mxu1 %v1488_v23  ;;  %2490 = vmatprep.subr.mxu0 %v1520_v25 }
 0x327   : > { %2456 = vmatpush3.msra.mxu1 %v1472_v26  ;;  %2491 = vmatpush3.msra.mxu0 %v1504_v27 }
 0x328   : > { %2457 = vmatprep.subr.mxu1 %v1487_v28  ;;  %2492 = vmatprep.subr.mxu0 %v1519_v40 }
 0x329   : > { %2458 = vmatpush3.msra.mxu1 %v1471_v41  ;;  %2493 = vmatpush3.msra.mxu0 %v1503_v35 }
 0x32a   : > { %2459 = vmatprep.subr.mxu1 %v1486_v36  ;;  %2494 = vmatprep.subr.mxu0 %v1518_v43 }
 0x32b   : > { %2460 = vmatpush3.msra.mxu1 %v1470_v44  ;;  %2495 = vmatpush3.msra.mxu0 %v1502_v45 }
 0x32c   : > { %2461 = vmatprep.subr.mxu1 %v1485_v46  ;;  %2496 = vmatprep.subr.mxu0 %v1517_v47 }
 0x32d   : > { %2462 = vmatpush3.msra.mxu1 %v1469_v53  ;;  %2497 = vmatpush3.msra.mxu0 %v1501_v48 }
 0x32e   : > { %2463 = vmatprep.subr.mxu1 %v1484_v49  ;;  %2498 = vmatprep.subr.mxu0 %v1516_v50 }
 0x32f   : > { %2464 = vmatpush3.msra.mxu1 %v1468_v51  ;;  %2499 = vmatpush3.msra.mxu0 %v1500_v30 }
 0x330   : > { %2465 = vmatprep.subr.mxu1 %v1483_v31  ;;  %2500 = vmatprep.subr.mxu0 %v1515_v54 }
 0x331   : > { %2466 = vmatpush3.msra.mxu1 %v1467_v2  ;;  %2501 = vmatpush3.msra.mxu0 %v1499_v9  ;;  %v2222_v2 = vld [vmem:[%s3766_s10] ss:$0 sm:$0xff] }
 0x332   : > { %2467 = vmatprep.subr.mxu1 %v1482_v52  ;;  %2502 = vmatprep.subr.mxu0 %v1514_v55  ;;  %v2223_v52 = vld [vmem:[%s3767_s11] ss:$0 sm:$0xff] }
 0x333   : > { %2468 = vmatpush3.msra.mxu1 %v1466_v56  ;;  %2503 = vmatpush3.msra.mxu0 %v1498_v57 }
 0x334   : > { %2469 = vmatprep.subr.mxu1 %v1481_v58  ;;  %2504 = vmatprep.subr.mxu0 %v1513_v59 }
 0x335   : > { %2470 = vmatpush3.msra.mxu1 %v1465_v62  ;;  %2505 = vmatpush3.msra.mxu0 %v1497_v63 }
 0x336   : > { %2471 = vmatprep.subr.mxu1 %v1480_v0  ;;  %2506 = vmatprep.subr.mxu0 %v1512_v32 }
 0x337   : > { %2472 = vmatpush3.msra.mxu1 %v1464_v34  ;;  %2507 = vmatpush3.msra.mxu0 %v1496_v24 }
 0x338   : > { %2020 = vmatmul.mubr.f32.vlgmr.msra.gmra.mxu1 %v1268_v29  ;;  %2090 = vmatmul.mubr.f32.vlgmr.msra.gmra.mxu0 %v1270_v3 }
 0x393   : > { %v2263_v6 = vpop.f32.mrf.mxu1  ;;  %v2298_v8 = vpop.f32.mrf.mxu0 }
 0x395   : > { %v2264_v7 = vpop.f32.mrf.mxu1  ;;  %v2299_v33 = vpop.f32.mrf.mxu0 }
 0x396   : > { %v2265_v11 = vadd.f32 %v2264_v7, %v2263_v6  ;;  %v2300_v15 = vadd.f32 %v2299_v33, %v2298_v8 }
 0x398   : > { %v1602_v12 = vadd.f32 %v2265_v11, %v2220_v1 }
 0x39a   : > { %v1672_v16 = vadd.f32 %v2300_v15, %v1602_v12 }
 0x3b4   : > { %v2333_v10 = vpop.f32.mrf.mxu1  ;;  %v2368_v13 = vpop.f32.mrf.mxu0 }
 0x3b6   : > { %v2334_v37 = vpop.f32.mrf.mxu1  ;;  %v2369_v17 = vpop.f32.mrf.mxu0 }
 0x3b7   : > { %v2335_v38 = vadd.f32 %v2334_v37, %v2333_v10  ;;  %v2370_v20 = vadd.f32 %v2369_v17, %v2368_v13 }
 0x3b9   : > { %v1742_v19 = vadd.f32 %v2335_v38, %v1672_v16 }
 0x3bb   : > { %v1812_v4 = vadd.f32 %v2370_v20, %v1742_v19 }
 0x3d6   : > { %v2403_v14 = vpop.f32.mrf.mxu1  ;;  %v2438_v39 = vpop.f32.mrf.mxu0 }
 0x3d8   : > { %v2404_v18 = vpop.f32.mrf.mxu1  ;;  %v2439_v5 = vpop.f32.mrf.mxu0 }
 0x3d9   : > { %v2405_v21 = vadd.f32 %v2404_v18, %v2403_v14  ;;  %v2440_v26 = vadd.f32 %v2439_v5, %v2438_v39 }
 0x3db   : > { %v1882_v22 = vadd.f32 %v2405_v21, %v1812_v4 }
 0x3dd   : > { %v1952_v40 = vadd.f32 %v2440_v26, %v1882_v22 }
 0x3f8   : > { %v2473_v23 = vpop.f32.mrf.mxu1  ;;  %v2508_v25 = vpop.f32.mrf.mxu0 }
 0x3fa   : > { %v2474_v27 = vpop.f32.mrf.mxu1  ;;  %v2509_v28 = vpop.f32.mrf.mxu0 }
 0x3fb   : > { %v2475_v41 = vadd.f32 %v2474_v27, %v2473_v23  ;;  %v2510_v36 = vadd.f32 %v2509_v28, %v2508_v25 }
 0x3fd   : > { %v2022_v35 = vadd.f32 %v2475_v41, %v1952_v40 }
 0x3ff   : > { %v2092_v43 = vadd.f32 %v2510_v36, %v2022_v35 }
 0x401   : > { %v2095_v44 = vadd.f32 %v2092_v43, %v2711_v42  ;;  %v2221_v42 = vld [vmem:[%s3765_s9] ss:$0 sm:$0xff] }
 0x403   : > { %v2096_v45 = vsel %vm431_vm1, %v2095_v44, 0.0 }
 0x404   : > { %2097 = vadd.xlane.f32.xlu1 %v2096_v45 }
 0x48d   : > { %v2098_v46 = vpop.xlane.xlu1 %2097 }
 0x48e   : > { %v2099_v47 = vmul.f32 0.03125, %v2098_v46 }
 0x490   : > { %v2100_v53 = vsub.f32 %v2095_v44, %v2099_v47 }
 0x492   : > { %v2101_v48 = vmul.f32 %v2100_v53, %v2100_v53 }
 0x494   : > { %v2102_v49 = vsel %vm431_vm1, %v2101_v48, 0.0 }
 0x495   : > { %2103 = vadd.xlane.f32.xlu1 %v2102_v49 }
 0x51e   : > { %v2104_v50 = vpop.xlane.xlu1 %2103 }
 0x51f   : > { %v2105_v51 = vmul.f32 0.03125, %v2104_v50 }
 0x521   : > { %v2106_v30 = vadd.f32 1e-05, %v2105_v51 }
 0x523   : > { %2534 = vrsqrt.f32 %v2106_v30 }
 0x530   : > { %v2535_v31 = vpop.eup %2534 }
 0x531   : > { %v2108_v54 = vmul.f32 %v2535_v31, %v2100_v53 }
 0x533   : > { %v2116_v9 = vmul.f32 %v2221_v42, %v2108_v54 }
 0x535   : > { %v2124_v55 = vadd.f32 %v2222_v2, %v2116_v9 }
 0x537   : > { %vm2125_vm2 = vcmp.gt.f32.partialorder %v2124_v55, 0.0  ;;  %v2133_v56 = vmul.f32 %v2223_v52, %v2124_v55 }
 0x539   : > { %v2134_v57 = vsel %vm2125_vm2, %v2124_v55, %v2133_v56 }
 0x53a   : > { %2135 = vst.msk [vmem:[%s425_s23] sm:$0xff] %vm431_vm1, %v2134_v57 }
 0x53b PF: > { %s22_s21 = sadd.s32 1, %s2542_s21  }
 0x53c   : > { %p19_p4 = scmp.ge.s32.totalorder %s22_s21, 4  }
 0x53e   :  { %21 = sbr.rel (!%p19_p4) target bundleno = 1 (0x1), region = 101 }

// kernel: encoder_forward.13
= control target key start
LH: loop header
LB: loop body
LE: loop exit
PB: predicated region body
PF: predicated region fallthrough
CT: control target
= control target key end

     0   :  { %s3934_s0 = inlined_call_operand.vmem [shape: f32[16,32], index: 0, kind: input, shape index: {}]   ;;  %s3935_s1 = inlined_call_operand.vmem [shape: f32[16,32], index: 1, kind: input, shape index: {}]   ;;  %s3936_s2 = inlined_call_operand.vmem [shape: f32[32,32], index: 2, kind: input, shape index: {}]   ;;  %s3937_s3 = inlined_call_operand.vmem [shape: f32[1,32], index: 3, kind: input, shape index: {}]   ;;  %s3938_s4 = inlined_call_operand.vmem [shape: f32[1,32], index: 4, kind: input, shape index: {}]   ;;  %s3939_s5 = inlined_call_operand.vmem [shape: f32[32,2048], index: 5, kind: input, shape index: {}]   ;;  %s3940_s6 = inlined_call_operand.vmem [shape: f32[1,2048], index: 6, kind: input, shape index: {}]   ;;  %s3941_s7 = inlined_call_operand.vmem [shape: f32[2048,32], index: 7, kind: input, shape index: {}]   ;;  %s3942_s8 = inlined_call_operand.vmem [shape: f32[1,32], index: 8, kind: input, shape index: {}]   ;;  %s3943_s9 = inlined_call_operand.vmem [shape: f32[1,32], index: 9, kind: input, shape index: {}]   ;;  %s3944_s10 = inlined_call_operand.vmem [shape: f32[1,32], index: 10, kind: input, shape index: {}]   ;;  %s3945_s11 = inlined_call_operand.vmem [shape: f32[1,32], index: 11, kind: input, shape index: {}]   ;;  %s3946_s12 = inlined_call_operand.hbm [shape: f32[16,32], index: 12, kind: output, shape index: {}]  }
   0x1   :  { %3947 = sst [smem:[#allocation5_spill]] %s3934_s0 }
   0x2   :  { %3948 = sst [smem:[#allocation6_spill]] %s3935_s1 }
   0x3   :  { %3949 = sst [smem:[#allocation7_spill]] %s3936_s2 }
   0x4   :  { %17 = vsyncpa [#allocation3], 0 }
   0x5   :  { %19 = vsyncpa [#allocation3 + $0x1], 0  ;;  %s2718_s21 = smov 0   ;;  %s2720_s22 = smov 0  }
   0x6   :  { %s2722_s23 = smov 0   ;;  %s2724_s24 = smov 0  }
   0x7 LB: > { %s2739_s25 = sadd.s32 4294967295, %s2648_s24   ;;  %s2221_s26 = sadd.s32 4294967294, %s2648_s24   ;;  %s2648_s24 = sphi %s2724_s24, %s3958_s24   ;;  %s2644_s23 = sphi %s2722_s23, %s3957_s23   ;;  %s2640_s22 = sphi %s2720_s22, %s3956_s22   ;;  %s2636_s21 = sphi %s2718_s21, %s3955_s21  }
   0x8   : > { %s2743_s27 = sadd.s32 1, %s2648_s24   ;;  %s294_s28 = sadd.s32 1, %s2644_s23 }
   0x9   : > { %s291_s29 = ssub.s32 %s2648_s24, %s2743_s27  ;;  %p304_p0 = scmp.ne.s32.totalorder %s2644_s23, %s2640_s22 }
   0xa   : > { %p292_p1 = scmp.eq.s32.totalorder %s291_s29, 0  ;;  %p305_p2 = scmp.eq.s32.totalorder %s2739_s25, 1 }
   0xb   : > { %p310_p3 = scmp.ne.s32.totalorder %s2640_s22, %s2636_s21  ;;  %p311_p4 = scmp.eq.s32.totalorder %s2221_s26, 1 }
   0xc   : > { %s2754_s30 = scalar_select %p292_p1, %s2644_s23, %s294_s28  }
   0xd   : > { %p2756_p5 = por %p305_p2, %p304_p0  ;;  %p2760_p6 = por %p311_p4, %p310_p3 }
   0xe   : > { %p2224_p7 = scmp.ge.s32.totalorder %s2648_s24, 1  ;;  %p373_p8 = scmp.lt.s32.totalorder %s2648_s24, 3 }
  0x10   : > { %p374_p9 = pnand %p2224_p7, %p373_p8 }
  0x11   : > { %s3952_s2 = sld [smem:[#allocation7_spill]] (!%p374_p9)  ;;  %p418_p10 = scmp.lt.s32.totalorder (!%p374_p9), %s2739_s25, 1 }
  0x12   : > { %377 = sbr.rel (%p374_p9) target bundleno = 1363 (0x553), region = 68  ;;  %s3953_s1 = sld [smem:[#allocation6_spill]] (!%p374_p9) }
  0x13   : > { %s3954_s0 = sld [smem:[#allocation5_spill]] (!%p374_p9)  ;;  %s415_s29 = sand.u32 (!%p374_p9), 1, %s2640_s22  }
  0x14   : > { %s2225_s15 = sshll.u32 (!%p374_p9), %s415_s29, 3  ;;  %s2137_s17 = scalar_lea.sflag (!%p374_p9), [#allocation3], %s415_s29 }
  0x17   : > { %v430_v0 = vld [vmem:[%s3952_s2 + $0x18] sm:$0xff]  ;;  %v2650_v1 = vmov 0.0   ;;  %v429_v2 = vld [vmem:[%s3952_s2 + $0x10] sm:$0xff]  ;;  %vm2651_vm0 = vmmov 0   ;;  %s419_s19 = scalar_select %p418_p10, %s2739_s25, 1  ;;  %v428_v3 = vld [vmem:[%s3952_s2 + $0x8] sm:$0xff] }
  0x18   : > { %2532 = vmatprep.subr.mxu0 %v2650_v1  ;;  %2540 = vmatprep.mubr.msk.f32.mxu0 %vm2651_vm0, %v2650_v1  ;;  %v427_v4 = vld [vmem:[%s3952_s2] sm:$0xff]  ;;  %vm431_vm1 = vcmask 261120   ;;  %v586_v16 = vld [vmem:[%s3939_s5 + $0x188] sm:$0xff]  ;;  %v588_v17 = vld [vmem:[%s3939_s5 + $0x198] sm:$0xff] }
  0x19   : > { %2533 = vmatpush3.msra.mxu0 %v430_v0  ;;  %752 = vmatprep.mubr.f32.mxu1 %v2650_v1  ;;  %s2226_s28 = sshll.u32 %s419_s19, 3  ;;  %v585_v18 = vld [vmem:[%s3939_s5 + $0x180] sm:$0xff]  ;;  %v587_v19 = vld [vmem:[%s3939_s5 + $0x190] sm:$0xff]  ;;  %v570_v20 = vld [vmem:[%s3939_s5 + $0x108] sm:$0xff] }
  0x1a   : > { %2534 = vmatprep.subr.mxu0 %v2650_v1  ;;  %s425_s18 = scalar_lea.vmem %s3953_s1, %s2226_s28  ;;  %s421_s26 = scalar_lea.vmem %s3954_s0, %s2226_s28  ;;  %712 = vmatprep.subr.mxu1 %v586_v16  ;;  %v572_v21 = vld [vmem:[%s3939_s5 + $0x118] sm:$0xff]  ;;  %v569_v22 = vld [vmem:[%s3939_s5 + $0x100] sm:$0xff]  ;;  %v571_v23 = vld [vmem:[%s3939_s5 + $0x110] sm:$0xff] }
  0x1b   : > { %2535 = vmatpush3.msra.mxu0 %v429_v2  ;;  %v426_v5 = vld [vmem:[%s425_s18] sm:$0xff]  ;;  %713 = vmatpush1.msra.mxu1 %v585_v18  ;;  %v554_v24 = vld [vmem:[%s3939_s5 + $0x88] sm:$0xff]  ;;  %v556_v25 = vld [vmem:[%s3939_s5 + $0x98] sm:$0xff]  ;;  %s2244_s0 = sshll.u32 %s2739_s25, 7  ;;  %s2652_s25 = smov [#allocation2]  }
  0x1c   : > { %2536 = vmatprep.subr.mxu0 %v2650_v1  ;;  %v505_v6 = vld [vmem:[%s421_s26] sm:$0xff]  ;;  %714 = vmatprep.subr.mxu1 %v570_v20  ;;  %v555_v27 = vld [vmem:[%s3939_s5 + $0x90] sm:$0xff]  ;;  %v538_v28 = vld [vmem:[%s3939_s5 + $0x8] sm:$0xff]  ;;  %s417_s26 = scalar_lea.vmem [#allocation2], %s2225_s15  ;;  %s3898_s28 = scalar_lea.hbm %s3946_s12, %s2244_s0 }
  0x1d   : > { %2537 = vmatpush3.msra.mxu0 %v428_v3  ;;  %715 = vmatpush1.msra.mxu1 %v569_v22  ;;  %v553_v26 = vld [vmem:[%s3939_s5 + $0x80] sm:$0xff]  ;;  %v540_v29 = vld [vmem:[%s3939_s5 + $0x18] sm:$0xff]  ;;  %v539_v31 = vld [vmem:[%s3939_s5 + $0x10] sm:$0xff]  ;;  %s2150_s1 = sshll.u32 %s417_s26, 4  ;;  %s2592_s15 = sshll.u32 %s2652_s25, 4  ;;  %s2151_s1 = int_to_ptr.vmem [resolvable:$true] %s2150_s1  ;;  %s2593_s15 = int_to_ptr.vmem [resolvable:$false] %s2592_s15 }
  0x1e   : > { %2538 = vmatprep.subr.mxu0 %v2650_v1  ;;  %716 = vmatprep.subr.mxu1 %v554_v24  ;;  %v537_v30 = vld [vmem:[%s3939_s5] sm:$0xff]  ;;  %v590_v32 = vld [vmem:[%s3939_s5 + $0x1a8] sm:$0xff]  ;;  %v592_v33 = vld [vmem:[%s3939_s5 + $0x1b8] sm:$0xff]  ;;  %s2588_s18 = scalar_lea.vmem %s2151_s1, 128  ;;  %s2594_s19 = scalar_lea.vmem %s2593_s15, 256 }
  0x1f   : > { %2539 = vmatpush3.msra.mxu0 %v427_v4  ;;  %717 = vmatpush1.msra.mxu1 %v553_v26  ;;  %v2229_v38 = vld [vmem:[%s3937_s3] ss:$0 sm:$0xff]  ;;  %v591_v44 = vld [vmem:[%s3939_s5 + $0x1b0] sm:$0xff]  ;;  %v574_v45 = vld [vmem:[%s3939_s5 + $0x128] sm:$0xff]  ;;  %p2589_p11 = scmp.ne.s32.totalorder %s2151_s1, %s2588_s18  ;;  %p2595_p0 = scmp.lt.s32.totalorder %s2151_s1, %s2593_s15 }
  0x20   : > { %2541 = vmatmul.mubr.msk.f32.vlgmr.msra.gmra.mxu0 %vm431_vm1, %v426_v5  ;;  %783 = vmatprep.subr.mxu0 %v588_v17  ;;  %v2230_v40 = vld [vmem:[%s3938_s4] ss:$0 sm:$0xff]  ;;  %v576_v46 = vld [vmem:[%s3939_s5 + $0x138] sm:$0xff]  ;;  %v575_v48 = vld [vmem:[%s3939_s5 + $0x130] sm:$0xff]  ;;  %p2596_p1 = scmp.lt.s32.totalorder %s2594_s19, %s2588_s18 }
  0x21   : > { %823 = vmatprep.mubr.f32.mxu0 %v2650_v1  ;;  %784 = vmatpush1.msra.mxu0 %v587_v19  ;;  %v589_v43 = vld [vmem:[%s3939_s5 + $0x1a0] sm:$0xff]  ;;  %v558_v49 = vld [vmem:[%s3939_s5 + $0xa8] sm:$0xff]  ;;  %v560_v50 = vld [vmem:[%s3939_s5 + $0xb8] sm:$0xff]  ;;  %p2590_p12 = pnand %p2589_p11, %p2756_p5 }
  0x22   : > { %785 = vmatprep.subr.mxu0 %v572_v21  ;;  %718 = vmatprep.subr.mxu1 %v538_v28  ;;  %v573_v47 = vld [vmem:[%s3939_s5 + $0x120] sm:$0xff]  ;;  %v559_v52 = vld [vmem:[%s3939_s5 + $0xb0] sm:$0xff]  ;;  %v542_v53 = vld [vmem:[%s3939_s5 + $0x28] sm:$0xff]  ;;  %p2597_p2 = por %p2596_p1, %p2595_p0 }
  0x23   : > { %786 = vmatpush1.msra.mxu0 %v571_v23  ;;  %719 = vmatpush1.msra.mxu1 %v537_v30  ;;  %v557_v51 = vld [vmem:[%s3939_s5 + $0xa0] sm:$0xff]  ;;  %v544_v54 = vld [vmem:[%s3939_s5 + $0x38] sm:$0xff]  ;;  %v543_v56 = vld [vmem:[%s3939_s5 + $0x30] sm:$0xff]  ;;  %p2591_p13 = pneg %p2590_p12 }
  0x24   : > { %787 = vmatprep.subr.mxu0 %v556_v25  ;;  %854 = vmatprep.subr.mxu1 %v590_v32  ;;  %v541_v55 = vld [vmem:[%s3939_s5 + $0x20] sm:$0xff]  ;;  %v594_v57 = vld [vmem:[%s3939_s5 + $0x1c8] sm:$0xff]  ;;  %v596_v58 = vld [vmem:[%s3939_s5 + $0x1d8] sm:$0xff] }
  0x25   : > { %788 = vmatpush1.msra.mxu0 %v555_v27  ;;  %v593_v59 = vld [vmem:[%s3939_s5 + $0x1c0] sm:$0xff]  ;;  %v595_v60 = vld [vmem:[%s3939_s5 + $0x1d0] sm:$0xff]  ;;  %v578_v61 = vld [vmem:[%s3939_s5 + $0x148] sm:$0xff]  ;;  %p2598_p3 = pnand %p2597_p2, %p2591_p13 }
  0x26   : > { %789 = vmatprep.subr.mxu0 %v540_v29  ;;  %v580_v62 = vld [vmem:[%s3939_s5 + $0x158] sm:$0xff]  ;;  %v577_v63 = vld [vmem:[%s3939_s5 + $0x140] sm:$0xff]  ;;  %v579_v0 = vld [vmem:[%s3939_s5 + $0x150] sm:$0xff] }
  0x27   : > { %790 = vmatpush1.msra.mxu0 %v539_v31  ;;  %v562_v2 = vld [vmem:[%s3939_s5 + $0xc8] sm:$0xff]  ;;  %v564_v3 = vld [vmem:[%s3939_s5 + $0xd8] sm:$0xff]  ;;  %v561_v4 = vld [vmem:[%s3939_s5 + $0xc0] sm:$0xff] }
  0x28   : > { %925 = vmatprep.subr.mxu0 %v592_v33  ;;  %v563_v5 = vld [vmem:[%s3939_s5 + $0xd0] sm:$0xff]  ;;  %v581_v16 = vld [vmem:[%s3939_s5 + $0x160] sm:$0xff]  ;;  %v566_v18 = vld [vmem:[%s3939_s5 + $0xe8] sm:$0xff] }
  0x29   : > { %v583_v17 = vld [vmem:[%s3939_s5 + $0x170] sm:$0xff]  ;;  %v568_v19 = vld [vmem:[%s3939_s5 + $0xf8] sm:$0xff]  ;;  %v565_v20 = vld [vmem:[%s3939_s5 + $0xe0] sm:$0xff] }
  0x2a   : > { %v567_v21 = vld [vmem:[%s3939_s5 + $0xf0] sm:$0xff]  ;;  %v550_v22 = vld [vmem:[%s3939_s5 + $0x68] sm:$0xff]  ;;  %v552_v23 = vld [vmem:[%s3939_s5 + $0x78] sm:$0xff] }
  0x2b   : > { %v549_v24 = vld [vmem:[%s3939_s5 + $0x60] sm:$0xff]  ;;  %v551_v25 = vld [vmem:[%s3939_s5 + $0x70] sm:$0xff]  ;;  %v1303_v26 = vld [vmem:[%s3941_s7 + $0xf8] sm:$0xff] }
  0x2c   : > { %v1335_v27 = vld [vmem:[%s3941_s7 + $0x1f8] sm:$0xff]  ;;  %v1302_v30 = vld [vmem:[%s3941_s7 + $0xf0] sm:$0xff]  ;;  %v1301_v33 = vld [vmem:[%s3941_s7 + $0xe8] sm:$0xff] }
  0x2d   : > { %v1287_v28 = vld [vmem:[%s3941_s7 + $0x78] sm:$0xff]  ;;  %v1286_v31 = vld [vmem:[%s3941_s7 + $0x70] sm:$0xff] }
  0x2e   : > { %v1319_v29 = vld [vmem:[%s3941_s7 + $0x178] sm:$0xff]  ;;  %v1318_v32 = vld [vmem:[%s3941_s7 + $0x170] sm:$0xff] }
  0xe0   : > { %v501_v7 = vpop.f32.mrf.mxu0 }
  0xe1   : > { %v506_v8 = vadd.f32 %v505_v6, %v501_v7  ;;  %v546_v6 = vld [vmem:[%s3939_s5 + $0x48] sm:$0xff]  ;;  %v548_v7 = vld [vmem:[%s3939_s5 + $0x58] sm:$0xff] }
  0xe2   : > { %v2542_v9 = vpop.f32.mrf.mxu0 }
  0xe3   : > { %v507_v10 = vsel %vm431_vm1, %v506_v8, 0.0  ;;  %v547_v9 = vld [vmem:[%s3939_s5 + $0x50] sm:$0xff] }
  0xe4   : > { %508 = vadd.xlane.f32.xlu0 %v507_v10  ;;  %v598_v10 = vld [vmem:[%s3939_s5 + $0x1e8] sm:$0xff] }
 0x16d   : > { %v509_v11 = vpop.xlane.xlu0 %508 }
 0x16e   : > { %v511_v12 = vmul.f32 0.03125, %v509_v11  ;;  %v600_v11 = vld [vmem:[%s3939_s5 + $0x1f8] sm:$0xff] }
 0x170   : > { %v512_v13 = vsub.f32 %v506_v8, %v511_v12  ;;  %v545_v8 = vld [vmem:[%s3939_s5 + $0x40] sm:$0xff] }
 0x171   : > { %v597_v12 = vld [vmem:[%s3939_s5 + $0x1e0] sm:$0xff] }
 0x172   : > { %v513_v14 = vmul.f32 %v512_v13, %v512_v13 }
 0x174   : > { %v514_v15 = vsel %vm431_vm1, %v513_v14, 0.0  ;;  %v582_v14 = vld [vmem:[%s3939_s5 + $0x168] sm:$0xff] }
 0x175   : > { %515 = vadd.xlane.f32.xlu0 %v514_v15  ;;  %v584_v15 = vld [vmem:[%s3939_s5 + $0x178] sm:$0xff] }
 0x1fe   : > { %v516_v34 = vpop.xlane.xlu0 %515 }
 0x1ff   : > { %v517_v35 = vmul.f32 0.03125, %v516_v34  ;;  %v1333_v34 = vld [vmem:[%s3941_s7 + $0x1e8] sm:$0xff] }
 0x201   : > { %v518_v36 = vadd.f32 1e-05, %v517_v35  ;;  %v1285_v35 = vld [vmem:[%s3941_s7 + $0x68] sm:$0xff] }
 0x203   : > { %2584 = vrsqrt.f32 %v518_v36  ;;  %v1317_v36 = vld [vmem:[%s3941_s7 + $0x168] sm:$0xff] }
 0x210   : > { %v2585_v37 = vpop.eup %2584 }
 0x211   : > { %v520_v39 = vmul.f32 %v2585_v37, %v512_v13  ;;  %v599_v13 = vld [vmem:[%s3939_s5 + $0x1f0] sm:$0xff]  ;;  %v1300_v37 = vld [vmem:[%s3941_s7 + $0xe0] sm:$0xff] }
 0x213   : > { %v528_v41 = vmul.f32 %v2229_v38, %v520_v39  ;;  %v1332_v38 = vld [vmem:[%s3941_s7 + $0x1e0] sm:$0xff] }
 0x214   : > { %v1284_v39 = vld [vmem:[%s3941_s7 + $0x60] sm:$0xff] }
 0x215   : > { %v2856_v42 = vadd.f32 %v2230_v40, %v528_v41  ;;  %v1316_v40 = vld [vmem:[%s3941_s7 + $0x160] sm:$0xff]  ;;  %v1299_v41 = vld [vmem:[%s3941_s7 + $0xd8] sm:$0xff] }
 0x217   : > { %2231 = vmatmul.mubr.msk.f32.vlgmr.msra.gmra.mxu1 %vm431_vm1, %v2856_v42  ;;  %2232 = vmatmul.mubr.msk.f32.vlgmr.msra.gmra.mxu0 %vm431_vm1, %v2856_v42 }
 0x218   : > { %855 = vmatpush1.msra.mxu1 %v589_v43  ;;  %926 = vmatpush1.msra.mxu0 %v591_v44  ;;  %v1331_v43 = vld [vmem:[%s3941_s7 + $0x1d8] sm:$0xff] }
 0x219   : > { %856 = vmatprep.subr.mxu1 %v574_v45  ;;  %927 = vmatprep.subr.mxu0 %v576_v46  ;;  %v1283_v44 = vld [vmem:[%s3941_s7 + $0x58] sm:$0xff]  ;;  %v1298_v46 = vld [vmem:[%s3941_s7 + $0xd0] sm:$0xff] }
 0x21a   : > { %857 = vmatpush1.msra.mxu1 %v573_v47  ;;  %928 = vmatpush1.msra.mxu0 %v575_v48  ;;  %v1315_v45 = vld [vmem:[%s3941_s7 + $0x158] sm:$0xff]  ;;  %v1330_v47 = vld [vmem:[%s3941_s7 + $0x1d0] sm:$0xff] }
 0x21b   : > { %858 = vmatprep.subr.mxu1 %v558_v49  ;;  %929 = vmatprep.subr.mxu0 %v560_v50  ;;  %v1282_v48 = vld [vmem:[%s3941_s7 + $0x50] sm:$0xff]  ;;  %v1297_v50 = vld [vmem:[%s3941_s7 + $0xc8] sm:$0xff] }
 0x21c   : > { %859 = vmatpush1.msra.mxu1 %v557_v51  ;;  %930 = vmatpush1.msra.mxu0 %v559_v52  ;;  %v1314_v49 = vld [vmem:[%s3941_s7 + $0x150] sm:$0xff]  ;;  %v1329_v51 = vld [vmem:[%s3941_s7 + $0x1c8] sm:$0xff] }
 0x21d   : > { %860 = vmatprep.subr.mxu1 %v542_v53  ;;  %931 = vmatprep.subr.mxu0 %v544_v54  ;;  %v1281_v52 = vld [vmem:[%s3941_s7 + $0x48] sm:$0xff]  ;;  %v1296_v54 = vld [vmem:[%s3941_s7 + $0xc0] sm:$0xff] }
 0x21e   : > { %861 = vmatpush1.msra.mxu1 %v541_v55  ;;  %894 = vmatprep.mubr.f32.mxu1 %v2650_v1  ;;  %v1313_v53 = vld [vmem:[%s3941_s7 + $0x148] sm:$0xff]  ;;  %v1328_v55 = vld [vmem:[%s3941_s7 + $0x1c0] sm:$0xff] }
 0x21f   : > { %932 = vmatpush1.msra.mxu0 %v543_v56  ;;  %965 = vmatprep.mubr.f32.mxu0 %v2650_v1  ;;  %v1280_v56 = vld [vmem:[%s3941_s7 + $0x40] sm:$0xff] }
 0x220   : > { %2233 = vmatmul.mubr.msk.f32.vlgmr.msra.gmra.mxu1 %vm431_vm1, %v2856_v42  ;;  %2234 = vmatmul.mubr.msk.f32.vlgmr.msra.gmra.mxu0 %vm431_vm1, %v2856_v42 }
 0x221   : > { %996 = vmatprep.subr.mxu1 %v594_v57  ;;  %1067 = vmatprep.subr.mxu0 %v596_v58  ;;  %v1312_v57 = vld [vmem:[%s3941_s7 + $0x140] sm:$0xff]  ;;  %v1295_v58 = vld [vmem:[%s3941_s7 + $0xb8] sm:$0xff] }
 0x222   : > { %997 = vmatpush1.msra.mxu1 %v593_v59  ;;  %1068 = vmatpush1.msra.mxu0 %v595_v60  ;;  %v1327_v59 = vld [vmem:[%s3941_s7 + $0x1b8] sm:$0xff] }
 0x223   : > { %998 = vmatprep.subr.mxu1 %v578_v61  ;;  %1069 = vmatprep.subr.mxu0 %v580_v62  ;;  %v1279_v60 = vld [vmem:[%s3941_s7 + $0x38] sm:$0xff]  ;;  %v1294_v62 = vld [vmem:[%s3941_s7 + $0xb0] sm:$0xff] }
 0x224   : > { %999 = vmatpush1.msra.mxu1 %v577_v63  ;;  %1070 = vmatpush1.msra.mxu0 %v579_v0  ;;  %v1311_v61 = vld [vmem:[%s3941_s7 + $0x138] sm:$0xff]  ;;  %v1326_v63 = vld [vmem:[%s3941_s7 + $0x1b0] sm:$0xff] }
 0x225   : > { %1000 = vmatprep.subr.mxu1 %v562_v2  ;;  %1071 = vmatprep.subr.mxu0 %v564_v3  ;;  %v1278_v0 = vld [vmem:[%s3941_s7 + $0x30] sm:$0xff]  ;;  %v1293_v3 = vld [vmem:[%s3941_s7 + $0xa8] sm:$0xff] }
 0x226   : > { %1001 = vmatpush1.msra.mxu1 %v561_v4  ;;  %1072 = vmatpush1.msra.mxu0 %v563_v5  ;;  %v1310_v2 = vld [vmem:[%s3941_s7 + $0x130] sm:$0xff]  ;;  %v1325_v4 = vld [vmem:[%s3941_s7 + $0x1a8] sm:$0xff] }
 0x227   : > { %1002 = vmatprep.subr.mxu1 %v546_v6  ;;  %1073 = vmatprep.subr.mxu0 %v548_v7  ;;  %v1277_v5 = vld [vmem:[%s3941_s7 + $0x28] sm:$0xff]  ;;  %v1292_v7 = vld [vmem:[%s3941_s7 + $0xa0] sm:$0xff] }
 0x228   : > { %1003 = vmatpush1.msra.mxu1 %v545_v8  ;;  %1036 = vmatprep.mubr.f32.mxu1 %v2650_v1  ;;  %v1309_v6 = vld [vmem:[%s3941_s7 + $0x128] sm:$0xff]  ;;  %v1324_v8 = vld [vmem:[%s3941_s7 + $0x1a0] sm:$0xff] }
 0x229   : > { %1074 = vmatpush1.msra.mxu0 %v547_v9  ;;  %1107 = vmatprep.mubr.f32.mxu0 %v2650_v1  ;;  %v1276_v9 = vld [vmem:[%s3941_s7 + $0x20] sm:$0xff] }
 0x22a   : > { %2235 = vmatmul.mubr.msk.f32.vlgmr.msra.gmra.mxu1 %vm431_vm1, %v2856_v42  ;;  %2236 = vmatmul.mubr.msk.f32.vlgmr.msra.gmra.mxu0 %vm431_vm1, %v2856_v42 }
 0x22b   : > { %1138 = vmatprep.subr.mxu1 %v598_v10  ;;  %1209 = vmatprep.subr.mxu0 %v600_v11  ;;  %v1308_v10 = vld [vmem:[%s3941_s7 + $0x120] sm:$0xff]  ;;  %v1291_v11 = vld [vmem:[%s3941_s7 + $0x98] sm:$0xff] }
 0x22c   : > { %1139 = vmatpush1.msra.mxu1 %v597_v12  ;;  %1210 = vmatpush1.msra.mxu0 %v599_v13  ;;  %v1323_v12 = vld [vmem:[%s3941_s7 + $0x198] sm:$0xff] }
 0x22d   : > { %1140 = vmatprep.subr.mxu1 %v582_v14  ;;  %1211 = vmatprep.subr.mxu0 %v584_v15  ;;  %v1275_v13 = vld [vmem:[%s3941_s7 + $0x18] sm:$0xff]  ;;  %v1290_v15 = vld [vmem:[%s3941_s7 + $0x90] sm:$0xff] }
 0x22e   : > { %1141 = vmatpush1.msra.mxu1 %v581_v16  ;;  %1212 = vmatpush1.msra.mxu0 %v583_v17  ;;  %v1307_v14 = vld [vmem:[%s3941_s7 + $0x118] sm:$0xff]  ;;  %v1322_v16 = vld [vmem:[%s3941_s7 + $0x190] sm:$0xff] }
 0x22f   : > { %1142 = vmatprep.subr.mxu1 %v566_v18  ;;  %1213 = vmatprep.subr.mxu0 %v568_v19  ;;  %v1274_v17 = vld [vmem:[%s3941_s7 + $0x10] sm:$0xff]  ;;  %v1289_v19 = vld [vmem:[%s3941_s7 + $0x88] sm:$0xff] }
 0x230   : > { %1143 = vmatpush1.msra.mxu1 %v565_v20  ;;  %1214 = vmatpush1.msra.mxu0 %v567_v21  ;;  %v1306_v18 = vld [vmem:[%s3941_s7 + $0x110] sm:$0xff]  ;;  %v1321_v20 = vld [vmem:[%s3941_s7 + $0x188] sm:$0xff] }
 0x231   : > { %1144 = vmatprep.subr.mxu1 %v550_v22  ;;  %1215 = vmatprep.subr.mxu0 %v552_v23  ;;  %v1273_v21 = vld [vmem:[%s3941_s7 + $0x8] sm:$0xff]  ;;  %v1288_v23 = vld [vmem:[%s3941_s7 + $0x80] sm:$0xff] }
 0x232   : > { %1145 = vmatpush1.msra.mxu1 %v549_v24  ;;  %1178 = vmatprep.mubr.f32.mxu1 %v2650_v1  ;;  %v1305_v22 = vld [vmem:[%s3941_s7 + $0x108] sm:$0xff]  ;;  %v1320_v24 = vld [vmem:[%s3941_s7 + $0x180] sm:$0xff] }
 0x233   : > { %1216 = vmatpush1.msra.mxu0 %v551_v25  ;;  %1249 = vmatprep.mubr.f32.mxu0 %v2650_v1  ;;  %v1334_v1 = vld [vmem:[%s3941_s7 + $0x1f0] sm:$0xff]  ;;  %v1272_v25 = vld [vmem:[%s3941_s7] sm:$0xff] }
 0x234   : > { %2237 = vmatmul.mubr.msk.f32.vlgmr.msra.gmra.mxu1 %vm431_vm1, %v2856_v42  ;;  %2238 = vmatmul.mubr.msk.f32.vlgmr.msra.gmra.mxu0 %vm431_vm1, %v2856_v42 }
 0x235   : > { %2252 = vmatprep.subr.mxu1 %v1303_v26  ;;  %2287 = vmatprep.subr.mxu0 %v1335_v27  ;;  %v1304_v26 = vld [vmem:[%s3941_s7 + $0x100] sm:$0xff]  ;;  %v1367_v27 = vld [vmem:[%s3941_s7 + $0x2f8] sm:$0xff] }
 0x236   : > { %2253 = vmatpush3.msra.mxu1 %v1287_v28  ;;  %2288 = vmatpush3.msra.mxu0 %v1319_v29  ;;  %v1399_v28 = vld [vmem:[%s3941_s7 + $0x3f8] sm:$0xff]  ;;  %v605_v29 = vlaneseq }
 0x237   : > { %2254 = vmatprep.subr.mxu1 %v1302_v30  ;;  %2289 = vmatprep.subr.mxu0 %v1334_v1 }
 0x238   : > { %2255 = vmatpush3.msra.mxu1 %v1286_v31  ;;  %2290 = vmatpush3.msra.mxu0 %v1318_v32  ;;  %v3216_v30 = vshrl.u32 %v605_v29, 7  ;;  %v3222_v31 = vld [vmem:[%s3940_s6 + $0x8] sm:$0xff] }
 0x239   : > { %2256 = vmatprep.subr.mxu1 %v1301_v33  ;;  %2291 = vmatprep.subr.mxu0 %v1333_v34  ;;  %v1393_v29 = vld [vmem:[%s3941_s7 + $0x3c8] sm:$0xff] }
 0x23a   : > { %2257 = vmatpush3.msra.mxu1 %v1285_v35  ;;  %2292 = vmatpush3.msra.mxu0 %v1317_v36  ;;  %v623_v1 = vsub.s32 4, %v3216_v30  ;;  %v631_v33 = vsub.s32 6, %v3216_v30  ;;  %v607_v35 = vsub.s32 0, %v3216_v30  ;;  %v615_v36 = vsub.s32 2, %v3216_v30 }
 0x23b   : > { %2258 = vmatprep.subr.mxu1 %v1300_v37  ;;  %2293 = vmatprep.subr.mxu0 %v1332_v38  ;;  %v3240_v37 = vld [vmem:[%s3940_s6] sm:$0xff]  ;;  %v611_v38 = vsub.s32 1, %v3216_v30 }
 0x23c   : > { %2259 = vmatpush3.msra.mxu1 %v1284_v39  ;;  %2294 = vmatpush3.msra.mxu0 %v1316_v40  ;;  %v3227_v32 = vrot.slane %v3222_v31, %v623_v1  ;;  %v3233_v34 = vrot.slane %v3222_v31, %v631_v33  ;;  %v619_v39 = vsub.s32 3, %v3216_v30  ;;  %v608_v40 = vrot.slane %v3240_v37, %v607_v35 }
 0x23d   : > { %2260 = vmatprep.subr.mxu1 %v1299_v41  ;;  %2295 = vmatprep.subr.mxu0 %v1331_v43  ;;  %v616_v41 = vrot.slane %v3240_v37, %v615_v36  ;;  %v612_v43 = vrot.slane %v3240_v37, %v611_v38 }
 0x23e   : > { %2261 = vmatpush3.msra.mxu1 %v1283_v44  ;;  %2296 = vmatpush3.msra.mxu0 %v1315_v45  ;;  %v620_v44 = vrot.slane %v3240_v37, %v619_v39 }
 0x23f   : > { %2262 = vmatprep.subr.mxu1 %v1298_v46  ;;  %2297 = vmatprep.subr.mxu0 %v1330_v47 }
 0x240   : > { %2263 = vmatpush3.msra.mxu1 %v1282_v48  ;;  %2298 = vmatpush3.msra.mxu0 %v1314_v49 }
 0x241   : > { %2264 = vmatprep.subr.mxu1 %v1297_v50  ;;  %2299 = vmatprep.subr.mxu0 %v1329_v51 }
 0x242   : > { %2265 = vmatpush3.msra.mxu1 %v1281_v52  ;;  %2300 = vmatpush3.msra.mxu0 %v1313_v53  ;;  %v627_v53 = vsub.s32 5, %v3216_v30 }
 0x243   : > { %2266 = vmatprep.subr.mxu1 %v1296_v54  ;;  %2301 = vmatprep.subr.mxu0 %v1328_v55  ;;  %v635_v54 = vsub.s32 7, %v3216_v30  ;;  %v1401_v30 = vld [vmem:[%s3941_s7 + $0x408] sm:$0xff] }
 0x244   : > { %2267 = vmatpush3.msra.mxu1 %v1280_v56  ;;  %2302 = vmatpush3.msra.mxu0 %v1312_v57 }
 0x245   : > { %2268 = vmatprep.subr.mxu1 %v1295_v58  ;;  %2303 = vmatprep.subr.mxu0 %v1327_v59  ;;  %v1351_v59 = vld [vmem:[%s3941_s7 + $0x278] sm:$0xff] }
 0x246   : > { %2269 = vmatpush3.msra.mxu1 %v1279_v60  ;;  %2304 = vmatpush3.msra.mxu0 %v1311_v61  ;;  %v1383_v60 = vld [vmem:[%s3941_s7 + $0x378] sm:$0xff]  ;;  %v1366_v61 = vld [vmem:[%s3941_s7 + $0x2f0] sm:$0xff] }
 0x247   : > { %2270 = vmatprep.subr.mxu1 %v1294_v62  ;;  %2305 = vmatprep.subr.mxu0 %v1326_v63  ;;  %v1398_v62 = vld [vmem:[%s3941_s7 + $0x3f0] sm:$0xff]  ;;  %v628_v63 = vrot.slane %v3240_v37, %v627_v53 }
 0x248   : > { %2271 = vmatpush3.msra.mxu1 %v1278_v0  ;;  %2306 = vmatpush3.msra.mxu0 %v1310_v2  ;;  %v636_v0 = vrot.slane %v3240_v37, %v635_v54  ;;  %v1350_v2 = vld [vmem:[%s3941_s7 + $0x270] sm:$0xff] }
 0x249   : > { %2272 = vmatprep.subr.mxu1 %v1293_v3  ;;  %2307 = vmatprep.subr.mxu0 %v1325_v4  ;;  %v1382_v3 = vld [vmem:[%s3941_s7 + $0x370] sm:$0xff] }
 0x24a   : > { %2273 = vmatpush3.msra.mxu1 %v1277_v5  ;;  %2308 = vmatpush3.msra.mxu0 %v1309_v6  ;;  %v1365_v6 = vld [vmem:[%s3941_s7 + $0x2e8] sm:$0xff] }
 0x24b   : > { %2274 = vmatprep.subr.mxu1 %v1292_v7  ;;  %2309 = vmatprep.subr.mxu0 %v1324_v8  ;;  %v1397_v7 = vld [vmem:[%s3941_s7 + $0x3e8] sm:$0xff] }
 0x24c   : > { %2275 = vmatpush3.msra.mxu1 %v1276_v9  ;;  %2310 = vmatpush3.msra.mxu0 %v1308_v10  ;;  %v1349_v8 = vld [vmem:[%s3941_s7 + $0x268] sm:$0xff] }
 0x24d   : > { %2276 = vmatprep.subr.mxu1 %v1291_v11  ;;  %2311 = vmatprep.subr.mxu0 %v1323_v12  ;;  %v1381_v9 = vld [vmem:[%s3941_s7 + $0x368] sm:$0xff]  ;;  %v1364_v12 = vld [vmem:[%s3941_s7 + $0x2e0] sm:$0xff] }
 0x24e   : > { %2277 = vmatpush3.msra.mxu1 %v1275_v13  ;;  %2312 = vmatpush3.msra.mxu0 %v1307_v14  ;;  %v1396_v13 = vld [vmem:[%s3941_s7 + $0x3e0] sm:$0xff] }
 0x24f   : > { %2278 = vmatprep.subr.mxu1 %v1290_v15  ;;  %2313 = vmatprep.subr.mxu0 %v1322_v16  ;;  %v1348_v16 = vld [vmem:[%s3941_s7 + $0x260] sm:$0xff] }
 0x250   : > { %2279 = vmatpush3.msra.mxu1 %v1274_v17  ;;  %2314 = vmatpush3.msra.mxu0 %v1306_v18  ;;  %v1380_v17 = vld [vmem:[%s3941_s7 + $0x360] sm:$0xff] }
 0x251   : > { %2280 = vmatprep.subr.mxu1 %v1289_v19  ;;  %2315 = vmatprep.subr.mxu0 %v1321_v20  ;;  %v1363_v20 = vld [vmem:[%s3941_s7 + $0x2d8] sm:$0xff] }
 0x252   : > { %2281 = vmatpush3.msra.mxu1 %v1273_v21  ;;  %2316 = vmatpush3.msra.mxu0 %v1305_v22  ;;  %v1395_v21 = vld [vmem:[%s3941_s7 + $0x3d8] sm:$0xff] }
 0x253   : > { %2282 = vmatprep.subr.mxu1 %v1288_v23  ;;  %2317 = vmatprep.subr.mxu0 %v1320_v24  ;;  %v1347_v22 = vld [vmem:[%s3941_s7 + $0x258] sm:$0xff]  ;;  %v1362_v24 = vld [vmem:[%s3941_s7 + $0x2d0] sm:$0xff] }
 0x254   : > { %2283 = vmatpush3.msra.mxu1 %v1272_v25  ;;  %2318 = vmatpush3.msra.mxu0 %v1304_v26  ;;  %v1379_v23 = vld [vmem:[%s3941_s7 + $0x358] sm:$0xff]  ;;  %v1394_v25 = vld [vmem:[%s3941_s7 + $0x3d0] sm:$0xff] }
 0x255   : > { %2322 = vmatprep.subr.mxu1 %v1367_v27  ;;  %2357 = vmatprep.subr.mxu0 %v1399_v28  ;;  %v1346_v26 = vld [vmem:[%s3941_s7 + $0x250] sm:$0xff]  ;;  %v1361_v28 = vld [vmem:[%s3941_s7 + $0x2c8] sm:$0xff] }
 0x256   : > { %v1378_v27 = vld [vmem:[%s3941_s7 + $0x350] sm:$0xff] }
 0x2d7   : > { %v754_v45 = vpop.f32.mrf.mxu1  ;;  %v825_v46 = vpop.f32.mrf.mxu0 }
 0x2d8   : > { %v755_v47 = vadd.f32 %v754_v45, %v608_v40  ;;  %v826_v48 = vadd.f32 %v825_v46, %v616_v41  ;;  %v1345_v40 = vld [vmem:[%s3941_s7 + $0x248] sm:$0xff]  ;;  %v1344_v45 = vld [vmem:[%s3941_s7 + $0x240] sm:$0xff] }
 0x2d9   : > { %v756_v49 = vpop.f32.mrf.mxu1  ;;  %v827_v50 = vpop.f32.mrf.mxu0  ;;  %v1377_v41 = vld [vmem:[%s3941_s7 + $0x348] sm:$0xff]  ;;  %v1376_v46 = vld [vmem:[%s3941_s7 + $0x340] sm:$0xff] }
 0x2da   : > { %v757_v51 = vadd.f32 %v756_v49, %v612_v43  ;;  %v828_v52 = vadd.f32 %v827_v50, %v620_v44  ;;  %v1256_v57 = vmax.f32 %v755_v47, 0.0  ;;  %v1258_v58 = vmax.f32 %v826_v48, 0.0  ;;  %v1360_v43 = vld [vmem:[%s3941_s7 + $0x2c0] sm:$0xff]  ;;  %v1359_v47 = vld [vmem:[%s3941_s7 + $0x2b8] sm:$0xff] }
 0x2db   : > { %v1392_v44 = vld [vmem:[%s3941_s7 + $0x3c0] sm:$0xff]  ;;  %v1391_v48 = vld [vmem:[%s3941_s7 + $0x3b8] sm:$0xff] }
 0x2dc   : > { %v1257_v55 = vmax.f32 %v757_v51, 0.0  ;;  %v1259_v56 = vmax.f32 %v828_v52, 0.0  ;;  %v1343_v49 = vld [vmem:[%s3941_s7 + $0x238] sm:$0xff]  ;;  %v1358_v51 = vld [vmem:[%s3941_s7 + $0x2b0] sm:$0xff] }
 0x2dd   : > { %v1375_v50 = vld [vmem:[%s3941_s7 + $0x338] sm:$0xff]  ;;  %v1390_v52 = vld [vmem:[%s3941_s7 + $0x3b0] sm:$0xff] }
 0x2de   : > { %1599 = vmatprep.mubr.f32.mxu1 %v1257_v55  ;;  %1669 = vmatprep.mubr.f32.mxu0 %v1259_v56  ;;  %v1342_v55 = vld [vmem:[%s3941_s7 + $0x230] sm:$0xff] }
 0x2df   : > { %1600 = vmatmul.mubr.f32.vlgmr.msra.gmra.mxu1 %v1256_v57  ;;  %1670 = vmatmul.mubr.f32.vlgmr.msra.gmra.mxu0 %v1258_v58  ;;  %v1374_v56 = vld [vmem:[%s3941_s7 + $0x330] sm:$0xff]  ;;  %v1357_v57 = vld [vmem:[%s3941_s7 + $0x2a8] sm:$0xff] }
 0x2e0   : > { %v3282_v4 = vpop.f32.mrf.mxu1  ;;  %v3284_v5 = vpop.f32.mrf.mxu0  ;;  %2323 = vmatpush3.msra.mxu1 %v1351_v59  ;;  %2358 = vmatpush3.msra.mxu0 %v1383_v60  ;;  %v1389_v58 = vld [vmem:[%s3941_s7 + $0x3a8] sm:$0xff] }
 0x2e1   : > { %2324 = vmatprep.subr.mxu1 %v1366_v61  ;;  %2359 = vmatprep.subr.mxu0 %v1398_v62  ;;  %v1341_v59 = vld [vmem:[%s3941_s7 + $0x228] sm:$0xff]  ;;  %v1356_v61 = vld [vmem:[%s3941_s7 + $0x2a0] sm:$0xff] }
 0x2e2   : > { %v898_v10 = vpop.f32.mrf.mxu1  ;;  %v969_v11 = vpop.f32.mrf.mxu0  ;;  %2325 = vmatpush3.msra.mxu1 %v1350_v2  ;;  %2360 = vmatpush3.msra.mxu0 %v1382_v3  ;;  %v1373_v60 = vld [vmem:[%s3941_s7 + $0x328] sm:$0xff]  ;;  %v1388_v62 = vld [vmem:[%s3941_s7 + $0x3a0] sm:$0xff]  ;;  %v1355_v3 = vld [vmem:[%s3941_s7 + $0x298] sm:$0xff] }
 0x2e3   : > { %v899_v14 = vadd.f32 %v898_v10, %v628_v63  ;;  %v970_v15 = vadd.f32 %v969_v11, %v636_v0  ;;  %2326 = vmatprep.subr.mxu1 %v1365_v6  ;;  %2361 = vmatprep.subr.mxu0 %v1397_v7  ;;  %v1340_v63 = vld [vmem:[%s3941_s7 + $0x220] sm:$0xff]  ;;  %v1387_v6 = vld [vmem:[%s3941_s7 + $0x398] sm:$0xff]  ;;  %v624_v7 = vrot.slane %v3240_v37, %v623_v1  ;;  %v1354_v1 = vld [vmem:[%s3941_s7 + $0x290] sm:$0xff] }
 0x2e4   : > { %2327 = vmatpush3.msra.mxu1 %v1349_v8  ;;  %2362 = vmatpush3.msra.mxu0 %v1381_v9  ;;  %v1372_v0 = vld [vmem:[%s3941_s7 + $0x320] sm:$0xff]  ;;  %v632_v8 = vrot.slane %v3240_v37, %v631_v33  ;;  %v1339_v10 = vld [vmem:[%s3941_s7 + $0x218] sm:$0xff]  ;;  %v1386_v33 = vld [vmem:[%s3941_s7 + $0x390] sm:$0xff]  ;;  %v644_v37 = vrot.slane %v3222_v31, %v611_v38 }
 0x2e5   : > { %v1261_v18 = vmax.f32 %v899_v14, 0.0  ;;  %v1263_v19 = vmax.f32 %v970_v15, 0.0  ;;  %2328 = vmatprep.subr.mxu1 %v1364_v12  ;;  %2363 = vmatprep.subr.mxu0 %v1396_v13  ;;  %v1371_v11 = vld [vmem:[%s3941_s7 + $0x318] sm:$0xff]  ;;  %v1338_v12 = vld [vmem:[%s3941_s7 + $0x210] sm:$0xff]  ;;  %v652_v15 = vrot.slane %v3222_v31, %v619_v39  ;;  %v1353_v38 = vld [vmem:[%s3941_s7 + $0x288] sm:$0xff] }
 0x2e6   : > { %2329 = vmatpush3.msra.mxu1 %v1348_v16  ;;  %2364 = vmatpush3.msra.mxu0 %v1380_v17  ;;  %v1370_v13 = vld [vmem:[%s3941_s7 + $0x310] sm:$0xff]  ;;  %v1385_v16 = vld [vmem:[%s3941_s7 + $0x388] sm:$0xff]  ;;  %v897_v17 = vadd.f32 %v3282_v4, %v624_v7  ;;  %v1384_v4 = vld [vmem:[%s3941_s7 + $0x380] sm:$0xff] }
 0x2e7   : > { %1739 = vmatprep.mubr.f32.mxu1 %v1261_v18  ;;  %1809 = vmatprep.mubr.f32.mxu0 %v1263_v19  ;;  %v968_v18 = vadd.f32 %v3284_v5, %v632_v8  ;;  %v1337_v39 = vld [vmem:[%s3941_s7 + $0x208] sm:$0xff] }
 0x2e8   : > { %2330 = vmatprep.subr.mxu1 %v1363_v20  ;;  %2365 = vmatprep.subr.mxu0 %v1395_v21  ;;  %v1369_v20 = vld [vmem:[%s3941_s7 + $0x308] sm:$0xff]  ;;  %v1352_v21 = vld [vmem:[%s3941_s7 + $0x280] sm:$0xff] }
 0x2e9   : > { %2331 = vmatpush3.msra.mxu1 %v1347_v22  ;;  %2366 = vmatpush3.msra.mxu0 %v1379_v23  ;;  %v1336_v22 = vld [vmem:[%s3941_s7 + $0x200] sm:$0xff]  ;;  %v1457_v7 = vld [vmem:[%s3941_s7 + $0x5c8] sm:$0xff] }
 0x2ea   : > { %2332 = vmatprep.subr.mxu1 %v1362_v24  ;;  %2367 = vmatprep.subr.mxu0 %v1394_v25  ;;  %v3406_v2 = vpop.f32.mrf.mxu1  ;;  %v3420_v9 = vpop.f32.mrf.mxu0  ;;  %v1368_v23 = vld [vmem:[%s3941_s7 + $0x300] sm:$0xff]  ;;  %v1260_v25 = vmax.f32 %v897_v17, 0.0  ;;  %v1409_v8 = vld [vmem:[%s3941_s7 + $0x448] sm:$0xff]  ;;  %v1406_v17 = vld [vmem:[%s3941_s7 + $0x430] sm:$0xff] }
 0x2eb   : > { %2333 = vmatpush3.msra.mxu1 %v1346_v26  ;;  %2368 = vmatpush3.msra.mxu0 %v1378_v27  ;;  %v1262_v26 = vmax.f32 %v968_v18, 0.0  ;;  %v1431_v27 = vld [vmem:[%s3941_s7 + $0x4f8] sm:$0xff]  ;;  %v1438_v18 = vld [vmem:[%s3941_s7 + $0x530] sm:$0xff] }
 0x2ec   : > { %2334 = vmatprep.subr.mxu1 %v1361_v28  ;;  %2369 = vmatprep.subr.mxu0 %v1393_v29  ;;  %v1040_v14 = vpop.f32.mrf.mxu1  ;;  %v1111_v19 = vpop.f32.mrf.mxu0  ;;  %v1463_v28 = vld [vmem:[%s3941_s7 + $0x5f8] sm:$0xff] }
 0x2ed   : > { %2335 = vmatpush3.msra.mxu1 %v1345_v40  ;;  %2370 = vmatpush3.msra.mxu0 %v1377_v41  ;;  %v1041_v5 = vadd.f32 %v1040_v14, %v644_v37  ;;  %v1112_v24 = vadd.f32 %v1111_v19, %v652_v15  ;;  %v1415_v29 = vld [vmem:[%s3941_s7 + $0x478] sm:$0xff]  ;;  %v1440_v37 = vld [vmem:[%s3941_s7 + $0x540] sm:$0xff]  ;;  %v1421_v19 = vld [vmem:[%s3941_s7 + $0x4a8] sm:$0xff] }
 0x2ee   : > { %2336 = vmatprep.subr.mxu1 %v1360_v43  ;;  %2371 = vmatprep.subr.mxu0 %v1392_v44  ;;  %v1447_v41 = vld [vmem:[%s3941_s7 + $0x578] sm:$0xff]  ;;  %v1430_v44 = vld [vmem:[%s3941_s7 + $0x4f0] sm:$0xff] }
 0x2ef   : > { %2337 = vmatpush3.msra.mxu1 %v1344_v45  ;;  %2372 = vmatpush3.msra.mxu0 %v1376_v46  ;;  %v1265_v40 = vmax.f32 %v1041_v5, 0.0  ;;  %v1267_v43 = vmax.f32 %v1112_v24, 0.0  ;;  %v1462_v45 = vld [vmem:[%s3941_s7 + $0x5f0] sm:$0xff]  ;;  %v1407_v14 = vld [vmem:[%s3941_s7 + $0x438] sm:$0xff]  ;;  %v1452_v5 = vld [vmem:[%s3941_s7 + $0x5a0] sm:$0xff] }
 0x2f0   : > { %2338 = vmatprep.subr.mxu1 %v1359_v47  ;;  %2373 = vmatprep.subr.mxu0 %v1391_v48  ;;  %v1414_v46 = vld [vmem:[%s3941_s7 + $0x470] sm:$0xff]  ;;  %v1429_v48 = vld [vmem:[%s3941_s7 + $0x4e8] sm:$0xff]  ;;  %v1439_v15 = vld [vmem:[%s3941_s7 + $0x538] sm:$0xff] }
 0x2f1   : > { %2339 = vmatpush3.msra.mxu1 %v1343_v49  ;;  %2374 = vmatpush3.msra.mxu0 %v1375_v50  ;;  %v1446_v47 = vld [vmem:[%s3941_s7 + $0x570] sm:$0xff]  ;;  %v1461_v49 = vld [vmem:[%s3941_s7 + $0x5e8] sm:$0xff] }
 0x2f2   : > { %2340 = vmatprep.subr.mxu1 %v1358_v51  ;;  %2375 = vmatprep.subr.mxu0 %v1390_v52  ;;  %v1413_v50 = vld [vmem:[%s3941_s7 + $0x468] sm:$0xff]  ;;  %v1428_v52 = vld [vmem:[%s3941_s7 + $0x4e0] sm:$0xff] }
 0x2f3   : > { %2341 = vmatpush3.msra.mxu1 %v1342_v55  ;;  %2376 = vmatpush3.msra.mxu0 %v1374_v56  ;;  %v1445_v51 = vld [vmem:[%s3941_s7 + $0x568] sm:$0xff]  ;;  %v1460_v55 = vld [vmem:[%s3941_s7 + $0x5e0] sm:$0xff] }
 0x2f4   : > { %2342 = vmatprep.subr.mxu1 %v1357_v57  ;;  %2377 = vmatprep.subr.mxu0 %v1389_v58  ;;  %v1412_v56 = vld [vmem:[%s3941_s7 + $0x460] sm:$0xff]  ;;  %v1427_v58 = vld [vmem:[%s3941_s7 + $0x4d8] sm:$0xff]  ;;  %v3616_v24 = vpop.f32.mrf.mxu1 }
 0x2f5   : > { %2343 = vmatpush3.msra.mxu1 %v1341_v59  ;;  %2378 = vmatpush3.msra.mxu0 %v1373_v60  ;;  %v1444_v57 = vld [vmem:[%s3941_s7 + $0x560] sm:$0xff]  ;;  %v1459_v59 = vld [vmem:[%s3941_s7 + $0x5d8] sm:$0xff] }
 0x2f6   : > { %2344 = vmatprep.subr.mxu1 %v1356_v61  ;;  %2379 = vmatprep.subr.mxu0 %v1388_v62  ;;  %v1411_v60 = vld [vmem:[%s3941_s7 + $0x458] sm:$0xff]  ;;  %v1426_v62 = vld [vmem:[%s3941_s7 + $0x4d0] sm:$0xff] }
 0x2f7   : > { %2345 = vmatpush3.msra.mxu1 %v1340_v63  ;;  %2380 = vmatpush3.msra.mxu0 %v1372_v0  ;;  %v1443_v61 = vld [vmem:[%s3941_s7 + $0x558] sm:$0xff]  ;;  %v1458_v63 = vld [vmem:[%s3941_s7 + $0x5d0] sm:$0xff] }
 0x2f8   : > { %2346 = vmatprep.subr.mxu1 %v1355_v3  ;;  %2381 = vmatprep.subr.mxu0 %v1387_v6  ;;  %v1410_v0 = vld [vmem:[%s3941_s7 + $0x450] sm:$0xff]  ;;  %v1425_v6 = vld [vmem:[%s3941_s7 + $0x4c8] sm:$0xff] }
 0x2f9   : > { %2347 = vmatpush3.msra.mxu1 %v1339_v10  ;;  %2382 = vmatpush3.msra.mxu0 %v1371_v11  ;;  %v1442_v3 = vld [vmem:[%s3941_s7 + $0x550] sm:$0xff]  ;;  %v1441_v10 = vld [vmem:[%s3941_s7 + $0x548] sm:$0xff]  ;;  %v1424_v11 = vld [vmem:[%s3941_s7 + $0x4c0] sm:$0xff] }
 0x2fa   : > { %2348 = vmatprep.subr.mxu1 %v1354_v1  ;;  %2383 = vmatprep.subr.mxu0 %v1386_v33  ;;  %v1456_v1 = vld [vmem:[%s3941_s7 + $0x5c0] sm:$0xff] }
 0x2fb   : > { %2349 = vmatpush3.msra.mxu1 %v1338_v12  ;;  %2384 = vmatpush3.msra.mxu0 %v1370_v13  ;;  %v1408_v33 = vld [vmem:[%s3941_s7 + $0x440] sm:$0xff]  ;;  %v1423_v12 = vld [vmem:[%s3941_s7 + $0x4b8] sm:$0xff] }
 0x2fc   : > { %2350 = vmatprep.subr.mxu1 %v1353_v38  ;;  %2385 = vmatprep.subr.mxu0 %v1385_v16  ;;  %v1455_v13 = vld [vmem:[%s3941_s7 + $0x5b8] sm:$0xff]  ;;  %v1422_v38 = vld [vmem:[%s3941_s7 + $0x4b0] sm:$0xff] }
 0x2fd   : > { %2351 = vmatpush3.msra.mxu1 %v1337_v39  ;;  %2386 = vmatpush3.msra.mxu0 %v1369_v20  ;;  %v1454_v16 = vld [vmem:[%s3941_s7 + $0x5b0] sm:$0xff]  ;;  %v1453_v39 = vld [vmem:[%s3941_s7 + $0x5a8] sm:$0xff] }
 0x2fe   : > { %2352 = vmatprep.subr.mxu1 %v1352_v21  ;;  %2387 = vmatprep.subr.mxu0 %v1384_v4  ;;  %v1405_v20 = vld [vmem:[%s3941_s7 + $0x428] sm:$0xff]  ;;  %v1420_v4 = vld [vmem:[%s3941_s7 + $0x4a0] sm:$0xff] }
 0x2ff   : > { %2353 = vmatpush3.msra.mxu1 %v1336_v22  ;;  %2388 = vmatpush3.msra.mxu0 %v1368_v23  ;;  %v1437_v21 = vld [vmem:[%s3941_s7 + $0x528] sm:$0xff]  ;;  %v1404_v22 = vld [vmem:[%s3941_s7 + $0x420] sm:$0xff] }
 0x300   : > { %1740 = vmatmul.mubr.f32.vlgmr.msra.gmra.mxu1 %v1260_v25  ;;  %1810 = vmatmul.mubr.f32.vlgmr.msra.gmra.mxu0 %v1262_v26  ;;  %v1436_v23 = vld [vmem:[%s3941_s7 + $0x520] sm:$0xff]  ;;  %v1419_v25 = vld [vmem:[%s3941_s7 + $0x498] sm:$0xff] }
 0x301   : > { %2392 = vmatprep.subr.mxu1 %v1431_v27  ;;  %2427 = vmatprep.subr.mxu0 %v1463_v28  ;;  %v1451_v26 = vld [vmem:[%s3941_s7 + $0x598] sm:$0xff]  ;;  %v640_v27 = vrot.slane %v3222_v31, %v607_v35  ;;  %v648_v28 = vrot.slane %v3222_v31, %v615_v36  ;;  %v1418_v35 = vld [vmem:[%s3941_s7 + $0x490] sm:$0xff] }
 0x302   : > { %2393 = vmatpush3.msra.mxu1 %v1415_v29  ;;  %1879 = vmatprep.mubr.f32.mxu1 %v1265_v40  ;;  %v3630_v29 = vpop.f32.mrf.mxu0  ;;  %v1403_v40 = vld [vmem:[%s3941_s7 + $0x418] sm:$0xff]  ;;  %v1450_v36 = vld [vmem:[%s3941_s7 + $0x590] sm:$0xff] }
 0x303   : > { %2428 = vmatpush3.msra.mxu0 %v1447_v41  ;;  %1949 = vmatprep.mubr.f32.mxu0 %v1267_v43  ;;  %v1435_v41 = vld [vmem:[%s3941_s7 + $0x518] sm:$0xff]  ;;  %v660_v43 = vrot.slane %v3222_v31, %v627_v53  ;;  %v1417_v53 = vld [vmem:[%s3941_s7 + $0x488] sm:$0xff] }
 0x304   : > { %2394 = vmatprep.subr.mxu1 %v1430_v44  ;;  %2429 = vmatprep.subr.mxu0 %v1462_v45  ;;  %v1402_v44 = vld [vmem:[%s3941_s7 + $0x410] sm:$0xff] }
 0x305   : > { %2395 = vmatpush3.msra.mxu1 %v1414_v46  ;;  %2430 = vmatpush3.msra.mxu0 %v1446_v47  ;;  %v1434_v45 = vld [vmem:[%s3941_s7 + $0x510] sm:$0xff]  ;;  %v1182_v46 = vpop.f32.mrf.mxu1  ;;  %v668_v47 = vrot.slane %v3222_v31, %v635_v54  ;;  %v1433_v31 = vld [vmem:[%s3941_s7 + $0x508] sm:$0xff]  ;;  %v1416_v54 = vld [vmem:[%s3941_s7 + $0x480] sm:$0xff] }
 0x306   : > { %2396 = vmatprep.subr.mxu1 %v1429_v48  ;;  %2431 = vmatprep.subr.mxu0 %v1461_v49  ;;  %v1449_v48 = vld [vmem:[%s3941_s7 + $0x588] sm:$0xff]  ;;  %v1039_v49 = vadd.f32 %v3406_v2, %v640_v27  ;;  %v1448_v2 = vld [vmem:[%s3941_s7 + $0x580] sm:$0xff] }
 0x307   : > { %2397 = vmatpush3.msra.mxu1 %v1413_v50  ;;  %2432 = vmatpush3.msra.mxu0 %v1445_v51  ;;  %v1110_v50 = vadd.f32 %v3420_v9, %v648_v28  ;;  %v1253_v51 = vpop.f32.mrf.mxu0  ;;  %v1183_v9 = vadd.f32 %v1182_v46, %v660_v43  ;;  %v1504_v27 = vld [vmem:[%s3941_s7 + $0x740] sm:$0xff]  ;;  %v1487_v28 = vld [vmem:[%s3941_s7 + $0x6b8] sm:$0xff]  ;;  %v1518_v43 = vld [vmem:[%s3941_s7 + $0x7b0] sm:$0xff] }
 0x308   : > { %2398 = vmatprep.subr.mxu1 %v1428_v52  ;;  %2433 = vmatprep.subr.mxu0 %v1460_v55  ;;  %v1400_v52 = vld [vmem:[%s3941_s7 + $0x400] sm:$0xff]  ;;  %v1485_v46 = vld [vmem:[%s3941_s7 + $0x6a8] sm:$0xff] }
 0x309   : > { %2399 = vmatpush3.msra.mxu1 %v1412_v56  ;;  %2434 = vmatpush3.msra.mxu0 %v1444_v57  ;;  %v1432_v55 = vld [vmem:[%s3941_s7 + $0x500] sm:$0xff]  ;;  %v1254_v56 = vadd.f32 %v1253_v51, %v668_v47  ;;  %v1264_v57 = vmax.f32 %v1039_v49, 0.0  ;;  %v1517_v47 = vld [vmem:[%s3941_s7 + $0x7a8] sm:$0xff] }
 0x30a   : > { %2400 = vmatprep.subr.mxu1 %v1427_v58  ;;  %2435 = vmatprep.subr.mxu0 %v1459_v59  ;;  %v1266_v58 = vmax.f32 %v1110_v50, 0.0  ;;  %v1495_v59 = vld [vmem:[%s3941_s7 + $0x6f8] sm:$0xff]  ;;  %v1484_v49 = vld [vmem:[%s3941_s7 + $0x6a0] sm:$0xff] }
 0x30b   : > { %2401 = vmatpush3.msra.mxu1 %v1411_v60  ;;  %2436 = vmatpush3.msra.mxu0 %v1443_v61  ;;  %v1527_v60 = vld [vmem:[%s3941_s7 + $0x7f8] sm:$0xff]  ;;  %v1516_v50 = vld [vmem:[%s3941_s7 + $0x7a0] sm:$0xff] }
 0x30c   : > { %2402 = vmatprep.subr.mxu1 %v1426_v62  ;;  %2437 = vmatprep.subr.mxu0 %v1458_v63  ;;  %v1479_v61 = vld [vmem:[%s3941_s7 + $0x678] sm:$0xff]  ;;  %v1269_v62 = vmax.f32 %v1183_v9, 0.0  ;;  %v1468_v51 = vld [vmem:[%s3941_s7 + $0x620] sm:$0xff] }
 0x30d   : > { %2403 = vmatpush3.msra.mxu1 %v1410_v0  ;;  %2438 = vmatpush3.msra.mxu0 %v1442_v3  ;;  %v1511_v63 = vld [vmem:[%s3941_s7 + $0x778] sm:$0xff]  ;;  %v1271_v0 = vmax.f32 %v1254_v56, 0.0  ;;  %v1494_v3 = vld [vmem:[%s3941_s7 + $0x6f0] sm:$0xff] }
 0x30e   : > { %2404 = vmatprep.subr.mxu1 %v1425_v6  ;;  %2439 = vmatprep.subr.mxu0 %v1457_v7  ;;  %v1526_v6 = vld [vmem:[%s3941_s7 + $0x7f0] sm:$0xff]  ;;  %v1499_v9 = vld [vmem:[%s3941_s7 + $0x718] sm:$0xff] }
 0x30f   : > { %2405 = vmatpush3.msra.mxu1 %v1409_v8  ;;  %2440 = vmatpush3.msra.mxu0 %v1441_v10  ;;  %v1478_v7 = vld [vmem:[%s3941_s7 + $0x670] sm:$0xff]  ;;  %v1493_v10 = vld [vmem:[%s3941_s7 + $0x6e8] sm:$0xff] }
 0x310   : > { %2406 = vmatprep.subr.mxu1 %v1424_v11  ;;  %2441 = vmatprep.subr.mxu0 %v1456_v1  ;;  %v1510_v8 = vld [vmem:[%s3941_s7 + $0x770] sm:$0xff]  ;;  %v1525_v11 = vld [vmem:[%s3941_s7 + $0x7e8] sm:$0xff] }
 0x311   : > { %2407 = vmatpush3.msra.mxu1 %v1408_v33  ;;  %2442 = vmatpush3.msra.mxu0 %v1440_v37  ;;  %v1477_v1 = vld [vmem:[%s3941_s7 + $0x668] sm:$0xff]  ;;  %v1492_v37 = vld [vmem:[%s3941_s7 + $0x6e0] sm:$0xff]  ;;  %v1466_v56 = vld [vmem:[%s3941_s7 + $0x610] sm:$0xff] }
 0x312   : > { %2408 = vmatprep.subr.mxu1 %v1423_v12  ;;  %2443 = vmatprep.subr.mxu0 %v1455_v13  ;;  %v1509_v33 = vld [vmem:[%s3941_s7 + $0x768] sm:$0xff]  ;;  %v1524_v12 = vld [vmem:[%s3941_s7 + $0x7e0] sm:$0xff] }
 0x313   : > { %2409 = vmatpush3.msra.mxu1 %v1407_v14  ;;  %2444 = vmatpush3.msra.mxu0 %v1439_v15  ;;  %v1476_v13 = vld [vmem:[%s3941_s7 + $0x660] sm:$0xff]  ;;  %v1491_v15 = vld [vmem:[%s3941_s7 + $0x6d8] sm:$0xff] }
 0x314   : > { %2410 = vmatprep.subr.mxu1 %v1422_v38  ;;  %2445 = vmatprep.subr.mxu0 %v1454_v16  ;;  %v1508_v14 = vld [vmem:[%s3941_s7 + $0x760] sm:$0xff]  ;;  %v1523_v38 = vld [vmem:[%s3941_s7 + $0x7d8] sm:$0xff] }
 0x315   : > { %2411 = vmatpush3.msra.mxu1 %v1406_v17  ;;  %2446 = vmatpush3.msra.mxu0 %v1438_v18  ;;  %v1475_v16 = vld [vmem:[%s3941_s7 + $0x658] sm:$0xff]  ;;  %v1490_v18 = vld [vmem:[%s3941_s7 + $0x6d0] sm:$0xff] }
 0x316   : > { %2412 = vmatprep.subr.mxu1 %v1421_v19  ;;  %2447 = vmatprep.subr.mxu0 %v1453_v39  ;;  %v1507_v17 = vld [vmem:[%s3941_s7 + $0x758] sm:$0xff]  ;;  %v1522_v19 = vld [vmem:[%s3941_s7 + $0x7d0] sm:$0xff] }
 0x317   : > { %2413 = vmatpush3.msra.mxu1 %v1405_v20  ;;  %2448 = vmatpush3.msra.mxu0 %v1437_v21  ;;  %v1474_v39 = vld [vmem:[%s3941_s7 + $0x650] sm:$0xff]  ;;  %v1489_v21 = vld [vmem:[%s3941_s7 + $0x6c8] sm:$0xff] }
 0x318   : > { %2414 = vmatprep.subr.mxu1 %v1420_v4  ;;  %2449 = vmatprep.subr.mxu0 %v1452_v5  ;;  %v1506_v20 = vld [vmem:[%s3941_s7 + $0x750] sm:$0xff]  ;;  %v1521_v4 = vld [vmem:[%s3941_s7 + $0x7c8] sm:$0xff] }
 0x319   : > { %2415 = vmatpush3.msra.mxu1 %v1404_v22  ;;  %2450 = vmatpush3.msra.mxu0 %v1436_v23  ;;  %v1473_v5 = vld [vmem:[%s3941_s7 + $0x648] sm:$0xff]  ;;  %v1488_v23 = vld [vmem:[%s3941_s7 + $0x6c0] sm:$0xff] }
 0x31a   : > { %2416 = vmatprep.subr.mxu1 %v1419_v25  ;;  %2451 = vmatprep.subr.mxu0 %v1451_v26  ;;  %v1505_v22 = vld [vmem:[%s3941_s7 + $0x748] sm:$0xff]  ;;  %v1520_v25 = vld [vmem:[%s3941_s7 + $0x7c0] sm:$0xff] }
 0x31b   : > { %2417 = vmatpush3.msra.mxu1 %v1403_v40  ;;  %2452 = vmatpush3.msra.mxu0 %v1435_v41  ;;  %v1472_v26 = vld [vmem:[%s3941_s7 + $0x640] sm:$0xff]  ;;  %v1519_v40 = vld [vmem:[%s3941_s7 + $0x7b8] sm:$0xff] }
 0x31c   : > { %2418 = vmatprep.subr.mxu1 %v1418_v35  ;;  %2453 = vmatprep.subr.mxu0 %v1450_v36  ;;  %v1471_v41 = vld [vmem:[%s3941_s7 + $0x638] sm:$0xff]  ;;  %v1486_v36 = vld [vmem:[%s3941_s7 + $0x6b0] sm:$0xff] }
 0x31d   : > { %2419 = vmatpush3.msra.mxu1 %v1402_v44  ;;  %2454 = vmatpush3.msra.mxu0 %v1434_v45  ;;  %v1503_v35 = vld [vmem:[%s3941_s7 + $0x738] sm:$0xff]  ;;  %v1470_v44 = vld [vmem:[%s3941_s7 + $0x630] sm:$0xff] }
 0x31e   : > { %2420 = vmatprep.subr.mxu1 %v1417_v53  ;;  %2455 = vmatprep.subr.mxu0 %v1449_v48  ;;  %v1502_v45 = vld [vmem:[%s3941_s7 + $0x730] sm:$0xff]  ;;  %v1469_v53 = vld [vmem:[%s3941_s7 + $0x628] sm:$0xff] }
 0x31f   : > { %2421 = vmatpush3.msra.mxu1 %v1401_v30  ;;  %2456 = vmatpush3.msra.mxu0 %v1433_v31  ;;  %v1501_v48 = vld [vmem:[%s3941_s7 + $0x728] sm:$0xff]  ;;  %v1500_v30 = vld [vmem:[%s3941_s7 + $0x720] sm:$0xff]  ;;  %v1483_v31 = vld [vmem:[%s3941_s7 + $0x698] sm:$0xff] }
 0x320   : > { %2422 = vmatprep.subr.mxu1 %v1416_v54  ;;  %2457 = vmatprep.subr.mxu0 %v1448_v2  ;;  %v1515_v54 = vld [vmem:[%s3941_s7 + $0x798] sm:$0xff] }
 0x321   : > { %2423 = vmatpush3.msra.mxu1 %v1400_v52  ;;  %2458 = vmatpush3.msra.mxu0 %v1432_v55  ;;  %v1467_v2 = vld [vmem:[%s3941_s7 + $0x618] sm:$0xff]  ;;  %v1482_v52 = vld [vmem:[%s3941_s7 + $0x690] sm:$0xff] }
 0x322   : > { %1880 = vmatmul.mubr.f32.vlgmr.msra.gmra.mxu1 %v1264_v57  ;;  %1950 = vmatmul.mubr.f32.vlgmr.msra.gmra.mxu0 %v1266_v58  ;;  %v1514_v55 = vld [vmem:[%s3941_s7 + $0x790] sm:$0xff]  ;;  %v1481_v58 = vld [vmem:[%s3941_s7 + $0x688] sm:$0xff] }
 0x323   : > { %2462 = vmatprep.subr.mxu1 %v1495_v59  ;;  %2497 = vmatprep.subr.mxu0 %v1527_v60  ;;  %v1498_v57 = vld [vmem:[%s3941_s7 + $0x710] sm:$0xff]  ;;  %v1513_v59 = vld [vmem:[%s3941_s7 + $0x788] sm:$0xff]  ;;  %v1181_v60 = vadd.f32 %v3616_v24, %v3227_v32  ;;  %v1512_v32 = vld [vmem:[%s3941_s7 + $0x780] sm:$0xff] }
 0x324   : > { %2463 = vmatpush3.msra.mxu1 %v1479_v61  ;;  %2019 = vmatprep.mubr.f32.mxu1 %v1269_v62  ;;  %v1252_v61 = vadd.f32 %v3630_v29, %v3233_v34  ;;  %v1465_v62 = vld [vmem:[%s3941_s7 + $0x608] sm:$0xff]  ;;  %v1464_v34 = vld [vmem:[%s3941_s7 + $0x600] sm:$0xff] }
 0x325   : > { %2498 = vmatpush3.msra.mxu0 %v1511_v63  ;;  %2089 = vmatprep.mubr.f32.mxu0 %v1271_v0  ;;  %v1497_v63 = vld [vmem:[%s3941_s7 + $0x708] sm:$0xff]  ;;  %v1480_v0 = vld [vmem:[%s3941_s7 + $0x680] sm:$0xff]  ;;  %v1268_v29 = vmax.f32 %v1181_v60, 0.0 }
 0x326   : > { %2464 = vmatprep.subr.mxu1 %v1494_v3  ;;  %2499 = vmatprep.subr.mxu0 %v1526_v6  ;;  %v1496_v24 = vld [vmem:[%s3941_s7 + $0x700] sm:$0xff]  ;;  %v1270_v3 = vmax.f32 %v1252_v61, 0.0 }
 0x327   : > { %2465 = vmatpush3.msra.mxu1 %v1478_v7  ;;  %2500 = vmatpush3.msra.mxu0 %v1510_v8 }
 0x328   : > { %2466 = vmatprep.subr.mxu1 %v1493_v10  ;;  %2501 = vmatprep.subr.mxu0 %v1525_v11 }
 0x329   : > { %2467 = vmatpush3.msra.mxu1 %v1477_v1  ;;  %2502 = vmatpush3.msra.mxu0 %v1509_v33  ;;  %v2239_v1 = vld [vmem:[%s3942_s8] ss:$0 sm:$0xff] }
 0x32a   : > { %2468 = vmatprep.subr.mxu1 %v1492_v37  ;;  %2503 = vmatprep.subr.mxu0 %v1524_v12 }
 0x32b   : > { %2469 = vmatpush3.msra.mxu1 %v1476_v13  ;;  %2504 = vmatpush3.msra.mxu0 %v1508_v14 }
 0x32c   : > { %2470 = vmatprep.subr.mxu1 %v1491_v15  ;;  %2505 = vmatprep.subr.mxu0 %v1523_v38 }
 0x32d   : > { %2471 = vmatpush3.msra.mxu1 %v1475_v16  ;;  %2506 = vmatpush3.msra.mxu0 %v1507_v17 }
 0x32e   : > { %2472 = vmatprep.subr.mxu1 %v1490_v18  ;;  %2507 = vmatprep.subr.mxu0 %v1522_v19 }
 0x32f   : > { %2473 = vmatpush3.msra.mxu1 %v1474_v39  ;;  %2508 = vmatpush3.msra.mxu0 %v1506_v20 }
 0x330   : > { %2474 = vmatprep.subr.mxu1 %v1489_v21  ;;  %2509 = vmatprep.subr.mxu0 %v1521_v4 }
 0x331   : > { %2475 = vmatpush3.msra.mxu1 %v1473_v5  ;;  %2510 = vmatpush3.msra.mxu0 %v1505_v22 }
 0x332   : > { %2476 = vmatprep.subr.mxu1 %v1488_v23  ;;  %2511 = vmatprep.subr.mxu0 %v1520_v25 }
 0x333   : > { %2477 = vmatpush3.msra.mxu1 %v1472_v26  ;;  %2512 = vmatpush3.msra.mxu0 %v1504_v27 }
 0x334   : > { %2478 = vmatprep.subr.mxu1 %v1487_v28  ;;  %2513 = vmatprep.subr.mxu0 %v1519_v40 }
 0x335   : > { %2479 = vmatpush3.msra.mxu1 %v1471_v41  ;;  %2514 = vmatpush3.msra.mxu0 %v1503_v35 }
 0x336   : > { %2480 = vmatprep.subr.mxu1 %v1486_v36  ;;  %2515 = vmatprep.subr.mxu0 %v1518_v43 }
 0x337   : > { %2481 = vmatpush3.msra.mxu1 %v1470_v44  ;;  %2516 = vmatpush3.msra.mxu0 %v1502_v45 }
 0x338   : > { %2482 = vmatprep.subr.mxu1 %v1485_v46  ;;  %2517 = vmatprep.subr.mxu0 %v1517_v47 }
 0x339   : > { %2483 = vmatpush3.msra.mxu1 %v1469_v53  ;;  %2518 = vmatpush3.msra.mxu0 %v1501_v48 }
 0x33a   : > { %2484 = vmatprep.subr.mxu1 %v1484_v49  ;;  %2519 = vmatprep.subr.mxu0 %v1516_v50 }
 0x33b   : > { %2485 = vmatpush3.msra.mxu1 %v1468_v51  ;;  %2520 = vmatpush3.msra.mxu0 %v1500_v30 }
 0x33c   : > { %2486 = vmatprep.subr.mxu1 %v1483_v31  ;;  %2521 = vmatprep.subr.mxu0 %v1515_v54 }
 0x33d   : > { %2487 = vmatpush3.msra.mxu1 %v1467_v2  ;;  %2522 = vmatpush3.msra.mxu0 %v1499_v9  ;;  %v2241_v2 = vld [vmem:[%s3944_s10] ss:$0 sm:$0xff] }
 0x33e   : > { %2488 = vmatprep.subr.mxu1 %v1482_v52  ;;  %2523 = vmatprep.subr.mxu0 %v1514_v55  ;;  %v2242_v52 = vld [vmem:[%s3945_s11] ss:$0 sm:$0xff] }
 0x33f   : > { %2489 = vmatpush3.msra.mxu1 %v1466_v56  ;;  %2524 = vmatpush3.msra.mxu0 %v1498_v57 }
 0x340   : > { %2490 = vmatprep.subr.mxu1 %v1481_v58  ;;  %2525 = vmatprep.subr.mxu0 %v1513_v59 }
 0x341   : > { %2491 = vmatpush3.msra.mxu1 %v1465_v62  ;;  %2526 = vmatpush3.msra.mxu0 %v1497_v63 }
 0x342   : > { %2492 = vmatprep.subr.mxu1 %v1480_v0  ;;  %2527 = vmatprep.subr.mxu0 %v1512_v32 }
 0x343   : > { %2493 = vmatpush3.msra.mxu1 %v1464_v34  ;;  %2528 = vmatpush3.msra.mxu0 %v1496_v24 }
 0x344   : > { %2020 = vmatmul.mubr.f32.vlgmr.msra.gmra.mxu1 %v1268_v29  ;;  %2090 = vmatmul.mubr.f32.vlgmr.msra.gmra.mxu0 %v1270_v3 }
 0x39f   : > { %v2284_v6 = vpop.f32.mrf.mxu1  ;;  %v2319_v8 = vpop.f32.mrf.mxu0 }
 0x3a1   : > { %v2285_v7 = vpop.f32.mrf.mxu1  ;;  %v2320_v33 = vpop.f32.mrf.mxu0 }
 0x3a2   : > { %v2286_v11 = vadd.f32 %v2285_v7, %v2284_v6  ;;  %v2321_v15 = vadd.f32 %v2320_v33, %v2319_v8 }
 0x3a4   : > { %v1602_v12 = vadd.f32 %v2286_v11, %v2239_v1 }
 0x3a6   : > { %v1672_v16 = vadd.f32 %v2321_v15, %v1602_v12 }
 0x3c0   : > { %v2354_v10 = vpop.f32.mrf.mxu1  ;;  %v2389_v13 = vpop.f32.mrf.mxu0 }
 0x3c2   : > { %v2355_v37 = vpop.f32.mrf.mxu1  ;;  %v2390_v17 = vpop.f32.mrf.mxu0 }
 0x3c3   : > { %v2356_v38 = vadd.f32 %v2355_v37, %v2354_v10  ;;  %v2391_v20 = vadd.f32 %v2390_v17, %v2389_v13 }
 0x3c5   : > { %v1742_v19 = vadd.f32 %v2356_v38, %v1672_v16 }
 0x3c7   : > { %v1812_v4 = vadd.f32 %v2391_v20, %v1742_v19 }
 0x3e2   : > { %v2424_v14 = vpop.f32.mrf.mxu1  ;;  %v2459_v39 = vpop.f32.mrf.mxu0 }
 0x3e4   : > { %v2425_v18 = vpop.f32.mrf.mxu1  ;;  %v2460_v5 = vpop.f32.mrf.mxu0 }
 0x3e5   : > { %v2426_v21 = vadd.f32 %v2425_v18, %v2424_v14  ;;  %v2461_v26 = vadd.f32 %v2460_v5, %v2459_v39 }
 0x3e7   : > { %v1882_v22 = vadd.f32 %v2426_v21, %v1812_v4 }
 0x3e9   : > { %v1952_v40 = vadd.f32 %v2461_v26, %v1882_v22 }
 0x404   : > { %v2494_v23 = vpop.f32.mrf.mxu1  ;;  %v2529_v25 = vpop.f32.mrf.mxu0 }
 0x406   : > { %v2495_v27 = vpop.f32.mrf.mxu1  ;;  %v2530_v28 = vpop.f32.mrf.mxu0 }
 0x407   : > { %v2496_v41 = vadd.f32 %v2495_v27, %v2494_v23  ;;  %v2531_v36 = vadd.f32 %v2530_v28, %v2529_v25 }
 0x409   : > { %v2022_v35 = vadd.f32 %v2496_v41, %v1952_v40 }
 0x40b   : > { %v2092_v43 = vadd.f32 %v2531_v36, %v2022_v35 }
 0x40d   : > { %v2095_v44 = vadd.f32 %v2092_v43, %v2856_v42  ;;  %v2240_v42 = vld [vmem:[%s3943_s9] ss:$0 sm:$0xff] }
 0x40f   : > { %v2096_v45 = vsel %vm431_vm1, %v2095_v44, 0.0 }
 0x410   : > { %2097 = vadd.xlane.f32.xlu1 %v2096_v45 }
 0x499   : > { %v2098_v46 = vpop.xlane.xlu1 %2097 }
 0x49a   : > { %v2099_v47 = vmul.f32 0.03125, %v2098_v46 }
 0x49c   : > { %v2100_v53 = vsub.f32 %v2095_v44, %v2099_v47 }
 0x49e   : > { %v2101_v48 = vmul.f32 %v2100_v53, %v2100_v53 }
 0x4a0   : > { %v2102_v49 = vsel %vm431_vm1, %v2101_v48, 0.0 }
 0x4a1   : > { %2103 = vadd.xlane.f32.xlu1 %v2102_v49 }
 0x52a   : > { %v2104_v50 = vpop.xlane.xlu1 %2103 }
 0x52b   : > { %v2105_v51 = vmul.f32 0.03125, %v2104_v50 }
 0x52d   : > { %v2106_v30 = vadd.f32 1e-05, %v2105_v51 }
 0x52f   : > { %2586 = vrsqrt.f32 %v2106_v30 }
 0x53c   : > { %v2587_v31 = vpop.eup %2586 }
 0x53d   : > { %v2108_v54 = vmul.f32 %v2587_v31, %v2100_v53 }
 0x53f   : > { %v2116_v9 = vmul.f32 %v2240_v42, %v2108_v54 }
 0x541   : > { %v2124_v55 = vadd.f32 %v2241_v2, %v2116_v9 }
 0x543   : > { %vm2125_vm2 = vcmp.gt.f32.partialorder %v2124_v55, 0.0  ;;  %v2133_v56 = vmul.f32 %v2242_v52, %v2124_v55 }
 0x545   : > { %v2134_v57 = vsel %vm2125_vm2, %v2124_v55, %v2133_v56 }
 0x546   : > { %2135 = vst.msk [vmem:[%s417_s26] sm:$0xff] %vm431_vm1, %v2134_v57 }
 0x547   : > { %2601 = shalt.err (!%p2598_p3)
}
 0x548   : > { %s2602_s2 = scalar_lea.hbm %s3898_s28, 128  ;;  %s2606_s0 = scalar_lea.hbm %s3946_s12, 256 }
 0x549   : > { %p2603_p4 = scmp.ne.s32.totalorder %s3898_s28, %s2602_s2  ;;  %p2607_p9 = scmp.lt.s32.totalorder %s3898_s28, %s3946_s12 }
 0x54a   : > { %p2608_p10 = scmp.lt.s32.totalorder %s2606_s0, %s2602_s2 }
 0x54b   : > { %p2604_p7 = pnand %p2603_p4, %p2756_p5 }
 0x54c   : > { %p2609_p11 = por %p2608_p10, %p2607_p9 }
 0x54d   : > { %p2605_p8 = pneg %p2604_p7 }
 0x54f   : > { %p2610_p12 = pnand %p2609_p11, %p2605_p8 }
 0x551   : > { %2613 = shalt.err (!%p2610_p12)
}
 0x552   : > { %2543 = dma.vmem_to_hbm [thread:$0]  (%p2756_p5), %s2151_s1, 128, %s3898_s28, %s2137_s17  }
 0x553 PF: > { %p2549_p13 = scmp.ge.s32.totalorder %s2648_s24, 2  ;;  %s2162_s18 = sand.u32 1, %s2636_s21  }
 0x554   : > { %s2163_s25 = scalar_lea.sflag [#allocation3], %s2162_s18 }
 0x555   : > { %p2546_p0 = pnand %p2549_p13, %p2760_p6 }
 0x557   : > { %p2547_p1 = pneg %p2546_p0 }
 0x559   : > { %2631 = dma.done.wait (%p2547_p1), %s2163_s25, 128  }
 0x55a   : > { %2633 = vsyncadd (%p2547_p1), %s2163_s25, 4294967168  ;;  %p22_p2 = scmp.ge.s32.totalorder %s2743_s27, 4   ;;  %s3955_s21 = smov %s2640_s22 }
 0x55b   : > { %s3956_s22 = smov %s2644_s23  ;;  %s3957_s23 = smov %s2754_s30 }
 0x55c   : > { %s3958_s24 = smov %s2743_s27  ;;  %24 = sbr.rel (!%p22_p2) target bundleno = 7 (0x7), region = 106 }
 0x561   :  { %2168 = vsyncpa [#allocation3], 1 }
 0x562   :  { %2170 = vsyncpa [#allocation3 + $0x1], 1 }

</bundles_post_ra>
